<compile_context>
chip_gen: v5e
topology: v5e:2x2
jax: 0.10.0
libtpu: 0.0.40
codegen_flags: <defaults>
</compile_context>

<pallas_src>
import functools

import numpy as np
import jax
import jax.numpy as jnp
from jax.experimental import pallas as pl
from jax.experimental.pallas import tpu as pltpu


# ----------------------------------------------------------------------------
# Pallas kernel
# ----------------------------------------------------------------------------
def _shift_lanes(v, k):
    """out[:, t] = v[:, t + k] (circular wrap; wrapped positions are unused)."""
    return jnp.concatenate([v[:, k:], v[:, :k]], axis=1)


def dtgn_kernel(tile_b, n_nodes, x_ref, m2_ref, m4_ref, m6_ref, w8_ref,
                wbig_ref, blin_ref, scal_ref, out_ref):
    f32 = jnp.float32
    w00 = scal_ref[0]
    w01 = scal_ref[1]

    # ---- layers 0-1: Conv1d(k=2,s=2) + MaxPool(3) + ReLU, pure VPU/XLU -----
    # d[t] = w0*x[t] + w1*x[t+1]; e[t] = max(d[t], d[t+2], d[t+4]);
    # the true layer-1 output is y[j] = relu(e[6j] + b0): only columns 6j
    # matter, everything else is zeroed by the stage-2 operator matrix.
    x = x_ref[...]                                               # (TR, T)
    d = w00 * x + w01 * _shift_lanes(x, 1)
    e = jnp.maximum(d, _shift_lanes(d, 2))
    e = jnp.maximum(e, _shift_lanes(d, 4))
    y = jnp.maximum(e + scal_ref[2], 0.0)                        # (TR, T)

    # ---- layers 2-3: conv(k=4,s=2,p=1)+pool(2) fused (+ stride-6 select) ---
    h = m2_ref.shape[-1] // 2
    r = jnp.dot(y, m2_ref[...], preferred_element_type=f32)      # (TR, 2*L4)
    y = jnp.maximum(jnp.maximum(r[:, :h], r[:, h:]) + scal_ref[3], 0.0)

    # ---- layers 4-5 ---------------------------------------------------------
    h = m4_ref.shape[-1] // 2
    r = jnp.dot(y, m4_ref[...], preferred_element_type=f32)      # (TR, 2*L6)
    y = jnp.maximum(jnp.maximum(r[:, :h], r[:, h:]) + scal_ref[4], 0.0)

    # ---- layers 6-7 ---------------------------------------------------------
    h = m6_ref.shape[-1] // 2
    r = jnp.dot(y, m6_ref[...], preferred_element_type=f32)      # (TR, 2*3)
    y = jnp.maximum(jnp.maximum(r[:, :h], r[:, h:]) + scal_ref[5], 0.0)

    # ---- layer 8: Conv1d(k=3) -> one value per (batch, node) row -----------
    # (its bias has been folded into blin_ref in the wrapper)
    v = jnp.sum(y * w8_ref[...], axis=1, keepdims=True)          # (TR, 1)

    # ---- classifier Linear(n_nodes -> 3) + softmax --------------------------
    # per-batch node sum done as an in-kernel reshape + reduction (no P matrix)
    contrib = v * wbig_ref[...]                                  # (TR, 3)
    logits = (jnp.sum(contrib.reshape(tile_b, n_nodes, 3), axis=1)
              + blin_ref[...])                                   # (TB, 3)
    m = jnp.max(logits, axis=1, keepdims=True)
    ez = jnp.exp(logits - m)
    out_ref[...] = ez / jnp.sum(ez, axis=1, keepdims=True)


# ----------------------------------------------------------------------------
# weight-independent operator bases (cached, vectorized numpy)
# ----------------------------------------------------------------------------
@functools.lru_cache(maxsize=None)
def _conv_pool_basis(L_in, k_conv, stride, pad, k_pool):
    """basis[m, t, i, j] = 1 iff input i feeds conv tap t of pool candidate m
    of pooled output j."""
    L_conv = (L_in + 2 * pad - k_conv) // stride + 1
    L_out = L_conv // k_pool
    B = np.zeros((k_pool, k_conv, L_in, L_out), dtype=np.float32)
    j = np.arange(L_out)
    for m in range(k_pool):
        for t in range(k_conv):
            idx = (j * k_pool + m) * stride + t - pad
            ok = (idx >= 0) & (idx < L_in)
            B[m, t, idx[ok], j[ok]] = 1.0
    return B, L_out


def _packed_conv_pool(w, L_in, k_conv, stride, pad, k_pool):
    """(L_in, k_pool*L_out) operator; candidate m lives in column block m."""
    B, L_out = _conv_pool_basis(L_in, k_conv, stride, pad, k_pool)
    M = jnp.einsum('t,mtij->mij', w.astype(jnp.float32), jnp.asarray(B))
    return jnp.concatenate(list(M), axis=1), L_out


def _pick_tile_batch(bs, n_nodes, target_rows=1024):
    """Largest batch tile with tile_r <= target_rows, layout-legal blocks and
    (preferably) a grid of length >= 2 for pipelining / v7x dual-core."""
    def ok(tb):
        tr = tb * n_nodes
        return (bs % tb == 0
                and (tb % 8 == 0 or tb == bs)
                and (tr % 8 == 0 or tb == bs))
    cands = [tb for tb in range(1, bs + 1)
             if ok(tb) and tb * n_nodes <= target_rows]
    multi = [tb for tb in cands if bs // tb >= 2]
    if multi:
        return max(multi)
    if cands:
        return max(cands)
    return bs


# ----------------------------------------------------------------------------
# wrapper (jit-safe)
# ----------------------------------------------------------------------------
def deep_time_graph_net_forward(x, params, tile_batch=None):
    """x: (bs, n_nodes, T) float32 -> (bs, 3) softmax probabilities."""
    bs, n_nodes, T = x.shape
    conv_w, conv_b, W_lin, b_lin = params

    if tile_batch is None:
        tile_batch = _pick_tile_batch(bs, n_nodes)
    assert bs % tile_batch == 0, "tile_batch must divide batch size"
    tile_r = tile_batch * n_nodes
    R = bs * n_nodes
    assert tile_r % 8 == 0 or tile_r == R
    assert tile_batch % 8 == 0 or tile_batch == bs
    grid = (bs // tile_batch,)

    x2d = x.reshape(R, T).astype(jnp.float32)       # streamed as-is, no copy

    # layer 0-1 geometry: Conv1d(k=2,s=2) -> L1, MaxPool(3) -> L2
    L1 = (T - 2) // 2 + 1
    L2 = L1 // 3

    # fused conv(x)pool operator matrices (both pool candidates packed)
    M2cat, L4 = _packed_conv_pool(conv_w[1], L2, 4, 2, 1, 2)    # (L2, 2*L4)
    M4cat, L6 = _packed_conv_pool(conv_w[2], L4, 4, 2, 1, 2)    # (L4, 2*L6)
    M6cat, L8 = _packed_conv_pool(conv_w[3], L6, 4, 2, 1, 2)    # (L6, 2*L8)
    assert L8 == 3, f"final Conv1d(k=3) expects feature length 3, got {L8}"

    # embed the stride-6 selection (conv0 stride 2 * pool0 k 3) into stage 2:
    # row 6j of the wide layer-1 output holds y[j]; all other rows are zero.
    M2p = (jnp.zeros((T, M2cat.shape[1]), jnp.float32)
           .at[jnp.arange(L2) * 6].set(M2cat))                  # (T, 2*L4)

    W_lin = W_lin.astype(jnp.float32)                           # (3, n_nodes)
    w8row = conv_w[4].astype(jnp.float32).reshape(1, 3)
    # fold the final conv's bias into the classifier bias
    blin_eff = (b_lin.astype(jnp.float32)
                + conv_b[4] * jnp.sum(W_lin, axis=1)).reshape(1, 3)
    wbig = jnp.tile(W_lin.T, (tile_batch, 1))                   # (tile_r, 3)

    # scalars used on the VPU: conv0 taps + biases of conv layers 0, 2, 4, 6
    scal = jnp.stack([conv_w[0][0], conv_w[0][1],
                      conv_b[0], conv_b[1], conv_b[2], conv_b[3]]
                     ).astype(jnp.float32)

    kernel = functools.partial(dtgn_kernel, tile_batch, n_nodes)

    out = pl.pallas_call(
        kernel,
        out_shape=jax.ShapeDtypeStruct((bs, 3), jnp.float32),
        grid=grid,
        in_specs=[
            # per-step activation slab (pipelined / double-buffered)
            pl.BlockSpec((tile_r, T), lambda i: (i, 0)),
            # block-invariant operator matrices: fetched once, VMEM-resident
            pl.BlockSpec((T, M2cat.shape[1]), lambda i: (0, 0)),
            pl.BlockSpec((L4, 2 * L6), lambda i: (0, 0)),
            pl.BlockSpec((L6, 2 * L8), lambda i: (0, 0)),
            pl.BlockSpec((1, 3), lambda i: (0, 0)),
            pl.BlockSpec((tile_r, 3), lambda i: (0, 0)),
            pl.BlockSpec((1, 3), lambda i: (0, 0)),
            pl.BlockSpec(memory_space=pltpu.MemorySpace.SMEM),   # scalars
        ],
        out_specs=pl.BlockSpec((tile_batch, 3), lambda i: (i, 0)),
        compiler_params=pltpu.CompilerParams(
            dimension_semantics=("parallel",),    # v7x: shard over 2 TCs
            vmem_limit_bytes=48 << 20),
    )(x2d, M2p, M4cat, M6cat, w8row, wbig, blin_eff, scal)
    return out


# ----------------------------------------------------------------------------
# pure-JAX reference (mirrors the PyTorch forward, GCN dead code omitted)
# ----------------------------------------------------------------------------
def reference_forward(x, params):
    conv_w, conv_b, W_lin, b_lin = params
    bs, n_nodes, T = x.shape
    y = x.reshape(bs * n_nodes, T)
    hi = jax.lax.Precision.HIGHEST

    def conv1d(y, w, b, stride, pad):
        if pad:
            y = jnp.pad(y, ((0, 0), (pad, pad)))
        k = w.shape[0]
        L_out = (y.shape[1] - k) // stride + 1
        cols = (jnp.arange(L_out) * stride)[:, None] + jnp.arange(k)[None, :]
        win = y[:, cols]                        # (R, L_out, k)
        return jnp.einsum('rlk,k->rl', win, w, precision=hi) + b

    def maxpool(y, k):
        L_out = y.shape[1] // k
        return y[:, :L_out * k].reshape(y.shape[0], L_out, k).max(-1)

    y = conv1d(y, conv_w[0], conv_b[0], 2, 0)
    y = jax.nn.relu(maxpool(y, 3))
    y = conv1d(y, conv_w[1], conv_b[1], 2, 1)
    y = jax.nn.relu(maxpool(y, 2))
    y = conv1d(y, conv_w[2], conv_b[2], 2, 1)
    y = jax.nn.relu(maxpool(y, 2))
    y = conv1d(y, conv_w[3], conv_b[3], 2, 1)
    y = jax.nn.relu(maxpool(y, 2))
    y = conv1d(y, conv_w[4], conv_b[4], 1, 0)   # (R, 1)
    feat = y.reshape(bs, n_nodes)
    logits = jnp.dot(feat, W_lin.T, precision=hi) + b_lin
    return jax.nn.softmax(logits, axis=1)


# ----------------------------------------------------------------------------
# main
# ----------------------------------------------------------------------------
if __name__ == "__main__":
    # T = 1200 is forced by the module (the conv/pool pyramid must reach the
    # GCN feature sizes 50 / 12 and a final length of 3); batch / node counts
    # kept small.  tile_batch=8 -> grid=(2,) exercises the pipelined,
    # batch-tiled path (64 rows/tile here; production would use ~1024 rows).
    bs, n_nodes, T = 16, 8, 1200

    key = jax.random.PRNGKey(0)
    keys = jax.random.split(key, 16)

    def unif(k, shape, bound):
        return jax.random.uniform(k, shape, jnp.float32, -bound, bound)

    conv_ks = [2, 4, 4, 4, 3]
    conv_w, conv_b = [], []
    for i, kk in enumerate(conv_ks):
        bound = 1.0 / np.sqrt(kk)
        conv_w.append(unif(keys[2 * i], (kk,), bound))
        conv_b.append(unif(keys[2 * i + 1], (), bound))
    W_lin = unif(keys[10], (3, n_nodes), 1.0 / np.sqrt(n_nodes))
    b_lin = unif(keys[11], (3,), 1.0 / np.sqrt(n_nodes))
    params = (conv_w, conv_b, W_lin, b_lin)

    x = jax.random.normal(keys[12], (bs, n_nodes, T), jnp.float32)

    fwd = jax.jit(deep_time_graph_net_forward, static_argnames=("tile_batch",))
    out = jax.block_until_ready(fwd(x, params, tile_batch=8))

    ref = jax.block_until_ready(reference_forward(x, params))
    np.testing.assert_allclose(np.array(out), np.array(ref),
                               rtol=2e-4, atol=2e-5)
    assert out.shape == (bs, 3)

    print("KERNEL_OK")
</pallas_src>

<mosaic_0001>
module attributes {stable_mosaic.version = 11 : i64} {
  func.func @dtgn_kernel(%arg0: i32, %arg1: memref<64x1200xf32, #tpu.memory_space<vmem>>, %arg2: memref<1200x100xf32, #tpu.memory_space<vmem>>, %arg3: memref<50x24xf32, #tpu.memory_space<vmem>>, %arg4: memref<12x6xf32, #tpu.memory_space<vmem>>, %arg5: memref<1x3xf32, #tpu.memory_space<vmem>>, %arg6: memref<64x3xf32, #tpu.memory_space<vmem>>, %arg7: memref<1x3xf32, #tpu.memory_space<vmem>>, %arg8: memref<6xf32, #tpu.memory_space<smem>>, %arg9: memref<8x3xf32, #tpu.memory_space<vmem>>) attributes {dimension_semantics = [#tpu.dimension_semantics<parallel>], iteration_bounds = array<i64: 2>, scalar_prefetch = 0 : i64, scratch_operands = 0 : i64, tpu.core_type = #tpu.core_type<tc>, window_params = [{transform_indices = @transform_0, window_bounds = array<i64: 64, 1200>}, {pipeline_mode = #tpu.pipeline_mode<synchronous>, transform_indices = @transform_1, window_bounds = array<i64: 1200, 100>}, {pipeline_mode = #tpu.pipeline_mode<synchronous>, transform_indices = @transform_2, window_bounds = array<i64: 50, 24>}, {pipeline_mode = #tpu.pipeline_mode<synchronous>, transform_indices = @transform_3, window_bounds = array<i64: 12, 6>}, {pipeline_mode = #tpu.pipeline_mode<synchronous>, transform_indices = @transform_4, window_bounds = array<i64: 1, 3>}, {pipeline_mode = #tpu.pipeline_mode<synchronous>, transform_indices = @transform_5, window_bounds = array<i64: 64, 3>}, {pipeline_mode = #tpu.pipeline_mode<synchronous>, transform_indices = @transform_6, window_bounds = array<i64: 1, 3>}, {transform_indices = @transform_7, window_bounds = array<i64: 6>}, {transform_indices = @transform_8, window_bounds = array<i64: 8, 3>}]} {
    %c0 = arith.constant 0 : index
    %0 = memref.load %arg8[%c0] : memref<6xf32, #tpu.memory_space<smem>>
    %c1 = arith.constant 1 : index
    %1 = memref.load %arg8[%c1] : memref<6xf32, #tpu.memory_space<smem>>
    %c0_0 = arith.constant 0 : index
    %c0_1 = arith.constant 0 : index
    %2 = vector.load %arg1[%c0_0, %c0_1] : memref<64x1200xf32, #tpu.memory_space<vmem>>, vector<64x1200xf32>
    %3 = vector.broadcast %0 : f32 to vector<64x1200xf32>
    %4 = arith.mulf %3, %2 : vector<64x1200xf32>
    %5 = vector.extract_strided_slice %2 {offsets = [0, 1], sizes = [64, 1199], strides = [1, 1]} : vector<64x1200xf32> to vector<64x1199xf32>
    %6 = vector.extract_strided_slice %2 {offsets = [0, 0], sizes = [64, 1], strides = [1, 1]} : vector<64x1200xf32> to vector<64x1xf32>
    %7 = tpu.concatenate %5, %6 in 1 : vector<64x1199xf32>, vector<64x1xf32> -> vector<64x1200xf32>
    %8 = vector.broadcast %1 : f32 to vector<64x1200xf32>
    %9 = arith.mulf %8, %7 : vector<64x1200xf32>
    %10 = arith.addf %4, %9 : vector<64x1200xf32>
    %11 = vector.extract_strided_slice %10 {offsets = [0, 2], sizes = [64, 1198], strides = [1, 1]} : vector<64x1200xf32> to vector<64x1198xf32>
    %12 = vector.extract_strided_slice %10 {offsets = [0, 0], sizes = [64, 2], strides = [1, 1]} : vector<64x1200xf32> to vector<64x2xf32>
    %13 = tpu.concatenate %11, %12 in 1 : vector<64x1198xf32>, vector<64x2xf32> -> vector<64x1200xf32>
    %14 = arith.maximumf %10, %13 : vector<64x1200xf32>
    %15 = vector.extract_strided_slice %10 {offsets = [0, 4], sizes = [64, 1196], strides = [1, 1]} : vector<64x1200xf32> to vector<64x1196xf32>
    %16 = vector.extract_strided_slice %10 {offsets = [0, 0], sizes = [64, 4], strides = [1, 1]} : vector<64x1200xf32> to vector<64x4xf32>
    %17 = tpu.concatenate %15, %16 in 1 : vector<64x1196xf32>, vector<64x4xf32> -> vector<64x1200xf32>
    %18 = arith.maximumf %14, %17 : vector<64x1200xf32>
    %c2 = arith.constant 2 : index
    %19 = memref.load %arg8[%c2] : memref<6xf32, #tpu.memory_space<smem>>
    %20 = vector.broadcast %19 : f32 to vector<64x1200xf32>
    %21 = arith.addf %18, %20 : vector<64x1200xf32>
    %cst = arith.constant 0.000000e+00 : f32
    %22 = vector.broadcast %cst : f32 to vector<64x1200xf32>
    %23 = arith.maximumf %21, %22 : vector<64x1200xf32>
    %c0_2 = arith.constant 0 : index
    %c0_3 = arith.constant 0 : index
    %24 = vector.load %arg2[%c0_2, %c0_3] : memref<1200x100xf32, #tpu.memory_space<vmem>>, vector<1200x100xf32>
    %cst_4 = arith.constant dense<0.000000e+00> : vector<64x100xf32>
    %25 = tpu.matmul %23, %24, %cst_4 {dimension_numbers = #tpu.dot_dimension_numbers<[1], [0], [0], [1], [0, 0, 1, 1], [], []>} : vector<64x1200xf32>, vector<1200x100xf32>, vector<64x100xf32> -> vector<64x100xf32>
    %26 = vector.extract_strided_slice %25 {offsets = [0, 0], sizes = [64, 50], strides = [1, 1]} : vector<64x100xf32> to vector<64x50xf32>
    %27 = vector.extract_strided_slice %25 {offsets = [0, 50], sizes = [64, 50], strides = [1, 1]} : vector<64x100xf32> to vector<64x50xf32>
    %28 = arith.maximumf %26, %27 : vector<64x50xf32>
    %c3 = arith.constant 3 : index
    %29 = memref.load %arg8[%c3] : memref<6xf32, #tpu.memory_space<smem>>
    %30 = vector.broadcast %29 : f32 to vector<64x50xf32>
    %31 = arith.addf %28, %30 : vector<64x50xf32>
    %cst_5 = arith.constant 0.000000e+00 : f32
    %32 = vector.broadcast %cst_5 : f32 to vector<64x50xf32>
    %33 = arith.maximumf %31, %32 : vector<64x50xf32>
    %c0_6 = arith.constant 0 : index
    %c0_7 = arith.constant 0 : index
    %34 = vector.load %arg3[%c0_6, %c0_7] : memref<50x24xf32, #tpu.memory_space<vmem>>, vector<50x24xf32>
    %cst_8 = arith.constant dense<0.000000e+00> : vector<64x24xf32>
    %35 = tpu.matmul %33, %34, %cst_8 {dimension_numbers = #tpu.dot_dimension_numbers<[1], [0], [0], [1], [0, 0, 1, 1], [], []>} : vector<64x50xf32>, vector<50x24xf32>, vector<64x24xf32> -> vector<64x24xf32>
    %36 = vector.extract_strided_slice %35 {offsets = [0, 0], sizes = [64, 12], strides = [1, 1]} : vector<64x24xf32> to vector<64x12xf32>
    %37 = vector.extract_strided_slice %35 {offsets = [0, 12], sizes = [64, 12], strides = [1, 1]} : vector<64x24xf32> to vector<64x12xf32>
    %38 = arith.maximumf %36, %37 : vector<64x12xf32>
    %c4 = arith.constant 4 : index
    %39 = memref.load %arg8[%c4] : memref<6xf32, #tpu.memory_space<smem>>
    %40 = vector.broadcast %39 : f32 to vector<64x12xf32>
    %41 = arith.addf %38, %40 : vector<64x12xf32>
    %cst_9 = arith.constant 0.000000e+00 : f32
    %42 = vector.broadcast %cst_9 : f32 to vector<64x12xf32>
    %43 = arith.maximumf %41, %42 : vector<64x12xf32>
    %c0_10 = arith.constant 0 : index
    %c0_11 = arith.constant 0 : index
    %44 = vector.load %arg4[%c0_10, %c0_11] : memref<12x6xf32, #tpu.memory_space<vmem>>, vector<12x6xf32>
    %cst_12 = arith.constant dense<0.000000e+00> : vector<64x6xf32>
    %45 = tpu.matmul %43, %44, %cst_12 {dimension_numbers = #tpu.dot_dimension_numbers<[1], [0], [0], [1], [0, 0, 1, 1], [], []>} : vector<64x12xf32>, vector<12x6xf32>, vector<64x6xf32> -> vector<64x6xf32>
    %46 = vector.extract_strided_slice %45 {offsets = [0, 0], sizes = [64, 3], strides = [1, 1]} : vector<64x6xf32> to vector<64x3xf32>
    %47 = vector.extract_strided_slice %45 {offsets = [0, 3], sizes = [64, 3], strides = [1, 1]} : vector<64x6xf32> to vector<64x3xf32>
    %48 = arith.maximumf %46, %47 : vector<64x3xf32>
    %c5 = arith.constant 5 : index
    %49 = memref.load %arg8[%c5] : memref<6xf32, #tpu.memory_space<smem>>
    %50 = vector.broadcast %49 : f32 to vector<64x3xf32>
    %51 = arith.addf %48, %50 : vector<64x3xf32>
    %cst_13 = arith.constant 0.000000e+00 : f32
    %52 = vector.broadcast %cst_13 : f32 to vector<64x3xf32>
    %53 = arith.maximumf %51, %52 : vector<64x3xf32>
    %c0_14 = arith.constant 0 : index
    %c0_15 = arith.constant 0 : index
    %54 = vector.load %arg5[%c0_14, %c0_15] : memref<1x3xf32, #tpu.memory_space<vmem>>, vector<1x3xf32>
    %55 = vector.broadcast %54 : vector<1x3xf32> to vector<64x3xf32>
    %56 = arith.mulf %53, %55 : vector<64x3xf32>
    %cst_16 = arith.constant dense<0.000000e+00> : vector<64xf32>
    %57 = vector.multi_reduction <add>, %56, %cst_16 [1] : vector<64x3xf32> to vector<64xf32>
    %58 = vector.shape_cast %57 : vector<64xf32> to vector<64x1xf32>
    %c0_17 = arith.constant 0 : index
    %c0_18 = arith.constant 0 : index
    %59 = vector.load %arg6[%c0_17, %c0_18] : memref<64x3xf32, #tpu.memory_space<vmem>>, vector<64x3xf32>
    %60 = vector.broadcast %58 : vector<64x1xf32> to vector<64x3xf32>
    %61 = arith.mulf %60, %59 : vector<64x3xf32>
    %62 = vector.shape_cast %61 : vector<64x3xf32> to vector<8x8x3xf32>
    %cst_19 = arith.constant dense<0.000000e+00> : vector<8x3xf32>
    %63 = vector.multi_reduction <add>, %62, %cst_19 [1] : vector<8x8x3xf32> to vector<8x3xf32>
    %c0_20 = arith.constant 0 : index
    %c0_21 = arith.constant 0 : index
    %64 = vector.load %arg7[%c0_20, %c0_21] : memref<1x3xf32, #tpu.memory_space<vmem>>, vector<1x3xf32>
    %65 = vector.broadcast %64 : vector<1x3xf32> to vector<8x3xf32>
    %66 = arith.addf %63, %65 : vector<8x3xf32>
    %cst_22 = arith.constant dense<0xFF800000> : vector<8xf32>
    %67 = vector.multi_reduction <maximumf>, %66, %cst_22 [1] : vector<8x3xf32> to vector<8xf32>
    %68 = vector.shape_cast %67 : vector<8xf32> to vector<8x1xf32>
    %69 = vector.broadcast %68 : vector<8x1xf32> to vector<8x3xf32>
    %70 = arith.subf %66, %69 : vector<8x3xf32>
    %71 = math.exp %70 : vector<8x3xf32>
    %cst_23 = arith.constant dense<0.000000e+00> : vector<8xf32>
    %72 = vector.multi_reduction <add>, %71, %cst_23 [1] : vector<8x3xf32> to vector<8xf32>
    %73 = vector.shape_cast %72 : vector<8xf32> to vector<8x1xf32>
    %74 = vector.broadcast %73 : vector<8x1xf32> to vector<8x3xf32>
    %75 = arith.divf %71, %74 : vector<8x3xf32>
    %c0_24 = arith.constant 0 : index
    %c0_25 = arith.constant 0 : index
    %76 = vector.load %arg9[%c0_24, %c0_25] : memref<8x3xf32, #tpu.memory_space<vmem>>, vector<8x3xf32>
    tpu.vector_store %arg9[%c0_24, %c0_25], %75 {strides = array<i32>} : memref<8x3xf32, #tpu.memory_space<vmem>>, vector<8x3xf32>,
    return
  }
  func.func @transform_0(%arg0: i32) -> (i32, i32) {
    %c0_i32 = arith.constant 0 : i32
    %c0_i32_0 = arith.constant 0 : i32
    return %arg0, %c0_i32 : i32, i32
  }
  func.func @transform_1(%arg0: i32) -> (i32, i32) {
    %c0_i32 = arith.constant 0 : i32
    %c0_i32_0 = arith.constant 0 : i32
    %c0_i32_1 = arith.constant 0 : i32
    return %c0_i32, %c0_i32_0 : i32, i32
  }
  func.func @transform_2(%arg0: i32) -> (i32, i32) {
    %c0_i32 = arith.constant 0 : i32
    %c0_i32_0 = arith.constant 0 : i32
    %c0_i32_1 = arith.constant 0 : i32
    return %c0_i32, %c0_i32_0 : i32, i32
  }
  func.func @transform_3(%arg0: i32) -> (i32, i32) {
    %c0_i32 = arith.constant 0 : i32
    %c0_i32_0 = arith.constant 0 : i32
    %c0_i32_1 = arith.constant 0 : i32
    return %c0_i32, %c0_i32_0 : i32, i32
  }
  func.func @transform_4(%arg0: i32) -> (i32, i32) {
    %c0_i32 = arith.constant 0 : i32
    %c0_i32_0 = arith.constant 0 : i32
    %c0_i32_1 = arith.constant 0 : i32
    return %c0_i32, %c0_i32_0 : i32, i32
  }
  func.func @transform_5(%arg0: i32) -> (i32, i32) {
    %c0_i32 = arith.constant 0 : i32
    %c0_i32_0 = arith.constant 0 : i32
    %c0_i32_1 = arith.constant 0 : i32
    return %c0_i32, %c0_i32_0 : i32, i32
  }
  func.func @transform_6(%arg0: i32) -> (i32, i32) {
    %c0_i32 = arith.constant 0 : i32
    %c0_i32_0 = arith.constant 0 : i32
    %c0_i32_1 = arith.constant 0 : i32
    return %c0_i32, %c0_i32_0 : i32, i32
  }
  func.func @transform_7(%arg0: i32) -> i32 {
    %c0_i32 = arith.constant 0 : i32
    %c0_i32_0 = arith.constant 0 : i32
    return %c0_i32 : i32
  }
  func.func @transform_8(%arg0: i32) -> (i32, i32) {
    %c0_i32 = arith.constant 0 : i32
    %c0_i32_0 = arith.constant 0 : i32
    return %arg0, %c0_i32 : i32, i32
  }
}

</mosaic_0001>

<bundles_post_ra>
// kernel: deep_time_graph_net_forward.1
= control target key start
LH: loop header
LB: loop body
LE: loop exit
PB: predicated region body
PF: predicated region fallthrough
CT: control target
= control target key end

     0   :  { %13 = vsyncpa [#allocation3], 0  ;;  %s3739_s27 = smov 0   ;;  %s6663_s0 = inlined_call_operand.vmem [shape: f32[128,1200], index: 0, kind: input, shape index: {}]   ;;  %s6664_s1 = inlined_call_operand.vmem [shape: f32[1200,100], index: 1, kind: input, shape index: {}]   ;;  %s6665_s2 = inlined_call_operand.vmem [shape: f32[50,24], index: 2, kind: input, shape index: {}]   ;;  %s6666_s3 = inlined_call_operand.vmem [shape: f32[12,6], index: 3, kind: input, shape index: {}]   ;;  %s6667_s4 = inlined_call_operand.vmem [shape: f32[1,3], index: 4, kind: input, shape index: {}]   ;;  %s6668_s5 = inlined_call_operand.vmem [shape: f32[64,3], index: 5, kind: input, shape index: {}]   ;;  %s6669_s6 = inlined_call_operand.vmem [shape: f32[1,3], index: 6, kind: input, shape index: {}]   ;;  %s6670_s7 = inlined_call_operand.vmem [shape: f32[6], index: 7, kind: input, shape index: {}]   ;;  %s6671_s8 = inlined_call_operand.vmem [shape: f32[16,3], index: 8, kind: output, shape index: {}]  }
   0x1 LB: > { %s3745_s28 = sadd.s32 4294967295, %s3682_s27   ;;  %p3522_p0 = scmp.ge.s32.totalorder %s3682_s27, 1  ;;  %s3682_s27 = sphi %s3739_s27, %s19_s27  }
   0x2   : > { %p223_p1 = scmp.lt.s32.totalorder %s3682_s27, 3  ;;  %s253_s9 = sshll.u32 %s6670_s7, 4  ;;  %s254_s9 = int_to_ptr.vmem [resolvable:$true] %s253_s9 }
   0x3   : > { %p3572_p3 = scmp.eq.s32.totalorder %s3745_s28, 0  ;;  %s3684_s10 = smov [#allocation2]  }
   0x4   : > { %p224_p2 = pnand %p3522_p0, %p223_p1 }
   0x6   : > { %p3568_p4 = pneg %p224_p2  ;;  %276 = sbr.rel (%p224_p2) target bundleno = 2051 (0x803), region = 52 }
   0x8   : > { %p3569_p5 = pnand %p3572_p3, %p3568_p4 }
   0xa   : > { %3571 = dma.vmem_to_smem (!%p3569_p5), %s254_s9, 16, %s3684_s10, [#allocation3]  }
   0xb   : > { %3677 = dma.done.wait (%p3572_p3), [#allocation3], 16  }
   0xc   : > { %3679 = vsyncadd (%p3572_p3), [#allocation3], 4294967280 }
   0xd   : > { %283 = sfence }
   0xe   : > { %s3527_s11 = sshll.u32 %s3745_s28, 3  ;;  %s3685_s16 = smov 127   ;;  %vm726_vm0 = vcmask 1039360   ;;  %vm1313_vm1 = vcmask 1031168   ;;  %vm1739_vm2 = vcmask 1014784   ;;  %vm903_vm3 = vcmask 384000  }
   0xf   : > { %p313_p6 = scmp.lt.s32.totalorder %s3527_s11, 15  ;;  %s323_s17 = sld [smem:[#allocation2]]  ;;  %vm1490_vm4 = vcmask 375808   ;;  %vm1916_vm5 = vcmask 359424   ;;  %vm2317_vm6 = vcmask 392192   ;;  %vm2842_vm7 = vcmask 1041408  }
  0x10   : > { %s3530_s18 = sld [smem:[#allocation2 + $0x1]]  ;;  %s3686_s19 = smov 126   ;;  %vm2817_vm8 = vcmask 408576   ;;  %vm2972_vm9 = vcmask 1043456   ;;  %vm2947_vm10 = vcmask 97280   ;;  %vm6726_vm11 = vcmask 23552  }
  0x11   : > { %s6869_s11 = smov (!%p313_p6, %s3527_s11), 15  ;;  %s3687_s20 = smov 124   ;;  %vm3205_vm12 = vcmask 1041409   ;;  %vm6732_vm13 = vcmask 1042434   ;;  %vm6731_vm14 = vcmask 1043459   ;;  %vm6730_vm15 = vcmask 1044484  }
  0x12   : > { %s3563_s12 = smul.u32 80, %s6869_s11  ;;  %s3531_s21 = sld [smem:[#allocation2 + $0x2]] }
  0x13   : > { %s3688_s22 = smov 47   ;;  %s3689_s24 = smov 44  }
  0x14   : > { %s3757_s15 = scalar_lea.vmem %s6663_s0, %s3563_s12  ;;  %s3690_s25 = smov 46  }
  0x15   : > { %v3760_v0 = vld [vmem:[%s3757_s15 + $0x10] sm:$0xff]  ;;  %v3763_v1 = vld [vmem:[%s3757_s15] sm:$0xff]  ;;  %v3775_v3 = vld [vmem:[%s3757_s15 + $0x18] sm:$0xff]  ;;  %v3916_v38 = vstv %s323_s17  ;;  %s3540_s29 = sld [smem:[#allocation2 + $0x3]]  ;;  %s3692_s30 = smov 116  }
  0x16   : > { %570 = vrot.lane.b32.xlu1 %v3760_v0, %s3685_s16  ;;  %566 = vrot.lane.b32.xlu0 %v3763_v1, %s3685_s16  ;;  %v3770_v2 = vld [vmem:[%s3757_s15 + $0x50] sm:$0xff]  ;;  %v3778_v4 = vld [vmem:[%s3757_s15 + $0x8] sm:$0xff]  ;;  %v408_v40 = vmul.f32 %v3916_v38, %v3760_v0  ;;  %v406_v41 = vmul.f32 %v3916_v38, %v3763_v1  ;;  %p319_p7 = scmp.lt.s32.totalorder %s3745_s28, 1 }
  0x17   : > { %586 = vrot.lane.b32.xlu2 %v3770_v2, %s3685_s16  ;;  %v3781_v5 = vld [vmem:[%s3757_s15 + $0x58] sm:$0xff]  ;;  %v3790_v6 = vld [vmem:[%s3757_s15 + $0x60] sm:$0xff]  ;;  %v3793_v7 = vld [vmem:[%s3757_s15 + $0x68] sm:$0xff]  ;;  %v407_v42 = vmul.f32 %v3916_v38, %v3778_v4  ;;  %v416_v62 = vmul.f32 %v3916_v38, %v3770_v2 }
  0x18   : > { %v3800_v8 = vld [vmem:[%s3757_s15 + $0xa0] sm:$0xff]  ;;  %v3805_v9 = vld [vmem:[%s3757_s15 + $0xa8] sm:$0xff]  ;;  %v3808_v10 = vld [vmem:[%s3757_s15 + $0xb0] sm:$0xff]  ;;  %v3918_v39 = vstv %s3530_s18  ;;  %v417_v60 = vmul.f32 %v3916_v38, %v3781_v5  ;;  %s6871_s28 = smov (!%p319_p7, %s3745_s28), 1 }
  0x19   : > { %v348_v11 = vld [vmem:[%s3757_s15 + $0xb8] sm:$0xff]  ;;  %v3817_v12 = vld [vmem:[%s3757_s15 + $0xf0] sm:$0xff]  ;;  %v3827_v14 = vld [vmem:[%s3757_s15 + $0x100] sm:$0xff] }
  0x1a   : > { %v3820_v13 = vld [vmem:[%s3757_s15 + $0xf8] sm:$0xff]  ;;  %v358_v15 = vld [vmem:[%s3757_s15 + $0x108] sm:$0xff]  ;;  %v3833_v16 = vld [vmem:[%s3757_s15 + $0x140] sm:$0xff] }
  0x1b   : > { %v3839_v17 = vld [vmem:[%s3757_s15 + $0x150] sm:$0xff]  ;;  %v368_v18 = vld [vmem:[%s3757_s15 + $0x158] sm:$0xff]  ;;  %v3846_v19 = vld [vmem:[%s3757_s15 + $0x148] sm:$0xff] }
  0x1c   : > { %v3851_v20 = vld [vmem:[%s3757_s15 + $0x198] sm:$0xff]  ;;  %v3856_v21 = vld [vmem:[%s3757_s15 + $0x190] sm:$0xff]  ;;  %v3859_v22 = vld [vmem:[%s3757_s15 + $0x1a0] sm:$0xff] }
  0x1d   : > { %v3866_v23 = vld [vmem:[%s3757_s15 + $0x1e8] sm:$0xff]  ;;  %v3872_v25 = vld [vmem:[%s3757_s15 + $0x1f0] sm:$0xff]  ;;  %v388_v26 = vld [vmem:[%s3757_s15 + $0x1f8] sm:$0xff] }
  0x1e   : > { %572 = vrot.lane.b32.xlu1 %v3775_v3, %s3685_s16  ;;  %568 = vrot.lane.b32.xlu0 %v3778_v4, %s3685_s16  ;;  %v378_v24 = vld [vmem:[%s3757_s15 + $0x1a8] sm:$0xff]  ;;  %v3880_v27 = vld [vmem:[%s3757_s15 + $0x1e0] sm:$0xff] }
  0x1f   : > { %588 = vrot.lane.b32.xlu2 %v3781_v5, %s3685_s16  ;;  %v3883_v28 = vld [vmem:[%s3757_s15 + $0x28] sm:$0xff]  ;;  %v3890_v29 = vld [vmem:[%s3757_s15 + $0x20] sm:$0xff]  ;;  %v3895_v30 = vld [vmem:[%s3757_s15 + $0x230] sm:$0xff] }
  0x20   : > { %v3898_v31 = vld [vmem:[%s3757_s15 + $0x240] sm:$0xff]  ;;  %v3905_v32 = vld [vmem:[%s3757_s15 + $0x238] sm:$0xff]  ;;  %v398_v33 = vld [vmem:[%s3757_s15 + $0x248] sm:$0xff] }
  0x21   : > { %v3912_v34 = vld [vmem:[%s3757_s15 + $0x70] sm:$0xff] }
  0x26   : > { %590 = vrot.lane.b32.xlu0 %v3790_v6, %s3685_s16  ;;  %592 = vrot.lane.b32.xlu1 %v3793_v7, %s3685_s16 }
  0x27   : > { %606 = vrot.lane.b32.xlu2 %v3800_v8, %s3685_s16 }
  0x2e   : > { %608 = vrot.lane.b32.xlu0 %v3805_v9, %s3685_s16  ;;  %610 = vrot.lane.b32.xlu1 %v3808_v10, %s3685_s16 }
  0x2f   : > { %612 = vrot.lane.b32.xlu2 %v348_v11, %s3685_s16 }
  0x36   : > { %626 = vrot.lane.b32.xlu0 %v3817_v12, %s3685_s16  ;;  %628 = vrot.lane.b32.xlu1 %v3820_v13, %s3685_s16 }
  0x37   : > { %630 = vrot.lane.b32.xlu2 %v3827_v14, %s3685_s16 }
  0x3e   : > { %632 = vrot.lane.b32.xlu0 %v358_v15, %s3685_s16  ;;  %646 = vrot.lane.b32.xlu1 %v3833_v16, %s3685_s16 }
  0x3f   : > { %648 = vrot.lane.b32.xlu2 %v3846_v19, %s3685_s16 }
  0x46   : > { %650 = vrot.lane.b32.xlu0 %v3839_v17, %s3685_s16  ;;  %652 = vrot.lane.b32.xlu1 %v368_v18, %s3685_s16  ;;  %v418_v18 = vmul.f32 %v3916_v38, %v3790_v6 }
  0x47   : > { %666 = vrot.lane.b32.xlu2 %v3856_v21, %s3685_s16 }
  0x4e   : > { %668 = vrot.lane.b32.xlu0 %v3851_v20, %s3685_s16  ;;  %670 = vrot.lane.b32.xlu1 %v3859_v22, %s3685_s16 }
  0x4f   : > { %672 = vrot.lane.b32.xlu2 %v378_v24, %s3685_s16 }
  0x56   : > { %688 = vrot.lane.b32.xlu0 %v3866_v23, %s3685_s16  ;;  %690 = vrot.lane.b32.xlu1 %v3872_v25, %s3685_s16 }
  0x57   : > { %686 = vrot.lane.b32.xlu2 %v3880_v27, %s3685_s16 }
  0x5e   : > { %692 = vrot.lane.b32.xlu0 %v388_v26, %s3685_s16  ;;  %576 = vrot.lane.b32.xlu1 %v3883_v28, %s3685_s16  ;;  %v427_v26 = vmul.f32 %v3916_v38, %v3805_v9 }
  0x5f   : > { %706 = vrot.lane.b32.xlu2 %v3895_v30, %s3685_s16 }
  0x66   : > { %574 = vrot.lane.b32.xlu0 %v3890_v29, %s3685_s16  ;;  %710 = vrot.lane.b32.xlu1 %v3898_v31, %s3685_s16 }
  0x6e   : > { %708 = vrot.lane.b32.xlu0 %v3905_v32, %s3685_s16 }
  0x71   : > { %v587_v37 = vpop.permute.xlu2 %586 }
  0x76   : > { %712 = vrot.lane.b32.xlu0 %v398_v33, %s3685_s16 }
  0x79   : > { %v589_v54 = vpop.permute.xlu2 %588 }
  0x7a   : > { %v736_v59 = vsel %vm726_vm0, %v587_v37, %v589_v54 }
  0x7b   : > { %v923_v63 = vmul.f32 %v3918_v39, %v736_v59 }
  0x7d   : > { %v3967_v11 = vadd.f32 %v923_v63, %v416_v62 }
  0x7e   : > { %594 = vrot.lane.b32.xlu0 %v3912_v34, %s3685_s16 }
  0x7f   : > { %6735 = vst [vmem:[#allocation7_spill] sm:$0xff] %v3967_v11 }
  0x81   : > { %v607_v58 = vpop.permute.xlu2 %606 }
  0x88   : > { %v571_v35 = vpop.permute.xlu1 %570  ;;  %v567_v36 = vpop.permute.xlu0 %566 }
  0x89   : > { %v3977_v2 = vpop.permute.xlu2 %612 }
  0x90   : > { %v3926_v43 = vpop.permute.xlu1 %572  ;;  %v569_v44 = vpop.permute.xlu0 %568 }
  0x91   : > { %v729_v45 = vsel %vm726_vm0, %v571_v35, %v3926_v43  ;;  %v727_v46 = vsel %vm726_vm0, %v567_v36, %v569_v44  ;;  %v728_v47 = vsel %vm726_vm0, %v569_v44, %v571_v35 }
  0x92   : > { %v915_v48 = vmul.f32 %v3918_v39, %v729_v45  ;;  %v913_v49 = vmul.f32 %v3918_v39, %v727_v46  ;;  %v914_v50 = vmul.f32 %v3918_v39, %v728_v47  ;;  %v631_v45 = vpop.permute.xlu2 %630 }
  0x94   : > { %v3935_v51 = vadd.f32 %v913_v49, %v406_v41  ;;  %v3937_v52 = vadd.f32 %v915_v48, %v408_v40  ;;  %v3939_v53 = vadd.f32 %v914_v50, %v407_v42  ;;  %v426_v41 = vmul.f32 %v3916_v38, %v3800_v8 }
  0x95   : > { %v428_v42 = vmul.f32 %v3916_v38, %v3808_v10  ;;  %v437_v10 = vmul.f32 %v3916_v38, %v3820_v13 }
  0x96   : > { %6733 = vst [vmem:[#allocation5_spill] sm:$0xff] %v3935_v51  ;;  %1157 = vrot.lane.b32.xlu2 %v3937_v52, %s3686_s19  ;;  %1155 = vrot.lane.b32.xlu1 %v3939_v53, %s3686_s19 }
  0x97   : > { %6734 = vst [vmem:[#allocation6_spill] sm:$0xff] %v3937_v52  ;;  %1153 = vrot.lane.b32.xlu0 %v3935_v51, %s3686_s19 }
  0x98   : > { %v591_v55 = vpop.permute.xlu0 %590  ;;  %v3947_v56 = vpop.permute.xlu1 %592 }
  0x99   : > { %v737_v57 = vsel %vm726_vm0, %v589_v54, %v591_v55  ;;  %v738_v5 = vsel %vm726_vm0, %v591_v55, %v3947_v56 }
  0x9a   : > { %v924_v61 = vmul.f32 %v3918_v39, %v737_v57  ;;  %v925_v24 = vmul.f32 %v3918_v39, %v738_v5  ;;  %v4028_v13 = vpop.permute.xlu2 %648  ;;  %v4055_v5 = vld [vmem:[%s3757_s15 + $0xc8] sm:$0xff] }
  0x9c   : > { %v3963_v4 = vadd.f32 %v924_v61, %v417_v60  ;;  %v3984_v6 = vadd.f32 %v925_v24, %v418_v18  ;;  %v4038_v61 = vld [vmem:[%s3757_s15 + $0x30] sm:$0xff]  ;;  %v446_v18 = vmul.f32 %v3916_v38, %v3833_v16 }
  0x9e   : > { %1583 = vrot.lane.b32.xlu2 %v3937_v52, %s3687_s20  ;;  %1581 = vrot.lane.b32.xlu1 %v3939_v53, %s3687_s20  ;;  %6736 = vst [vmem:[#allocation8_spill] sm:$0xff] %v3984_v6  ;;  %v360_v52 = vld [vmem:[%s3757_s15 + $0x118] sm:$0xff] }
  0x9f   : > { %1579 = vrot.lane.b32.xlu0 %v3935_v51, %s3687_s20 }
  0xa0   : > { %v609_v0 = vpop.permute.xlu0 %608  ;;  %v611_v1 = vpop.permute.xlu1 %610 }
  0xa1   : > { %v746_v15 = vsel %vm726_vm0, %v609_v0, %v611_v1  ;;  %v745_v36 = vsel %vm726_vm0, %v607_v58, %v609_v0  ;;  %v747_v40 = vsel %vm726_vm0, %v611_v1, %v3977_v2  ;;  %v436_v58 = vmul.f32 %v3916_v38, %v3817_v12  ;;  %v4051_v0 = vld [vmem:[%s3757_s15 + $0x78] sm:$0xff] }
  0xa2   : > { %v934_v33 = vmul.f32 %v3918_v39, %v746_v15  ;;  %v933_v9 = vmul.f32 %v3918_v39, %v745_v36  ;;  %v935_v44 = vmul.f32 %v3918_v39, %v747_v40  ;;  %v4048_v63 = vpop.permute.xlu2 %666  ;;  %v332_v1 = vld [vmem:[%s3757_s15 + $0x38] sm:$0xff]  ;;  %v4076_v40 = vld [vmem:[%s3757_s15 + $0xc0] sm:$0xff] }
  0xa4   : > { %v3987_v37 = vadd.f32 %v934_v33, %v427_v26  ;;  %v4005_v47 = vadd.f32 %v933_v9, %v426_v41  ;;  %v4007_v48 = vadd.f32 %v935_v44, %v428_v42  ;;  %v448_v9 = vmul.f32 %v3916_v38, %v3839_v17  ;;  %v2181_v17 = vld [vmem:[%s6664_s1 + $0x70] sm:$0xff] }
  0xa5   : > { %v438_v44 = vmul.f32 %v3916_v38, %v3827_v14  ;;  %v2197_v14 = vld [vmem:[%s6664_s1 + $0xf0] sm:$0xff] }
  0xa6   : > { %1173 = vrot.lane.b32.xlu1 %v3967_v11, %s3686_s19  ;;  %1175 = vrot.lane.b32.xlu2 %v3963_v4, %s3686_s19  ;;  %6737 = vst [vmem:[#allocation9_spill] sm:$0xff] %v4005_v47 }
  0xa7   : > { %1601 = vrot.lane.b32.xlu0 %v3963_v4, %s3687_s20  ;;  %6738 = vst [vmem:[#allocation10_spill] sm:$0xff] %v4007_v48 }
  0xa8   : > { %v627_v35 = vpop.permute.xlu0 %626  ;;  %v629_v8 = vpop.permute.xlu1 %628 }
  0xa9   : > { %v755_v49 = vsel %vm726_vm0, %v629_v8, %v631_v45  ;;  %v754_v57 = vsel %vm726_vm0, %v627_v35, %v629_v8 }
  0xaa   : > { %v944_v50 = vmul.f32 %v3918_v39, %v755_v49  ;;  %v943_v59 = vmul.f32 %v3918_v39, %v754_v57  ;;  %v4071_v35 = vpop.permute.xlu2 %672  ;;  %v2198_v49 = vld [vmem:[%s6664_s1 + $0xf8] sm:$0xff]  ;;  %v2196_v57 = vld [vmem:[%s6664_s1 + $0xe8] sm:$0xff] }
  0xab   : > { %6741 = vst [vmem:[#allocation13_spill] sm:$0xff] %v4071_v35  ;;  %2383 = vmatpush.msra.mxu1 %v2198_v49 }
  0xac   : > { %v4021_v55 = vadd.f32 %v944_v50, %v437_v10  ;;  %v4035_v60 = vadd.f32 %v943_v59, %v436_v58  ;;  %v2180_v50 = vld [vmem:[%s6664_s1 + $0x68] sm:$0xff] }
  0xad   : > { %2384 = vmatpush.msra.mxu1 %v2197_v14 }
  0xae   : > { %1177 = vrot.lane.b32.xlu1 %v3984_v6, %s3686_s19  ;;  %1599 = vrot.lane.b32.xlu2 %v3967_v11, %s3687_s20  ;;  %6739 = vst [vmem:[#allocation11_spill] sm:$0xff] %v4035_v60 }
  0xaf   : > { %1621 = vrot.lane.b32.xlu0 %v3987_v37, %s3687_s20  ;;  %2385 = vmatpush.msra.mxu1 %v2196_v57 }
  0xb0   : > { %v4003_v46 = vpop.permute.xlu0 %632  ;;  %v647_v12 = vpop.permute.xlu1 %646 }
  0xb1   : > { %v763_v15 = vsel %vm726_vm0, %v647_v12, %v4028_v13  ;;  %v756_v16 = vsel %vm726_vm0, %v631_v45, %v4003_v46  ;;  %v2182_v45 = vld [vmem:[%s6664_s1 + $0x78] sm:$0xff] }
  0xb2   : > { %v953_v26 = vmul.f32 %v3918_v39, %v763_v15  ;;  %v945_v8 = vmul.f32 %v3918_v39, %v756_v16  ;;  %2342 = vmatpush.msra.mxu0 %v2182_v45  ;;  %v4119_v12 = vpop.permute.xlu2 %686  ;;  %v2195_v15 = vld [vmem:[%s6664_s1 + $0xe0] sm:$0xff]  ;;  %v2177_v16 = vld [vmem:[%s6664_s1 + $0x50] sm:$0xff]  ;;  %v2176_v45 = vld [vmem:[%s6664_s1 + $0x48] sm:$0xff] }
  0xb3   : > { %2386 = vmatpush.msra.mxu1 %v2195_v15  ;;  %v2190_v15 = vld [vmem:[%s6664_s1 + $0xb8] sm:$0xff] }
  0xb4   : > { %v4073_v36 = vadd.f32 %v953_v26, %v446_v18  ;;  %2343 = vmatpush.msra.mxu0 %v2181_v17  ;;  %v4117_v59 = vadd.f32 %v945_v8, %v438_v44  ;;  %v2178_v26 = vld [vmem:[%s6664_s1 + $0x58] sm:$0xff]  ;;  %v4150_v44 = vld [vmem:[%s3757_s15 + $0x80] sm:$0xff]  ;;  %v4153_v8 = vld [vmem:[%s3757_s15 + $0xd0] sm:$0xff] }
  0xb5   : > { %v2192_v17 = vld [vmem:[%s6664_s1 + $0xc8] sm:$0xff] }
  0xb6   : > { %1603 = vrot.lane.b32.xlu2 %v3984_v6, %s3687_s20  ;;  %1193 = vrot.lane.b32.xlu1 %v4005_v47, %s3686_s19  ;;  %6742 = vst [vmem:[#allocation14_spill] sm:$0xff] %v4073_v36 }
  0xb7   : > { %1623 = vrot.lane.b32.xlu0 %v4007_v48, %s3687_s20  ;;  %6744 = vst [vmem:[#allocation16_spill] sm:$0xff] %v4117_v59  ;;  %2344 = vmatpush.msra.mxu0 %v2180_v50  ;;  %v447_v50 = vmul.f32 %v3916_v38, %v3846_v19  ;;  %v2173_v19 = vld [vmem:[%s6664_s1 + $0x30] sm:$0xff] }
  0xb8   : > { %v4019_v54 = vpop.permute.xlu0 %650  ;;  %v4069_v33 = vpop.permute.xlu1 %652 }
  0xb9   : > { %6740 = vst [vmem:[#allocation12_spill] sm:$0xff] %v4069_v33  ;;  %v765_v41 = vsel %vm726_vm0, %v4019_v54, %v4069_v33  ;;  %v764_v49 = vsel %vm726_vm0, %v4028_v13, %v4019_v54  ;;  %v2175_v54 = vld [vmem:[%s6664_s1 + $0x40] sm:$0xff] }
  0xba   : > { %v955_v42 = vmul.f32 %v3918_v39, %v765_v41  ;;  %v2194_v41 = vld [vmem:[%s6664_s1 + $0xd8] sm:$0xff]  ;;  %v4168_v14 = vpop.permute.xlu2 %706  ;;  %v2191_v13 = vld [vmem:[%s6664_s1 + $0xc0] sm:$0xff]  ;;  %v954_v57 = vmul.f32 %v3918_v39, %v764_v49 }
  0xbb   : > { %2387 = vmatpush.msra.mxu1 %v2194_v41  ;;  %v342_v41 = vld [vmem:[%s3757_s15 + $0x88] sm:$0xff] }
  0xbc   : > { %v4115_v58 = vadd.f32 %v955_v42, %v448_v9  ;;  %v2193_v9 = vld [vmem:[%s6664_s1 + $0xd0] sm:$0xff] }
  0xbd   : > { %2388 = vmatpush.msra.mxu1 %v2193_v9  ;;  %v352_v9 = vld [vmem:[%s3757_s15 + $0xd8] sm:$0xff] }
  0xbe   : > { %1195 = vrot.lane.b32.xlu2 %v3987_v37, %s3686_s19  ;;  %1197 = vrot.lane.b32.xlu1 %v4007_v48, %s3686_s19  ;;  %6743 = vst [vmem:[#allocation15_spill] sm:$0xff] %v4115_v58  ;;  %v457_v48 = vmul.f32 %v3916_v38, %v3851_v20 }
  0xbf   : > { %1215 = vrot.lane.b32.xlu0 %v4021_v55, %s3686_s19  ;;  %2389 = vmatpush.msra.mxu1 %v2192_v17  ;;  %v2172_v17 = vld [vmem:[%s6664_s1 + $0x28] sm:$0xff] }
  0xc0   : > { %v4040_v62 = vpop.permute.xlu0 %668  ;;  %v4133_v18 = vpop.permute.xlu1 %670 }
  0xc1   : > { %2390 = vmatpush.msra.mxu1 %v2191_v13  ;;  %v2171_v13 = vld [vmem:[%s6664_s1 + $0x20] sm:$0xff]  ;;  %v774_v20 = vsel %vm726_vm0, %v4133_v18, %v4071_v35 }
  0xc3   : > { %2391 = vmatpush.msra.mxu1 %v2190_v15  ;;  %v2186_v15 = vld [vmem:[%s6664_s1 + $0x98] sm:$0xff] }
  0xc6   : > { %1619 = vrot.lane.b32.xlu2 %v4005_v47, %s3687_s20  ;;  %578 = vrot.lane.b32.xlu1 %v4038_v61, %s3685_s16 }
  0xc7   : > { %1639 = vrot.lane.b32.xlu0 %v4035_v60, %s3687_s20 }
  0xc8   : > { %v4064_v24 = vpop.permute.xlu0 %688 }
  0xce   : > { %596 = vrot.lane.b32.xlu2 %v4051_v0, %s3685_s16  ;;  %580 = vrot.lane.b32.xlu1 %v332_v1, %s3685_s16  ;;  %v2179_v1 = vld [vmem:[%s6664_s1 + $0x60] sm:$0xff] }
  0xcf   : > { %616 = vrot.lane.b32.xlu0 %v4055_v5, %s3685_s16  ;;  %2345 = vmatpush.msra.mxu0 %v2179_v1  ;;  %v2174_v1 = vld [vmem:[%s6664_s1 + $0x38] sm:$0xff] }
  0xd0   : > { %v4104_v10 = vpop.permute.xlu0 %692 }
  0xd1   : > { %2346 = vmatpush.msra.mxu0 %v2178_v26  ;;  %v4187_v26 = vpop.permute.xlu1 %690 }
  0xd3   : > { %2347 = vmatpush.msra.mxu0 %v2177_v16  ;;  %v4193_v16 = vadd.f32 %v954_v57, %v447_v50  ;;  %v2187_v57 = vld [vmem:[%s6664_s1 + $0xa0] sm:$0xff] }
  0xd5   : > { %2348 = vmatpush.msra.mxu0 %v2176_v45  ;;  %v2189_v45 = vld [vmem:[%s6664_s1 + $0xb0] sm:$0xff] }
  0xd6   : > { %614 = vrot.lane.b32.xlu1 %v4076_v40, %s3685_s16  ;;  %1213 = vrot.lane.b32.xlu2 %v4035_v60, %s3686_s19 }
  0xd7   : > { %1233 = vrot.lane.b32.xlu0 %v4073_v36, %s3686_s19  ;;  %2349 = vmatpush.msra.mxu0 %v2175_v54  ;;  %v2188_v54 = vld [vmem:[%s6664_s1 + $0xa8] sm:$0xff] }
  0xd8   : > { %v4147_v42 = vpop.permute.xlu0 %574  ;;  %2392 = vmatpush.msra.mxu1 %v2189_v45  ;;  %v2169_v45 = vld [vmem:[%s6664_s1 + $0x10] sm:$0xff] }
  0xd9   : > { %2350 = vmatpush.msra.mxu0 %v2174_v1  ;;  %v2170_v1 = vld [vmem:[%s6664_s1 + $0x18] sm:$0xff] }
  0xda   : > { %2393 = vmatpush.msra.mxu1 %v2188_v54  ;;  %v773_v54 = vsel %vm726_vm0, %v4040_v62, %v4133_v18 }
  0xdb   : > { %2351 = vmatpush.msra.mxu0 %v2173_v19  ;;  %v4229_v19 = vld [vmem:[%s3757_s15 + $0x160] sm:$0xff]  ;;  %v964_v6 = vmul.f32 %v3918_v39, %v773_v54 }
  0xdc   : > { %2394 = vmatpush.msra.mxu1 %v2187_v57 }
  0xdd   : > { %2352 = vmatpush.msra.mxu0 %v2172_v17  ;;  %v2185_v17 = vld [vmem:[%s6664_s1 + $0x90] sm:$0xff]  ;;  %v4271_v33 = vadd.f32 %v964_v6, %v457_v48 }
  0xde   : > { %1641 = vrot.lane.b32.xlu1 %v4021_v55, %s3687_s20  ;;  %1217 = vrot.lane.b32.xlu2 %v4117_v59, %s3686_s19 }
  0xdf   : > { %1237 = vrot.lane.b32.xlu0 %v4115_v58, %s3686_s19  ;;  %2353 = vmatpush.msra.mxu0 %v2171_v13  ;;  %v2168_v13 = vld [vmem:[%s6664_s1 + $0x8] sm:$0xff] }
  0xe0   : > { %v4199_v49 = vpop.permute.xlu0 %708  ;;  %2395 = vmatpush.msra.mxu1 %v2186_v15 }
  0xe1   : > { %2354 = vmatpush.msra.mxu0 %v2170_v1  ;;  %v2184_v1 = vld [vmem:[%s6664_s1 + $0x88] sm:$0xff] }
  0xe2   : > { %2396 = vmatpush.msra.mxu1 %v2185_v17  ;;  %v772_v17 = vsel %vm726_vm0, %v4048_v63, %v4040_v62  ;;  %v458_v62 = vmul.f32 %v3916_v38, %v3859_v22  ;;  %v965_v63 = vmul.f32 %v3918_v39, %v774_v20 }
  0xe3   : > { %2355 = vmatpush.msra.mxu0 %v2169_v45  ;;  %v2183_v45 = vld [vmem:[%s6664_s1 + $0x80] sm:$0xff]  ;;  %v963_v6 = vmul.f32 %v3918_v39, %v772_v17 }
  0xe4   : > { %2397 = vmatpush.msra.mxu1 %v2184_v1  ;;  %v782_v1 = vsel %vm726_vm0, %v4064_v24, %v4187_v26 }
  0xe5   : > { %2356 = vmatpush.msra.mxu0 %v2168_v13  ;;  %v4295_v13 = vadd.f32 %v965_v63, %v458_v62  ;;  %v974_v17 = vmul.f32 %v3918_v39, %v782_v1  ;;  %v781_v62 = vsel %vm726_vm0, %v4119_v12, %v4064_v24 }
  0xe6   : > { %1643 = vrot.lane.b32.xlu1 %v4117_v59, %s3687_s20  ;;  %598 = vrot.lane.b32.xlu2 %v4150_v44, %s3685_s16  ;;  %v2167_v59 = vld [vmem:[%s6664_s1] sm:$0xff]  ;;  %v973_v12 = vmul.f32 %v3918_v39, %v781_v62 }
  0xe7   : > { %618 = vrot.lane.b32.xlu0 %v4153_v8, %s3685_s16  ;;  %2357 = vmatpush.msra.mxu0 %v2167_v59  ;;  %v456_v59 = vmul.f32 %v3916_v38, %v3856_v21  ;;  %6748 = vst [vmem:[#allocation20_spill] sm:$0xff] %v4295_v13 }
  0xe8   : > { %v4249_v57 = vpop.permute.xlu0 %712  ;;  %2398 = vmatpush.msra.mxu1 %v2183_v45  ;;  %v467_v45 = vmul.f32 %v3916_v38, %v3866_v23  ;;  %v466_v23 = vmul.f32 %v3916_v38, %v3880_v27  ;;  %v4336_v27 = vld [vmem:[%s3757_s15 + $0x120] sm:$0xff] }
  0xe9   : > { %6746 = vst [vmem:[#allocation18_spill] sm:$0xff] %v4249_v57 }
  0xee   : > { %600 = vrot.lane.b32.xlu2 %v342_v41, %s3685_s16  ;;  %1235 = vrot.lane.b32.xlu1 %v4193_v16, %s3686_s19  ;;  %v4226_v41 = vld [vmem:[%s3757_s15 + $0x110] sm:$0xff] }
  0xef   : > { %620 = vrot.lane.b32.xlu0 %v352_v9, %s3685_s16  ;;  %v4231_v9 = vpop.permute.xlu1 %576 }
  0xf0   : > { %v4214_v50 = vpop.permute.xlu2 %1157  ;;  %v4291_v18 = vpop.permute.xlu0 %594 }
  0xf1   : > { %6745 = vst [vmem:[#allocation17_spill] sm:$0xff] %v4214_v50 }
  0xf6   : > { %634 = vrot.lane.b32.xlu2 %v4226_v41, %s3685_s16  ;;  %1659 = vrot.lane.b32.xlu1 %v4073_v36, %s3687_s20 }
  0xf7   : > { %654 = vrot.lane.b32.xlu0 %v4229_v19, %s3685_s16  ;;  %v4279_v54 = vpop.permute.xlu1 %710 }
  0xf8   : > { %v4256_v15 = vpop.permute.xlu2 %1583 }
  0xfe   : > { %1661 = vrot.lane.b32.xlu2 %v4193_v16, %s3687_s20  ;;  %636 = vrot.lane.b32.xlu1 %v360_v52, %s3685_s16  ;;  %v4293_v52 = vadd.f32 %v963_v6, %v456_v59  ;;  %v4311_v6 = vadd.f32 %v974_v17, %v467_v45 }
  0xff   : > { %1681 = vrot.lane.b32.xlu0 %v4271_v33, %s3687_s20 }
 0x100   : > { %v4286_v48 = vpop.permute.xlu2 %1175  ;;  %6747 = vst [vmem:[#allocation19_spill] sm:$0xff] %v4293_v52 }
 0x106   : > { %1663 = vrot.lane.b32.xlu2 %v4115_v58, %s3687_s20  ;;  %1253 = vrot.lane.b32.xlu1 %v4293_v52, %s3686_s19 }
 0x107   : > { %1683 = vrot.lane.b32.xlu0 %v4295_v13, %s3687_s20 }
 0x108   : > { %v1156_v21 = vpop.permute.xlu1 %1155  ;;  %v1600_v22 = vpop.permute.xlu2 %1599 }
 0x109   : > { %v1154_v20 = vpop.permute.xlu0 %1153  ;;  %v1315_v59 = vsel %vm1313_vm1, %v1156_v21, %v4214_v50 }
 0x10a   : > { %v1314_v63 = vsel %vm1313_vm1, %v1154_v20, %v1156_v21  ;;  %v1500_v1 = vmax.f32 %v3939_v53, %v1315_v59  ;;  %v4339_v59 = vadd.f32 %v973_v12, %v466_v23 }
 0x10b   : > { %v1499_v21 = vmax.f32 %v3935_v51, %v1314_v63 }
 0x10c   : > { %6749 = vst [vmem:[#allocation21_spill] sm:$0xff] %v4339_v59 }
 0x10e   : > { %1255 = vrot.lane.b32.xlu2 %v4271_v33, %s3686_s19  ;;  %1257 = vrot.lane.b32.xlu1 %v4295_v13, %s3686_s19  ;;  %v4332_v13 = vstv %s3531_s21 }
 0x10f   : > { %1275 = vrot.lane.b32.xlu0 %v4311_v6, %s3686_s19 }
 0x110   : > { %v1582_v45 = vpop.permute.xlu1 %1581  ;;  %v4326_v24 = vpop.permute.xlu2 %1603 }
 0x111   : > { %v1741_v17 = vsel %vm1739_vm2, %v1582_v45, %v4256_v15  ;;  %v1580_v20 = vpop.permute.xlu0 %1579 }
 0x112   : > { %v1740_v58 = vsel %vm1739_vm2, %v1580_v20, %v1582_v45  ;;  %v1926_v35 = vmax.f32 %v1500_v1, %v1741_v17  ;;  %v362_v17 = vld [vmem:[%s3757_s15 + $0x128] sm:$0xff]  ;;  %v380_v20 = vld [vmem:[%s3757_s15 + $0x1b8] sm:$0xff] }
 0x113   : > { %v1925_v50 = vmax.f32 %v1499_v21, %v1740_v58  ;;  %v4353_v21 = vld [vmem:[%s3757_s15 + $0x168] sm:$0xff] }
 0x114   : > { %v2008_v53 = vadd.f32 %v4332_v13, %v1926_v35 }
 0x115   : > { %v2007_v62 = vadd.f32 %v4332_v13, %v1925_v50 }
 0x116   : > { %1679 = vrot.lane.b32.xlu2 %v4293_v52, %s3687_s20  ;;  %638 = vrot.lane.b32.xlu1 %v4336_v27, %s3685_s16  ;;  %v2088_v63 = vmax.f32 %v2008_v53, 0.0 }
 0x117   : > { %1699 = vrot.lane.b32.xlu0 %v4339_v59, %s3687_s20  ;;  %v2087_v58 = vmax.f32 %v2007_v62, 0.0  ;;  %v730_v62 = vsel %vm726_vm0, %v3926_v43, %v4147_v42 }
 0x118   : > { %2399 = vmatmul.f32.vlgmr.msra.gmra.mxu1 %v2088_v63  ;;  %v1174_v35 = vpop.permute.xlu1 %1173  ;;  %v1196_v1 = vpop.permute.xlu2 %1195 }
 0x119   : > { %v1323_v23 = vsel %vm1313_vm1, %v1174_v35, %v4286_v48  ;;  %2358 = vmatmul.f32.vlgmr.msra.gmra.mxu0 %v2087_v58  ;;  %v1602_v50 = vpop.permute.xlu0 %1601 }
 0x11a   : > { %v1509_v45 = vmax.f32 %v3967_v11, %v1323_v23  ;;  %v1749_v12 = vsel %vm1739_vm2, %v1600_v22, %v1602_v50  ;;  %v409_v23 = vmul.f32 %v3916_v38, %v3775_v3 }
 0x11c   : > { %v1935_v53 = vmax.f32 %v1509_v45, %v1749_v12  ;;  %v916_v45 = vmul.f32 %v3918_v39, %v730_v62  ;;  %v791_v62 = vsel %vm726_vm0, %v4199_v49, %v4279_v54 }
 0x11e   : > { %656 = vrot.lane.b32.xlu2 %v4353_v21, %s3685_s16  ;;  %640 = vrot.lane.b32.xlu1 %v362_v17, %s3685_s16  ;;  %v2017_v63 = vadd.f32 %v4332_v13, %v1935_v53  ;;  %v379_v53 = vld [vmem:[%s3757_s15 + $0x1b0] sm:$0xff]  ;;  %v4380_v3 = vadd.f32 %v916_v45, %v409_v23  ;;  %v477_v45 = vmul.f32 %v3916_v38, %v3905_v32 }
 0x11f   : > { %676 = vrot.lane.b32.xlu0 %v380_v20, %s3685_s16  ;;  %v1750_v20 = vsel %vm1739_vm2, %v1602_v50, %v4326_v24  ;;  %v792_v32 = vsel %vm726_vm0, %v4279_v54, %v4249_v57 }
 0x120   : > { %v4365_v22 = vpop.permute.xlu1 %1177  ;;  %v1620_v58 = vpop.permute.xlu2 %1619  ;;  %v2097_v35 = vmax.f32 %v2017_v63, 0.0  ;;  %v783_v63 = vsel %vm726_vm0, %v4187_v26, %v4104_v10  ;;  %v985_v54 = vmul.f32 %v3918_v39, %v792_v32 }
 0x121   : > { %v1324_v43 = vsel %vm1313_vm1, %v4286_v48, %v4365_v22  ;;  %v1622_v12 = vpop.permute.xlu0 %1621  ;;  %v468_v48 = vmul.f32 %v3916_v38, %v3872_v25  ;;  %v975_v26 = vmul.f32 %v3918_v39, %v783_v63 }
 0x122   : > { %v1510_v17 = vmax.f32 %v3963_v4, %v1324_v43  ;;  %2361 = vmatmul.f32.gmra.mxu0 %v2097_v35  ;;  %v984_v43 = vmul.f32 %v3918_v39, %v791_v62  ;;  %v1758_v25 = vsel %vm1739_vm2, %v1620_v58, %v1622_v12 }
 0x124   : > { %v1936_v11 = vmax.f32 %v1510_v17, %v1750_v20  ;;  %v4406_v51 = vadd.f32 %v984_v43, %v477_v45 }
 0x126   : > { %674 = vrot.lane.b32.xlu1 %v379_v53, %s3685_s16  ;;  %1273 = vrot.lane.b32.xlu2 %v4339_v59, %s3686_s19  ;;  %v2018_v4 = vadd.f32 %v4332_v13, %v1936_v11  ;;  %v4404_v53 = vadd.f32 %v975_v26, %v468_v48  ;;  %v478_v26 = vmul.f32 %v3916_v38, %v3898_v31 }
 0x127   : > { %1159 = vrot.lane.b32.xlu0 %v4380_v3, %s3686_s19  ;;  %v731_v31 = vsel %vm726_vm0, %v4147_v42, %v4231_v9 }
 0x128   : > { %v4394_v50 = vpop.permute.xlu2 %596  ;;  %v1194_v35 = vpop.permute.xlu1 %1193  ;;  %v2098_v23 = vmax.f32 %v2018_v4, 0.0  ;;  %6750 = vst [vmem:[#allocation22_spill] sm:$0xff] %v4404_v53 }
 0x129   : > { %v1332_v17 = vsel %vm1313_vm1, %v1194_v35, %v1196_v1  ;;  %v4400_v11 = vpop.permute.xlu0 %1623 }
 0x12a   : > { %v1519_v20 = vmax.f32 %v4005_v47, %v1332_v17  ;;  %2402 = vmatmul.f32.gmra.mxu1 %v2098_v23  ;;  %v1759_v43 = vsel %vm1739_vm2, %v1622_v12, %v4400_v11  ;;  %v4429_v17 = vld [vmem:[%s3757_s15 + $0x170] sm:$0xff]  ;;  %v917_v12 = vmul.f32 %v3918_v39, %v731_v31 }
 0x12c   : > { %v1945_v63 = vmax.f32 %v1519_v20, %v1758_v25  ;;  %v4434_v25 = vadd.f32 %v985_v54, %v478_v26  ;;  %v790_v54 = vsel %vm726_vm0, %v4168_v14, %v4199_v49 }
 0x12e   : > { %1701 = vrot.lane.b32.xlu1 %v4311_v6, %s3687_s20  ;;  %1277 = vrot.lane.b32.xlu2 %v4404_v53, %s3686_s19  ;;  %v2027_v62 = vadd.f32 %v4332_v13, %v1945_v63  ;;  %6751 = vst [vmem:[#allocation23_spill] sm:$0xff] %v4434_v25 }
 0x12f   : > { %1295 = vrot.lane.b32.xlu0 %v4406_v51, %s3686_s19 }
 0x130   : > { %v4418_v58 = vpop.permute.xlu1 %1197  ;;  %v1214_v4 = vpop.permute.xlu2 %1213  ;;  %v2107_v48 = vmax.f32 %v2027_v62, 0.0 }
 0x131   : > { %v1333_v35 = vsel %vm1313_vm1, %v1196_v1, %v4418_v58  ;;  %v1216_v23 = vpop.permute.xlu0 %1215  ;;  %v410_v1 = vmul.f32 %v3916_v38, %v3890_v29  ;;  %v476_v29 = vmul.f32 %v3916_v38, %v3895_v30 }
 0x132   : > { %v1520_v45 = vmax.f32 %v3987_v37, %v1333_v35  ;;  %2364 = vmatmul.f32.gmra.mxu0 %v2107_v48  ;;  %v372_v48 = vld [vmem:[%s3757_s15 + $0x178] sm:$0xff]  ;;  %v983_v35 = vmul.f32 %v3918_v39, %v790_v54 }
 0x133   : > { %v4449_v26 = vadd.f32 %v917_v12, %v410_v1  ;;  %v4486_v12 = vld [vmem:[%s3757_s15 + $0x200] sm:$0xff] }
 0x134   : > { %v1946_v20 = vmax.f32 %v1520_v45, %v1759_v43  ;;  %v4468_v14 = vadd.f32 %v983_v35, %v476_v29 }
 0x136   : > { %1703 = vrot.lane.b32.xlu1 %v4404_v53, %s3687_s20  ;;  %658 = vrot.lane.b32.xlu2 %v4429_v17, %s3685_s16  ;;  %v2028_v37 = vadd.f32 %v4332_v13, %v1946_v20  ;;  %6753 = vst [vmem:[#allocation25_spill] sm:$0xff] %v4468_v14 }
 0x137   : > { %1297 = vrot.lane.b32.xlu0 %v4434_v25, %s3686_s19 }
 0x138   : > { %v579_v63 = vpop.permute.xlu1 %578  ;;  %v4446_v42 = vpop.permute.xlu2 %1217  ;;  %v2108_v32 = vmax.f32 %v2028_v37, 0.0  ;;  %v411_v37 = vmul.f32 %v3916_v38, %v3883_v28 }
 0x139   : > { %6752 = vst [vmem:[#allocation24_spill] sm:$0xff] %v4446_v42  ;;  %v1640_v62 = vpop.permute.xlu0 %1639  ;;  %v732_v49 = vsel %vm726_vm0, %v4231_v9, %v579_v63 }
 0x13a   : > { %2405 = vmatmul.f32.gmra.mxu1 %v2108_v32  ;;  %v918_v9 = vmul.f32 %v3918_v39, %v732_v49  ;;  %v1341_v32 = vsel %vm1313_vm1, %v1214_v4, %v1216_v23 }
 0x13b   : > { %v1529_v28 = vmax.f32 %v4035_v60, %v1341_v32  ;;  %v740_v32 = vsel %vm726_vm0, %v4291_v18, %v4394_v50 }
 0x13c   : > { %v927_v60 = vmul.f32 %v3918_v39, %v740_v32 }
 0x13e   : > { %660 = vrot.lane.b32.xlu2 %v372_v48, %s3685_s16  ;;  %1161 = vrot.lane.b32.xlu1 %v4449_v26, %s3686_s19  ;;  %v4489_v48 = vadd.f32 %v918_v9, %v411_v37  ;;  %v4504_v37 = vld [vmem:[%s3757_s15 + $0x1c0] sm:$0xff]  ;;  %v399_v9 = vld [vmem:[%s3757_s15 + $0x250] sm:$0xff] }
 0x13f   : > { %1721 = vrot.lane.b32.xlu0 %v4406_v51, %s3687_s20  ;;  %6755 = vst [vmem:[#allocation27_spill] sm:$0xff] %v4504_v37 }
 0x140   : > { %v4462_v45 = vpop.permute.xlu1 %580  ;;  %v4464_v43 = vpop.permute.xlu2 %598 }
 0x141   : > { %v4466_v20 = vpop.permute.xlu0 %616 }
 0x146   : > { %1585 = vrot.lane.b32.xlu1 %v4380_v3, %s3687_s20  ;;  %1293 = vrot.lane.b32.xlu2 %v4468_v14, %s3686_s19 }
 0x147   : > { %1723 = vrot.lane.b32.xlu0 %v4434_v25, %s3687_s20  ;;  %v1342_v25 = vsel %vm1313_vm1, %v1216_v23, %v4446_v42  ;;  %v420_v23 = vmul.f32 %v3916_v38, %v3912_v34  ;;  %v733_v34 = vsel %vm726_vm0, %v579_v63, %v4462_v45 }
 0x148   : > { %v4478_v30 = vpop.permute.xlu1 %614  ;;  %v4480_v31 = vpop.permute.xlu2 %600 }
 0x149   : > { %6754 = vst [vmem:[#allocation26_spill] sm:$0xff] %v4480_v31  ;;  %v1234_v1 = vpop.permute.xlu0 %1233 }
 0x14e   : > { %1587 = vrot.lane.b32.xlu1 %v4449_v26, %s3687_s20  ;;  %694 = vrot.lane.b32.xlu2 %v4486_v12, %s3685_s16 }
 0x14f   : > { %1163 = vrot.lane.b32.xlu0 %v4489_v48, %s3686_s19 }
 0x150   : > { %v1642_v54 = vpop.permute.xlu1 %1641  ;;  %v4498_v29 = vpop.permute.xlu2 %634 }
 0x151   : > { %v1767_v35 = vsel %vm1739_vm2, %v1640_v62, %v1642_v54  ;;  %v4501_v49 = vpop.permute.xlu0 %1237 }
 0x152   : > { %v1955_v4 = vmax.f32 %v1529_v28, %v1767_v35  ;;  %v1530_v28 = vmax.f32 %v4021_v55, %v1342_v25  ;;  %v739_v55 = vsel %vm726_vm0, %v3947_v56, %v4291_v18  ;;  %v4534_v25 = vadd.f32 %v927_v60, %v420_v23 }
 0x153   : > { %v412_v60 = vmul.f32 %v3916_v38, %v4038_v61  ;;  %v919_v18 = vmul.f32 %v3918_v39, %v733_v34  ;;  %v741_v61 = vsel %vm726_vm0, %v4394_v50, %v4464_v43 }
 0x154   : > { %v2037_v47 = vadd.f32 %v4332_v13, %v1955_v4  ;;  %v928_v50 = vmul.f32 %v3918_v39, %v741_v61  ;;  %v749_v61 = vsel %vm726_vm0, %v4478_v30, %v4466_v20 }
 0x156   : > { %678 = vrot.lane.b32.xlu1 %v4504_v37, %s3685_s16  ;;  %1719 = vrot.lane.b32.xlu2 %v4468_v14, %s3687_s20  ;;  %v2117_v62 = vmax.f32 %v2037_v47, 0.0  ;;  %v382_v47 = vld [vmem:[%s3757_s15 + $0x1c8] sm:$0xff] }
 0x157   : > { %714 = vrot.lane.b32.xlu0 %v399_v9, %s3685_s16  ;;  %v390_v37 = vld [vmem:[%s3757_s15 + $0x208] sm:$0xff] }
 0x158   : > { %v4519_v35 = vpop.permute.xlu1 %1643  ;;  %v1662_v4 = vpop.permute.xlu2 %1661  ;;  %2367 = vmatmul.f32.gmra.mxu0 %v2117_v62 }
 0x159   : > { %v1768_v53 = vsel %vm1739_vm2, %v1642_v54, %v4519_v35  ;;  %v4526_v57 = vpop.permute.xlu0 %618 }
 0x15a   : > { %v1956_v42 = vmax.f32 %v1530_v28, %v1768_v53  ;;  %v419_v53 = vmul.f32 %v3916_v38, %v3793_v7 }
 0x15c   : > { %v2038_v9 = vadd.f32 %v4332_v13, %v1956_v42  ;;  %v926_v42 = vmul.f32 %v3918_v39, %v739_v55 }
 0x15e   : > { %680 = vrot.lane.b32.xlu1 %v382_v47, %s3685_s16  ;;  %696 = vrot.lane.b32.xlu2 %v390_v37, %s3685_s16  ;;  %v2118_v54 = vmax.f32 %v2038_v9, 0.0  ;;  %v4557_v28 = vadd.f32 %v926_v42, %v419_v53  ;;  %v4560_v9 = vadd.f32 %v919_v18, %v412_v60  ;;  %v421_v53 = vmul.f32 %v3916_v38, %v4051_v0 }
 0x15f   : > { %1607 = vrot.lane.b32.xlu0 %v4534_v25, %s3687_s20 }
 0x160   : > { %v4545_v32 = vpop.permute.xlu2 %1663  ;;  %v1236_v56 = vpop.permute.xlu1 %1235  ;;  %2408 = vmatmul.f32.gmra.mxu1 %v2118_v54  ;;  %6758 = vst [vmem:[#allocation30_spill] sm:$0xff] %v4560_v9 }
 0x161   : > { %6756 = vst [vmem:[#allocation28_spill] sm:$0xff] %v4545_v32  ;;  %v1351_v63 = vsel %vm1313_vm1, %v1236_v56, %v4501_v49  ;;  %v4552_v37 = vpop.permute.xlu0 %620  ;;  %v1777_v7 = vsel %vm1739_vm2, %v1662_v4, %v4545_v32  ;;  %v1350_v47 = vsel %vm1313_vm1, %v1234_v1, %v1236_v56 }
 0x162   : > { %6757 = vst [vmem:[#allocation29_spill] sm:$0xff] %v4552_v37  ;;  %v1540_v62 = vmax.f32 %v4193_v16, %v1351_v63  ;;  %v1539_v55 = vmax.f32 %v4073_v36, %v1350_v47  ;;  %v4580_v63 = vadd.f32 %v928_v50, %v421_v53  ;;  %v333_v47 = vld [vmem:[%s3757_s15 + $0x40] sm:$0xff]  ;;  %v748_v36 = vsel %vm726_vm0, %v3977_v2, %v4478_v30 }
 0x163   : > { %v936_v2 = vmul.f32 %v3918_v39, %v748_v36 }
 0x164   : > { %v1966_v23 = vmax.f32 %v1540_v62, %v1777_v7 }
 0x166   : > { %1181 = vrot.lane.b32.xlu1 %v4534_v25, %s3686_s19  ;;  %1179 = vrot.lane.b32.xlu2 %v4557_v28, %s3686_s19  ;;  %v2048_v16 = vadd.f32 %v4332_v13, %v1966_v23  ;;  %v4591_v23 = vld [vmem:[%s3757_s15 + $0x210] sm:$0xff] }
 0x167   : > { %1591 = vrot.lane.b32.xlu0 %v4560_v9, %s3687_s20 }
 0x168   : > { %v1660_v1 = vpop.permute.xlu1 %1659  ;;  %v1256_v34 = vpop.permute.xlu2 %1255  ;;  %v2128_v54 = vmax.f32 %v2048_v16, 0.0 }
 0x169   : > { %v1776_v42 = vsel %vm1739_vm2, %v1660_v1, %v1662_v4  ;;  %v4577_v56 = vpop.permute.xlu0 %654  ;;  %v430_v1 = vmul.f32 %v3916_v38, %v4076_v40  ;;  %v742_v40 = vsel %vm726_vm0, %v4464_v43, %v4480_v31  ;;  %v422_v43 = vmul.f32 %v3916_v38, %v4150_v44  ;;  %v2213_v44 = vld [vmem:[%s6664_s1 + $0x170] sm:$0xff]  ;;  %v2223_v31 = vld [vmem:[%s6664_s1 + $0x1c0] sm:$0xff] }
 0x16a   : > { %v1965_v60 = vmax.f32 %v1539_v55, %v1776_v42  ;;  %2411 = vmatmul.f32.gmra.mxu1 %v2128_v54  ;;  %v937_v54 = vmul.f32 %v3918_v39, %v749_v61 }
 0x16c   : > { %v2047_v18 = vadd.f32 %v4332_v13, %v1965_v60 }
 0x16e   : > { %1165 = vrot.lane.b32.xlu1 %v4560_v9, %s3686_s19  ;;  %1605 = vrot.lane.b32.xlu2 %v4557_v28, %s3687_s20  ;;  %v2127_v0 = vmax.f32 %v2047_v18, 0.0  ;;  %v392_v18 = vld [vmem:[%s3757_s15 + $0x218] sm:$0xff]  ;;  %v4617_v9 = vadd.f32 %v937_v54, %v430_v1 }
 0x16f   : > { %1183 = vrot.lane.b32.xlu0 %v4580_v63, %s3686_s19 }
 0x170   : > { %v4588_v62 = vpop.permute.xlu1 %636  ;;  %v1680_v4 = vpop.permute.xlu2 %1679  ;;  %2370 = vmatmul.f32.gmra.mxu0 %v2127_v0  ;;  %v400_v0 = vld [vmem:[%s3757_s15 + $0x258] sm:$0xff] }
 0x171   : > { %v1682_v7 = vpop.permute.xlu0 %1681 }
 0x172   : > { %v1785_v60 = vsel %vm1739_vm2, %v1680_v4, %v1682_v7  ;;  %v3626_v4 = vld [vmem:[%s3757_s15 + $0xb8] sm:$0xff] }
 0x176   : > { %698 = vrot.lane.b32.xlu1 %v4591_v23, %s3685_s16  ;;  %1589 = vrot.lane.b32.xlu2 %v4489_v48, %s3687_s20 }
 0x177   : > { %582 = vrot.lane.b32.xlu0 %v333_v47, %s3685_s16 }
 0x178   : > { %v4602_v16 = vpop.permute.xlu2 %656  ;;  %v1254_v55 = vpop.permute.xlu1 %1253 }
 0x179   : > { %v1359_v53 = vsel %vm1313_vm1, %v1254_v55, %v1256_v34  ;;  %v4608_v50 = vpop.permute.xlu0 %1683  ;;  %v429_v55 = vmul.f32 %v3626_v4, %v3916_v38  ;;  %v2211_v4 = vld [vmem:[%s6664_s1 + $0x160] sm:$0xff] }
 0x17a   : > { %6759 = vst [vmem:[#allocation31_spill] sm:$0xff] %v4608_v50  ;;  %v1549_v42 = vmax.f32 %v4293_v52, %v1359_v53  ;;  %v929_v53 = vmul.f32 %v3918_v39, %v742_v40  ;;  %v2212_v40 = vld [vmem:[%s6664_s1 + $0x168] sm:$0xff] }
 0x17c   : > { %v1975_v47 = vmax.f32 %v1549_v42, %v1785_v60 }
 0x17e   : > { %700 = vrot.lane.b32.xlu1 %v392_v18, %s3685_s16  ;;  %716 = vrot.lane.b32.xlu2 %v400_v0, %s3685_s16  ;;  %v2057_v61 = vadd.f32 %v4332_v13, %v1975_v47  ;;  %v2214_v18 = vld [vmem:[%s6664_s1 + $0x178] sm:$0xff]  ;;  %v1786_v0 = vsel %vm1739_vm2, %v1682_v7, %v4608_v50  ;;  %v4650_v47 = vadd.f32 %v936_v2, %v429_v55  ;;  %v4774_v50 = vld [vmem:[%s3757_s15 + $0x260] sm:$0xff] }
 0x17f   : > { %1627 = vrot.lane.b32.xlu0 %v4617_v9, %s3687_s20  ;;  %2424 = vmatpush.msra.mxu2 %v2214_v18  ;;  %v2230_v18 = vld [vmem:[%s6664_s1 + $0x1f8] sm:$0xff]  ;;  %6765 = vst [vmem:[#allocation37_spill] sm:$0xff] %v4774_v50 }
 0x180   : > { %v4630_v30 = vpop.permute.xlu1 %1257  ;;  %v4632_v1 = vpop.permute.xlu2 %1273  ;;  %v2137_v54 = vmax.f32 %v2057_v61, 0.0  ;;  %v4655_v61 = vadd.f32 %v929_v53, %v422_v43  ;;  %2465 = vmatpush.msra.mxu3 %v2230_v18  ;;  %v4727_v18 = vld [vmem:[%s3757_s15 + $0x48] sm:$0xff] }
 0x181   : > { %6760 = vst [vmem:[#allocation32_spill] sm:$0xff] %v4630_v30  ;;  %v1360_v42 = vsel %vm1313_vm1, %v1256_v34, %v4630_v30  ;;  %v4639_v60 = vpop.permute.xlu0 %1275  ;;  %2425 = vmatpush.msra.mxu2 %v2213_v44 }
 0x182   : > { %v1550_v36 = vmax.f32 %v4271_v33, %v1360_v42  ;;  %2373 = vmatmul.f32.gmra.mxu0 %v2137_v54  ;;  %6761 = vst [vmem:[#allocation33_spill] sm:$0xff] %v4655_v61  ;;  %v750_v33 = vsel %vm726_vm0, %v4466_v20, %v4526_v57  ;;  %v431_v54 = vmul.f32 %v3916_v38, %v4055_v5  ;;  %v2210_v42 = vld [vmem:[%s6664_s1 + $0x158] sm:$0xff]  ;;  %v2209_v5 = vld [vmem:[%s6664_s1 + $0x150] sm:$0xff] }
 0x183   : > { %2426 = vmatpush.msra.mxu2 %v2212_v40  ;;  %v938_v43 = vmul.f32 %v3918_v39, %v750_v33  ;;  %v2207_v40 = vld [vmem:[%s6664_s1 + $0x140] sm:$0xff]  ;;  %6763 = vst [vmem:[#allocation35_spill] sm:$0xff] %v4727_v18  ;;  %v1368_v30 = vsel %vm1313_vm1, %v4632_v1, %v4639_v60  ;;  %v2220_v1 = vld [vmem:[%s6664_s1 + $0x1a8] sm:$0xff] }
 0x184   : > { %v1976_v34 = vmax.f32 %v1550_v36, %v1786_v0  ;;  %v2229_v36 = vld [vmem:[%s6664_s1 + $0x1f0] sm:$0xff]  ;;  %v2208_v0 = vld [vmem:[%s6664_s1 + $0x148] sm:$0xff]  ;;  %v2227_v33 = vld [vmem:[%s6664_s1 + $0x1e0] sm:$0xff] }
 0x185   : > { %2427 = vmatpush.msra.mxu2 %v2211_v4  ;;  %2466 = vmatpush.msra.mxu3 %v2229_v36  ;;  %v4694_v44 = vadd.f32 %v938_v43, %v431_v54  ;;  %v2206_v54 = vld [vmem:[%s6664_s1 + $0x138] sm:$0xff]  ;;  %v2225_v36 = vld [vmem:[%s6664_s1 + $0x1d0] sm:$0xff] }
 0x186   : > { %1199 = vrot.lane.b32.xlu2 %v4650_v47, %s3686_s19  ;;  %1201 = vrot.lane.b32.xlu1 %v4617_v9, %s3686_s19  ;;  %v2058_v7 = vadd.f32 %v4332_v13, %v1976_v34  ;;  %v2228_v34 = vld [vmem:[%s6664_s1 + $0x1e8] sm:$0xff]  ;;  %v2226_v43 = vld [vmem:[%s6664_s1 + $0x1d8] sm:$0xff] }
 0x187   : > { %1611 = vrot.lane.b32.xlu0 %v4655_v61, %s3687_s20  ;;  %2428 = vmatpush.msra.mxu2 %v2210_v42  ;;  %v2205_v42 = vld [vmem:[%s6664_s1 + $0x130] sm:$0xff] }
 0x188   : > { %v4670_v55 = vpop.permute.xlu1 %638  ;;  %v4672_v2 = vpop.permute.xlu2 %1277  ;;  %v2138_v20 = vmax.f32 %v2058_v7, 0.0  ;;  %2467 = vmatpush.msra.mxu3 %v2228_v34  ;;  %v2204_v34 = vld [vmem:[%s6664_s1 + $0x128] sm:$0xff] }
 0x189   : > { %v4677_v53 = vpop.permute.xlu0 %1699  ;;  %2429 = vmatpush.msra.mxu2 %v2209_v5  ;;  %v343_v5 = vld [vmem:[%s3757_s15 + $0x90] sm:$0xff] }
 0x18a   : > { %2414 = vmatmul.f32.gmra.mxu1 %v2138_v20  ;;  %2468 = vmatpush.msra.mxu3 %v2227_v33 }
 0x18b   : > { %2430 = vmatpush.msra.mxu2 %v2208_v0 }
 0x18c   : > { %2469 = vmatpush.msra.mxu3 %v2226_v43 }
 0x18d   : > { %2431 = vmatpush.msra.mxu2 %v2207_v40  ;;  %v758_v40 = vsel %vm726_vm0, %v4498_v29, %v4588_v62 }
 0x18e   : > { %1625 = vrot.lane.b32.xlu2 %v4650_v47, %s3687_s20  ;;  %1185 = vrot.lane.b32.xlu1 %v4655_v61, %s3686_s19 }
 0x18f   : > { %1203 = vrot.lane.b32.xlu0 %v4694_v44, %s3686_s19  ;;  %2432 = vmatpush.msra.mxu2 %v2206_v54  ;;  %v2224_v54 = vld [vmem:[%s6664_s1 + $0x1c8] sm:$0xff] }
 0x190   : > { %v4711_v7 = vpop.permute.xlu1 %640  ;;  %v4713_v4 = vpop.permute.xlu2 %658  ;;  %2470 = vmatpush.msra.mxu3 %v2225_v36  ;;  %v2202_v36 = vld [vmem:[%s6664_s1 + $0x118] sm:$0xff] }
 0x191   : > { %6762 = vst [vmem:[#allocation34_spill] sm:$0xff] %v4711_v7  ;;  %v4715_v20 = vpop.permute.xlu0 %676  ;;  %2433 = vmatpush.msra.mxu2 %v2205_v42  ;;  %v2203_v42 = vld [vmem:[%s6664_s1 + $0x120] sm:$0xff] }
 0x192   : > { %2471 = vmatpush.msra.mxu3 %v2224_v54  ;;  %v2201_v54 = vld [vmem:[%s6664_s1 + $0x110] sm:$0xff] }
 0x193   : > { %2434 = vmatpush.msra.mxu2 %v2204_v34  ;;  %v2246_v34 = vld [vmem:[%s6664_s1 + $0x278] sm:$0xff] }
 0x194   : > { %2472 = vmatpush.msra.mxu3 %v2223_v31  ;;  %2506 = vmatpush.msrb.mxu0 %v2246_v34  ;;  %v2244_v34 = vld [vmem:[%s6664_s1 + $0x268] sm:$0xff] }
 0x195   : > { %v2400_v0 = vpop.f32.mrf.mxu1  ;;  %2435 = vmatpush.msra.mxu2 %v2203_v42  ;;  %v757_v42 = vsel %vm726_vm0, %v4003_v46, %v4498_v29  ;;  %v751_v46 = vsel %vm726_vm0, %v4526_v57, %v4552_v37  ;;  %v2200_v29 = vld [vmem:[%s6664_s1 + $0x108] sm:$0xff]  ;;  %v2243_v57 = vld [vmem:[%s6664_s1 + $0x260] sm:$0xff] }
 0x196   : > { %v2359_v33 = vpop.f32.mrf.mxu0  ;;  %1609 = vrot.lane.b32.xlu2 %v4580_v63, %s3687_s20  ;;  %584 = vrot.lane.b32.xlu1 %v4727_v18, %s3685_s16  ;;  %v939_v32 = vmul.f32 %v3918_v39, %v751_v46  ;;  %v1369_v46 = vsel %vm1313_vm1, %v4639_v60, %v4672_v2 }
 0x197   : > { %v4746_v43 = vadd.f32 %v2400_v0, %v2359_v33  ;;  %602 = vrot.lane.b32.xlu0 %v343_v5, %s3685_s16  ;;  %v440_v0 = vmul.f32 %v3916_v38, %v4226_v41  ;;  %v947_v5 = vmul.f32 %v3918_v39, %v758_v40  ;;  %v402_v41 = vld [vmem:[%s3757_s15 + $0x268] sm:$0xff]  ;;  %v2245_v40 = vld [vmem:[%s6664_s1 + $0x270] sm:$0xff]  ;;  %2436 = vmatpush.msra.mxu2 %v2202_v36 }
 0x198   : > { %v4752_v52 = vpop.permute.xlu1 %674  ;;  %v4754_v61 = vpop.permute.xlu2 %660  ;;  %v2221_v36 = vld [vmem:[%s6664_s1 + $0x1b0] sm:$0xff]  ;;  %2507 = vmatpush.msrb.mxu0 %v2245_v40 }
 0x199   : > { %6764 = vst [vmem:[#allocation36_spill] sm:$0xff] %v4746_v43  ;;  %v4762_v33 = vpop.permute.xlu0 %1159  ;;  %v2222_v43 = vld [vmem:[%s6664_s1 + $0x1b8] sm:$0xff]  ;;  %v4789_v31 = vadd.f32 %v947_v5, %v440_v0  ;;  %2437 = vmatpush.msra.mxu2 %v2201_v54  ;;  %v946_v5 = vmul.f32 %v3918_v39, %v757_v42  ;;  %v2199_v54 = vld [vmem:[%s6664_s1 + $0x100] sm:$0xff] }
 0x19a   : > { %2473 = vmatpush.msra.mxu3 %v2222_v43  ;;  %v3627_v43 = vld [vmem:[%s3757_s15 + $0x108] sm:$0xff]  ;;  %2508 = vmatpush.msrb.mxu0 %v2244_v34  ;;  %v2242_v42 = vld [vmem:[%s6664_s1 + $0x258] sm:$0xff] }
 0x19b   : > { %v439_v0 = vmul.f32 %v3627_v43, %v3916_v38  ;;  %2438 = vmatpush.msra.mxu2 %v2200_v29 }
 0x19c   : > { %2474 = vmatpush.msra.mxu3 %v2221_v36  ;;  %2509 = vmatpush.msrb.mxu0 %v2243_v57 }
 0x19d   : > { %2439 = vmatpush.msra.mxu2 %v2199_v54 }
 0x19e   : > { %718 = vrot.lane.b32.xlu2 %v4774_v50, %s3685_s16  ;;  %720 = vrot.lane.b32.xlu1 %v402_v41, %s3685_s16  ;;  %v1559_v41 = vmax.f32 %v4339_v59, %v1368_v30  ;;  %v432_v50 = vmul.f32 %v3916_v38, %v4153_v8  ;;  %v2219_v30 = vld [vmem:[%s6664_s1 + $0x1a0] sm:$0xff]  ;;  %v4834_v8 = vadd.f32 %v946_v5, %v439_v0  ;;  %v2217_v0 = vld [vmem:[%s6664_s1 + $0x190] sm:$0xff] }
 0x19f   : > { %1647 = vrot.lane.b32.xlu0 %v4789_v31, %s3687_s20  ;;  %2475 = vmatpush.msra.mxu3 %v2220_v1  ;;  %v767_v1 = vsel %vm726_vm0, %v4577_v56, %v4602_v16  ;;  %v1560_v5 = vmax.f32 %v4311_v6, %v1369_v46 }
 0x1a0   : > { %v1702_v40 = vpop.permute.xlu1 %1701  ;;  %v1294_v37 = vpop.permute.xlu2 %1293  ;;  %2510 = vmatpush.msrb.mxu0 %v2242_v42  ;;  %v4843_v29 = vadd.f32 %v939_v32, %v432_v50  ;;  %v2241_v32 = vld [vmem:[%s6664_s1 + $0x250] sm:$0xff]  ;;  %v2240_v42 = vld [vmem:[%s6664_s1 + $0x248] sm:$0xff]  ;;  %v957_v6 = vmul.f32 %v3918_v39, %v767_v1  ;;  %v2238_v1 = vld [vmem:[%s6664_s1 + $0x238] sm:$0xff] }
 0x1a1   : > { %v1794_v43 = vsel %vm1739_vm2, %v4677_v53, %v1702_v40  ;;  %v4826_v18 = vpop.permute.xlu0 %1295  ;;  %2476 = vmatpush.msra.mxu3 %v2219_v30  ;;  %v2218_v53 = vld [vmem:[%s6664_s1 + $0x198] sm:$0xff]  ;;  %v2362_v50 = vpop.f32.mrf.mxu0  ;;  %v2216_v30 = vld [vmem:[%s6664_s1 + $0x188] sm:$0xff] }
 0x1a2   : > { %v1985_v36 = vmax.f32 %v1559_v41, %v1794_v43  ;;  %6766 = vst [vmem:[#allocation38_spill] sm:$0xff] %v4843_v29  ;;  %2511 = vmatpush.msrb.mxu0 %v2241_v32  ;;  %v760_v32 = vsel %vm726_vm0, %v4670_v55, %v4711_v7 }
 0x1a3   : > { %2477 = vmatpush.msra.mxu3 %v2218_v53 }
 0x1a4   : > { %v2067_v34 = vadd.f32 %v4332_v13, %v1985_v36  ;;  %v450_v36 = vmul.f32 %v3916_v38, %v4229_v19  ;;  %2512 = vmatpush.msrb.mxu0 %v2240_v42  ;;  %v2262_v19 = vld [vmem:[%s6664_s1 + $0x2f8] sm:$0xff]  ;;  %v2261_v42 = vld [vmem:[%s6664_s1 + $0x2f0] sm:$0xff] }
 0x1a5   : > { %2478 = vmatpush.msra.mxu3 %v2217_v0  ;;  %2547 = vmatpush.msrb.mxu1 %v2262_v19 }
 0x1a6   : > { %1219 = vrot.lane.b32.xlu2 %v4834_v8, %s3686_s19  ;;  %1221 = vrot.lane.b32.xlu1 %v4789_v31, %s3686_s19  ;;  %v2147_v57 = vmax.f32 %v2067_v34, 0.0  ;;  %v4893_v0 = vadd.f32 %v957_v6, %v450_v36  ;;  %v2236_v6 = vld [vmem:[%s6664_s1 + $0x228] sm:$0xff] }
 0x1a7   : > { %1631 = vrot.lane.b32.xlu0 %v4843_v29, %s3687_s20  ;;  %v2403_v60 = vpop.f32.mrf.mxu1  ;;  %2479 = vmatpush.msra.mxu3 %v2216_v30  ;;  %v2237_v30 = vld [vmem:[%s6664_s1 + $0x230] sm:$0xff] }
 0x1a8   : > { %v4861_v41 = vadd.f32 %v2403_v60, %v2362_v50  ;;  %v4863_v54 = vpop.permute.xlu1 %1703  ;;  %v4865_v43 = vpop.permute.xlu2 %694  ;;  %2376 = vmatmul.f32.gmra.mxu0 %v2147_v57  ;;  %v2215_v57 = vld [vmem:[%s6664_s1 + $0x180] sm:$0xff]  ;;  %v1377_v60 = vsel %vm1313_vm1, %v1294_v37, %v4826_v18  ;;  %2548 = vmatpush.msrb.mxu1 %v2261_v42 }
 0x1a9   : > { %v1795_v34 = vsel %vm1739_vm2, %v1702_v40, %v4863_v54  ;;  %v4878_v53 = vpop.permute.xlu0 %1297  ;;  %v2239_v50 = vld [vmem:[%s6664_s1 + $0x240] sm:$0xff]  ;;  %2480 = vmatpush.msra.mxu3 %v2215_v57  ;;  %v949_v57 = vmul.f32 %v3918_v39, %v760_v32  ;;  %v6769_v32 = vld [vmem:[#allocation12_spill] sm:$0xff] }
 0x1aa   : > { %6767 = vst [vmem:[#allocation39_spill] sm:$0xff] %v4861_v41  ;;  %v1986_v46 = vmax.f32 %v1560_v5, %v1795_v34  ;;  %2513 = vmatpush.msrb.mxu0 %v2239_v50  ;;  %v2260_v34 = vld [vmem:[%s6664_s1 + $0x2e8] sm:$0xff]  ;;  %v1569_v50 = vmax.f32 %v4468_v14, %v1377_v60  ;;  %v4932_v41 = vld [vmem:[%s3757_s15 + $0x98] sm:$0xff]  ;;  %v766_v60 = vsel %vm726_vm0, %v6769_v32, %v4577_v56 }
 0x1ab   : > { %6768 = vst [vmem:[#allocation40_spill] sm:$0xff] %v4878_v53  ;;  %2549 = vmatpush.msrb.mxu1 %v2260_v34  ;;  %v1378_v56 = vsel %vm1313_vm1, %v4826_v18, %v4878_v53  ;;  %v2257_v18 = vld [vmem:[%s6664_s1 + $0x2d0] sm:$0xff] }
 0x1ac   : > { %v2068_v40 = vadd.f32 %v4332_v13, %v1986_v46  ;;  %2514 = vmatpush.msrb.mxu0 %v2238_v1  ;;  %v442_v46 = vmul.f32 %v3916_v38, %v4336_v27  ;;  %v2235_v1 = vld [vmem:[%s6664_s1 + $0x220] sm:$0xff]  ;;  %v1570_v59 = vmax.f32 %v4406_v51, %v1378_v56 }
 0x1ae   : > { %1645 = vrot.lane.b32.xlu2 %v4834_v8, %s3687_s20  ;;  %1205 = vrot.lane.b32.xlu1 %v4843_v29, %s3686_s19  ;;  %v2148_v5 = vmax.f32 %v2068_v40, 0.0  ;;  %v4940_v42 = vadd.f32 %v949_v57, %v442_v46 }
 0x1af   : > { %1241 = vrot.lane.b32.xlu0 %v4893_v0, %s3686_s19  ;;  %2515 = vmatpush.msrb.mxu0 %v2237_v30  ;;  %v2234_v30 = vld [vmem:[%s6664_s1 + $0x218] sm:$0xff]  ;;  %v2365_v34 = vpop.f32.mrf.mxu0 }
 0x1b0   : > { %v4912_v37 = vpop.permute.xlu1 %1161  ;;  %v1720_v36 = vpop.permute.xlu2 %1719  ;;  %2417 = vmatmul.f32.gmra.mxu1 %v2148_v5  ;;  %v2259_v5 = vld [vmem:[%s6664_s1 + $0x2e0] sm:$0xff]  ;;  %6770 = vst [vmem:[#allocation12_spill] sm:$0xff] %v4940_v42 }
 0x1b1   : > { %v1722_v19 = vpop.permute.xlu0 %1721  ;;  %2516 = vmatpush.msrb.mxu0 %v2236_v6  ;;  %2550 = vmatpush.msrb.mxu1 %v2259_v5  ;;  %v2258_v6 = vld [vmem:[%s6664_s1 + $0x2d8] sm:$0xff]  ;;  %v956_v5 = vmul.f32 %v3918_v39, %v766_v60  ;;  %v2232_v60 = vld [vmem:[%s6664_s1 + $0x208] sm:$0xff] }
 0x1b2   : > { %v1803_v40 = vsel %vm1739_vm2, %v1720_v36, %v1722_v19  ;;  %v6771_v36 = vld [vmem:[#allocation17_spill] sm:$0xff] }
 0x1b3   : > { %v1995_v27 = vmax.f32 %v1569_v50, %v1803_v40  ;;  %v1316_v29 = vsel %vm1313_vm1, %v6771_v36, %v4762_v33  ;;  %2517 = vmatpush.msrb.mxu0 %v2235_v1  ;;  %v2233_v50 = vld [vmem:[%s6664_s1 + $0x210] sm:$0xff]  ;;  %v3628_v40 = vld [vmem:[%s3757_s15 + $0x158] sm:$0xff]  ;;  %2551 = vmatpush.msrb.mxu1 %v2258_v6 }
 0x1b4   : > { %v449_v1 = vmul.f32 %v3628_v40, %v3916_v38 }
 0x1b5   : > { %v2077_v14 = vadd.f32 %v4332_v13, %v1995_v27  ;;  %2518 = vmatpush.msrb.mxu0 %v2234_v30  ;;  %v6772_v27 = vld [vmem:[#allocation6_spill] sm:$0xff]  ;;  %2552 = vmatpush.msrb.mxu1 %v2257_v18  ;;  %v6773_v18 = vld [vmem:[#allocation13_spill] sm:$0xff] }
 0x1b6   : > { %1629 = vrot.lane.b32.xlu2 %v4694_v44, %s3687_s20  ;;  %604 = vrot.lane.b32.xlu1 %v4932_v41, %s3685_s16  ;;  %v1501_v32 = vmax.f32 %v6772_v27, %v1316_v29  ;;  %v2256_v29 = vld [vmem:[%s6664_s1 + $0x2c8] sm:$0xff]  ;;  %v4988_v56 = vadd.f32 %v956_v5, %v449_v1  ;;  %v775_v40 = vsel %vm726_vm0, %v6773_v18, %v4752_v52  ;;  %v3629_v1 = vld [vmem:[%s3757_s15] sm:$0xff] }
 0x1b7   : > { %1225 = vrot.lane.b32.xlu0 %v4940_v42, %s3686_s19  ;;  %v2406_v46 = vpop.f32.mrf.mxu1  ;;  %v2157_v57 = vmax.f32 %v2077_v14, 0.0  ;;  %2519 = vmatpush.msrb.mxu0 %v2233_v50  ;;  %v2255_v50 = vld [vmem:[%s6664_s1 + $0x2c0] sm:$0xff]  ;;  %v3630_v5 = vld [vmem:[%s3757_s15 + $0x118] sm:$0xff]  ;;  %v2252_v18 = vld [vmem:[%s6664_s1 + $0x2a8] sm:$0xff] }
 0x1b8   : > { %v4968_v36 = vadd.f32 %v2406_v46, %v2365_v34  ;;  %v1586_v14 = vpop.permute.xlu1 %1585  ;;  %v4970_v30 = vpop.permute.xlu2 %696  ;;  %2553 = vmatpush.msrb.mxu1 %v2256_v29  ;;  %v441_v27 = vmul.f32 %v3630_v5, %v3916_v38 }
 0x1b9   : > { %v1742_v53 = vsel %vm1739_vm2, %v4256_v15, %v1586_v14  ;;  %2379 = vmatmul.f32.gmra.mxu0 %v2157_v57  ;;  %v4975_v7 = vpop.permute.xlu0 %1723  ;;  %v4986_v15 = vld [vmem:[%s3757_s15 + $0xe8] sm:$0xff]  ;;  %v2231_v57 = vld [vmem:[%s6664_s1 + $0x200] sm:$0xff] }
 0x1ba   : > { %v1804_v34 = vsel %vm1739_vm2, %v1722_v19, %v4975_v7  ;;  %v1927_v6 = vmax.f32 %v1501_v32, %v1742_v53  ;;  %2520 = vmatpush.msrb.mxu0 %v2232_v60  ;;  %v759_v53 = vsel %vm726_vm0, %v4588_v62, %v4670_v55  ;;  %2554 = vmatpush.msrb.mxu1 %v2255_v50 }
 0x1bb   : > { %v1996_v51 = vmax.f32 %v1570_v59, %v1804_v34  ;;  %v1317_v59 = vsel %vm1313_vm1, %v4762_v33, %v4912_v37  ;;  %v2254_v33 = vld [vmem:[%s6664_s1 + $0x2b8] sm:$0xff]  ;;  %v948_v32 = vmul.f32 %v3918_v39, %v759_v53  ;;  %v2253_v53 = vld [vmem:[%s6664_s1 + $0x2b0] sm:$0xff] }
 0x1bc   : > { %v2009_v46 = vadd.f32 %v4332_v13, %v1927_v6  ;;  %2521 = vmatpush.msrb.mxu0 %v2231_v57  ;;  %v1502_v60 = vmax.f32 %v4380_v3, %v1317_v59  ;;  %v3631_v6 = vld [vmem:[%s3757_s15 + $0x1a8] sm:$0xff]  ;;  %2555 = vmatpush.msrb.mxu1 %v2254_v33 }
 0x1bd   : > { %v2078_v19 = vadd.f32 %v4332_v13, %v1996_v51  ;;  %v459_v51 = vmul.f32 %v3631_v6, %v3916_v38  ;;  %v5031_v59 = vadd.f32 %v948_v32, %v441_v27  ;;  %v2250_v27 = vld [vmem:[%s6664_s1 + $0x298] sm:$0xff] }
 0x1be   : > { %879 = vrot.lane.b32.xlu2 %v3629_v1, %s3688_s22  ;;  %1239 = vrot.lane.b32.xlu1 %v4988_v56, %s3686_s19  ;;  %v2089_v62 = vmax.f32 %v2009_v46, 0.0  ;;  %v966_v46 = vmul.f32 %v3918_v39, %v775_v40 }
 0x1bf   : > { %624 = vrot.lane.b32.xlu0 %v4986_v15, %s3685_s16  ;;  %v2158_v55 = vmax.f32 %v2078_v19, 0.0  ;;  %2556 = vmatpush.msrb.mxu1 %v2253_v53  ;;  %v2248_v53 = vld [vmem:[%s6664_s1 + $0x288] sm:$0xff] }
 0x1c0   : > { %v1588_v29 = vpop.permute.xlu1 %1587  ;;  %v5020_v34 = vpop.permute.xlu2 %1179  ;;  %2440 = vmatmul.f32.vlgmr.msra.gmra.mxu2 %v2089_v62  ;;  %v5037_v40 = vadd.f32 %v966_v46, %v459_v51  ;;  %v2251_v62 = vld [vmem:[%s6664_s1 + $0x2a0] sm:$0xff]  ;;  %v2249_v51 = vld [vmem:[%s6664_s1 + $0x290] sm:$0xff] }
 0x1c1   : > { %v1743_v57 = vsel %vm1739_vm2, %v1586_v14, %v1588_v29  ;;  %2420 = vmatmul.f32.gmra.mxu1 %v2158_v55  ;;  %v5026_v19 = vpop.permute.xlu0 %1163  ;;  %v1325_v14 = vsel %vm1313_vm1, %v4365_v22, %v5020_v34  ;;  %v6774_v55 = vld [vmem:[#allocation8_spill] sm:$0xff]  ;;  %v5065_v46 = vld [vmem:[%s3757_s15 + $0xe0] sm:$0xff] }
 0x1c2   : > { %v1928_v3 = vmax.f32 %v1502_v60, %v1743_v57  ;;  %2557 = vmatpush.msrb.mxu1 %v2252_v18  ;;  %v1511_v33 = vmax.f32 %v6774_v55, %v1325_v14  ;;  %v2247_v18 = vld [vmem:[%s6664_s1 + $0x280] sm:$0xff] }
 0x1c4   : > { %v2010_v50 = vadd.f32 %v4332_v13, %v1928_v3  ;;  %2558 = vmatpush.msrb.mxu1 %v2251_v62  ;;  %v768_v3 = vsel %vm726_vm0, %v4602_v16, %v4713_v4 }
 0x1c5   : > { %v958_v62 = vmul.f32 %v3918_v39, %v768_v3 }
 0x1c6   : > { %1223 = vrot.lane.b32.xlu2 %v5031_v59, %s3686_s19  ;;  %1665 = vrot.lane.b32.xlu1 %v4988_v56, %s3687_s20  ;;  %v2090_v1 = vmax.f32 %v2010_v50, 0.0 }
 0x1c7   : > { %1259 = vrot.lane.b32.xlu0 %v5037_v40, %s3686_s19  ;;  %2559 = vmatpush.msrb.mxu1 %v2250_v27 }
 0x1c8   : > { %v5052_v5 = vpop.permute.xlu1 %678  ;;  %v1606_v22 = vpop.permute.xlu2 %1605  ;;  %2481 = vmatmul.f32.vlgmr.msra.gmra.mxu3 %v2090_v1  ;;  %v451_v1 = vmul.f32 %v3916_v38, %v4353_v21 }
 0x1c9   : > { %v1751_v32 = vsel %vm1739_vm2, %v4326_v24, %v1606_v22  ;;  %v5059_v60 = vpop.permute.xlu0 %714  ;;  %v1318_v24 = vsel %vm1313_vm1, %v4912_v37, %v5026_v19  ;;  %2560 = vmatpush.msrb.mxu1 %v2249_v51 }
 0x1ca   : > { %v1937_v6 = vmax.f32 %v1511_v33, %v1751_v32  ;;  %v1503_v37 = vmax.f32 %v4449_v26, %v1318_v24  ;;  %v3632_v26 = vld [vmem:[%s3757_s15 + $0x50] sm:$0xff] }
 0x1cb   : > { %2561 = vmatpush.msrb.mxu1 %v2248_v53 }
 0x1cc   : > { %v2019_v57 = vadd.f32 %v4332_v13, %v1937_v6  ;;  %v5096_v6 = vadd.f32 %v958_v62, %v451_v1  ;;  %v777_v62 = vsel %vm726_vm0, %v4715_v20, %v5052_v5 }
 0x1cd   : > { %2562 = vmatpush.msrb.mxu1 %v2247_v18  ;;  %v776_v18 = vsel %vm726_vm0, %v4752_v52, %v4715_v20  ;;  %v3634_v52 = vld [vmem:[%s3757_s15 + $0x1b0] sm:$0xff] }
 0x1ce   : > { %622 = vrot.lane.b32.xlu2 %v5065_v46, %s3685_s16  ;;  %1649 = vrot.lane.b32.xlu1 %v5031_v59, %s3687_s20  ;;  %v2099_v50 = vmax.f32 %v2019_v57, 0.0 }
 0x1cf   : > { %1685 = vrot.lane.b32.xlu0 %v5037_v40, %s3687_s20 }
 0x1d0   : > { %v5087_v14 = vpop.permute.xlu1 %680  ;;  %v1590_v16 = vpop.permute.xlu2 %1589  ;;  %2443 = vmatmul.f32.gmra.mxu2 %v2099_v50 }
 0x1d1   : > { %v1744_v55 = vsel %vm1739_vm2, %v1588_v29, %v1590_v16  ;;  %v5093_v33 = vpop.permute.xlu0 %1607 }
 0x1d2   : > { %v1929_v27 = vmax.f32 %v1503_v37, %v1744_v55  ;;  %v1752_v3 = vsel %vm1739_vm2, %v1606_v22, %v5093_v33  ;;  %v3633_v22 = vld [vmem:[%s3757_s15 + $0xa0] sm:$0xff]  ;;  %v460_v55 = vmul.f32 %v3634_v52, %v3916_v38 }
 0x1d4   : > { %v2011_v32 = vadd.f32 %v4332_v13, %v1929_v27  ;;  %v967_v27 = vmul.f32 %v3918_v39, %v776_v18 }
 0x1d5   : > { %v2368_v37 = vpop.f32.mrf.mxu0 }
 0x1d6   : > { %1667 = vrot.lane.b32.xlu2 %v4893_v0, %s3687_s20  ;;  %881 = vrot.lane.b32.xlu1 %v3632_v26, %s3688_s22  ;;  %v2091_v51 = vmax.f32 %v2011_v32, 0.0 }
 0x1d7   : > { %1669 = vrot.lane.b32.xlu0 %v5096_v6, %s3687_s20 }
 0x1d8   : > { %v1182_v21 = vpop.permute.xlu1 %1181  ;;  %v5104_v29 = vpop.permute.xlu2 %716  ;;  %2522 = vmatmul.f32.vlgmr.msrb.gmra.mxu0 %v2091_v51  ;;  %v3635_v51 = vld [vmem:[%s3757_s15 + $0x1b8] sm:$0xff] }
 0x1d9   : > { %v1326_v57 = vsel %vm1313_vm1, %v5020_v34, %v1182_v21  ;;  %v5108_v53 = vpop.permute.xlu0 %1591 }
 0x1da   : > { %v1512_v24 = vmax.f32 %v4557_v28, %v1326_v57  ;;  %v461_v57 = vmul.f32 %v3635_v51, %v3916_v38  ;;  %v1745_v18 = vsel %vm1739_vm2, %v1590_v16, %v5108_v53 }
 0x1dc   : > { %v1938_v50 = vmax.f32 %v1512_v24, %v1752_v3  ;;  %v968_v24 = vmul.f32 %v3918_v39, %v777_v62  ;;  %v769_v62 = vsel %vm726_vm0, %v4713_v4, %v4754_v61  ;;  %v452_v4 = vmul.f32 %v3916_v38, %v4429_v17 }
 0x1dd   : > { %v2409_v1 = vpop.f32.mrf.mxu1  ;;  %v959_v16 = vmul.f32 %v3918_v39, %v769_v62 }
 0x1de   : > { %v5119_v34 = vadd.f32 %v2409_v1, %v2368_v37  ;;  %1651 = vrot.lane.b32.xlu2 %v4940_v42, %s3687_s20  ;;  %1243 = vrot.lane.b32.xlu1 %v5096_v6, %s3686_s19  ;;  %v2020_v28 = vadd.f32 %v4332_v13, %v1938_v50  ;;  %v5147_v1 = vld [vmem:[%s3757_s15 + $0x130] sm:$0xff]  ;;  %v5154_v52 = vadd.f32 %v968_v24, %v461_v57 }
 0x1df   : > { %883 = vrot.lane.b32.xlu0 %v3633_v22, %s3688_s22 }
 0x1e0   : > { %v5131_v20 = vpop.permute.xlu1 %1165  ;;  %v5133_v32 = vpop.permute.xlu2 %1199  ;;  %v2100_v26 = vmax.f32 %v2020_v28, 0.0  ;;  %v5149_v28 = vadd.f32 %v967_v27, %v460_v55  ;;  %v6775_v55 = vld [vmem:[#allocation10_spill] sm:$0xff] }
 0x1e1   : > { %v1319_v3 = vsel %vm1313_vm1, %v5026_v19, %v5131_v20  ;;  %v5141_v50 = vpop.permute.xlu0 %1183  ;;  %v1334_v19 = vsel %vm1313_vm1, %v4418_v58, %v5133_v32 }
 0x1e2   : > { %v1504_v37 = vmax.f32 %v4489_v48, %v1319_v3  ;;  %2484 = vmatmul.f32.gmra.mxu3 %v2100_v26  ;;  %v1521_v27 = vmax.f32 %v6775_v55, %v1334_v19 }
 0x1e4   : > { %v1930_v22 = vmax.f32 %v1504_v37, %v1745_v18  ;;  %v5176_v37 = vadd.f32 %v959_v16, %v452_v4  ;;  %v5179_v18 = vld [vmem:[%s3757_s15 + $0x180] sm:$0xff] }
 0x1e6   : > { %642 = vrot.lane.b32.xlu1 %v5147_v1, %s3685_s16  ;;  %1261 = vrot.lane.b32.xlu2 %v5149_v28, %s3686_s19  ;;  %v2012_v48 = vadd.f32 %v4332_v13, %v1930_v22  ;;  %6776 = vst [vmem:[#allocation17_spill] sm:$0xff] %v5176_v37  ;;  %v1327_v22 = vsel %vm1313_vm1, %v1182_v21, %v5141_v50 }
 0x1e7   : > { %1263 = vrot.lane.b32.xlu0 %v5154_v52, %s3686_s19  ;;  %v2412_v62 = vpop.f32.mrf.mxu1  ;;  %v1513_v21 = vmax.f32 %v4534_v25, %v1327_v22  ;;  %v784_v22 = vsel %vm726_vm0, %v4104_v10, %v4865_v43 }
 0x1e8   : > { %v5170_v58 = vpop.permute.xlu1 %698  ;;  %v1626_v26 = vpop.permute.xlu2 %1625  ;;  %v2092_v51 = vmax.f32 %v2012_v48, 0.0  ;;  %v976_v10 = vmul.f32 %v3918_v39, %v784_v22 }
 0x1e9   : > { %v1760_v57 = vsel %vm1739_vm2, %v4400_v11, %v1626_v26  ;;  %v5174_v24 = vpop.permute.xlu0 %582  ;;  %v785_v11 = vsel %vm726_vm0, %v4865_v43, %v4970_v30 }
 0x1ea   : > { %2563 = vmatmul.f32.vlgmr.msrb.gmra.mxu1 %v2092_v51  ;;  %v1947_v3 = vmax.f32 %v1521_v27, %v1760_v57  ;;  %v470_v27 = vmul.f32 %v3916_v38, %v4486_v12  ;;  %v977_v51 = vmul.f32 %v3918_v39, %v785_v11  ;;  %v778_v12 = vsel %vm726_vm0, %v5052_v5, %v5087_v14  ;;  %v3636_v11 = vld [vmem:[%s3757_s15 + $0x1f8] sm:$0xff]  ;;  %v6779_v5 = vld [vmem:[#allocation27_spill] sm:$0xff] }
 0x1ec   : > { %v2029_v17 = vadd.f32 %v4332_v13, %v1947_v3 }
 0x1ed   : > { %v2371_v19 = vpop.f32.mrf.mxu0 }
 0x1ee   : > { %v5187_v48 = vadd.f32 %v2412_v62, %v2371_v19  ;;  %1687 = vrot.lane.b32.xlu1 %v5149_v28, %s3687_s20  ;;  %1245 = vrot.lane.b32.xlu2 %v5176_v37, %s3686_s19  ;;  %v2109_v4 = vmax.f32 %v2029_v17, 0.0  ;;  %v5206_v62 = vld [vmem:[%s3757_s15 + $0x138] sm:$0xff]  ;;  %v5212_v19 = vadd.f32 %v977_v51, %v470_v27  ;;  %v462_v27 = vmul.f32 %v3916_v38, %v6779_v5 }
 0x1ef   : > { %662 = vrot.lane.b32.xlu0 %v5179_v18, %s3685_s16  ;;  %v969_v51 = vmul.f32 %v3918_v39, %v778_v12  ;;  %v794_v12 = vsel %vm726_vm0, %v5059_v60, %v5104_v29 }
 0x1f0   : > { %6777 = vst [vmem:[#allocation6_spill] sm:$0xff] %v5187_v48  ;;  %v5196_v16 = vpop.permute.xlu1 %700  ;;  %v1610_v55 = vpop.permute.xlu2 %1609  ;;  %2446 = vmatmul.f32.gmra.mxu2 %v2109_v4  ;;  %v469_v4 = vmul.f32 %v3636_v11, %v3916_v38 }
 0x1f1   : > { %6778 = vst [vmem:[#allocation13_spill] sm:$0xff] %v5196_v16  ;;  %v1753_v57 = vsel %vm1739_vm2, %v5093_v33, %v1610_v55  ;;  %v5203_v3 = vpop.permute.xlu0 %1627 }
 0x1f2   : > { %v1939_v17 = vmax.f32 %v1513_v21, %v1753_v57  ;;  %v1761_v22 = vsel %vm1739_vm2, %v1626_v26, %v5203_v3  ;;  %v5238_v11 = vadd.f32 %v976_v10, %v469_v4  ;;  %v3637_v10 = vld [vmem:[%s3757_s15 + $0x250] sm:$0xff] }
 0x1f3   : > { %v480_v5 = vmul.f32 %v3637_v10, %v3916_v38 }
 0x1f4   : > { %v2021_v25 = vadd.f32 %v4332_v13, %v1939_v17 }
 0x1f6   : > { %1671 = vrot.lane.b32.xlu1 %v5176_v37, %s3687_s20  ;;  %644 = vrot.lane.b32.xlu2 %v5206_v62, %s3685_s16  ;;  %v2101_v33 = vmax.f32 %v2021_v25, 0.0 }
 0x1f7   : > { %1707 = vrot.lane.b32.xlu0 %v5212_v19, %s3687_s20 }
 0x1f8   : > { %v5226_v43 = vpop.permute.xlu2 %718  ;;  %v1202_v21 = vpop.permute.xlu1 %1201  ;;  %2525 = vmatmul.f32.gmra.mxu0 %v2101_v33  ;;  %v5240_v33 = vadd.f32 %v969_v51, %v462_v27  ;;  %v987_v27 = vmul.f32 %v3918_v39, %v794_v12  ;;  %v787_v12 = vsel %vm726_vm0, %v5170_v58, %v5196_v16 }
 0x1f9   : > { %v1335_v57 = vsel %vm1313_vm1, %v5133_v32, %v1202_v21  ;;  %v5233_v17 = vpop.permute.xlu0 %1611 }
 0x1fa   : > { %6780 = vst [vmem:[#allocation8_spill] sm:$0xff] %v5233_v17  ;;  %v1522_v25 = vmax.f32 %v4650_v47, %v1335_v57  ;;  %v5267_v42 = vadd.f32 %v987_v27, %v480_v5 }
 0x1fb   : > { %6781 = vst [vmem:[#allocation10_spill] sm:$0xff] %v5240_v33 }
 0x1fc   : > { %v1948_v37 = vmax.f32 %v1522_v25, %v1761_v22  ;;  %v1754_v25 = vsel %vm1739_vm2, %v1610_v55, %v5233_v17  ;;  %6782 = vst [vmem:[#allocation27_spill] sm:$0xff] %v5267_v42  ;;  %v6795_v17 = vld [vmem:[#allocation28_spill] sm:$0xff] }
 0x1fe   : > { %1281 = vrot.lane.b32.xlu1 %v5212_v19, %s3686_s19  ;;  %1279 = vrot.lane.b32.xlu2 %v5238_v11, %s3686_s19  ;;  %v2030_v47 = vadd.f32 %v4332_v13, %v1948_v37 }
 0x1ff   : > { %1691 = vrot.lane.b32.xlu0 %v5240_v33, %s3687_s20 }
 0x200   : > { %v5252_v32 = vpop.permute.xlu2 %1219  ;;  %v5254_v26 = vpop.permute.xlu1 %1185  ;;  %v2110_v4 = vmax.f32 %v2030_v47, 0.0  ;;  %v6783_v47 = vld [vmem:[#allocation24_spill] sm:$0xff] }
 0x201   : > { %v1328_v51 = vsel %vm1313_vm1, %v5141_v50, %v5254_v26  ;;  %v5262_v57 = vpop.permute.xlu0 %1203  ;;  %v1343_v10 = vsel %vm1313_vm1, %v6783_v47, %v5252_v32  ;;  %v2374_v50 = vpop.f32.mrf.mxu0  ;;  %v472_v47 = vmul.f32 %v3916_v38, %v4591_v23 }
 0x202   : > { %v1514_v37 = vmax.f32 %v4580_v63, %v1328_v51  ;;  %2487 = vmatmul.f32.gmra.mxu3 %v2110_v4  ;;  %v6784_v4 = vld [vmem:[#allocation16_spill] sm:$0xff]  ;;  %v1336_v23 = vsel %vm1313_vm1, %v1202_v21, %v5262_v57 }
 0x203   : > { %v1531_v5 = vmax.f32 %v6784_v4, %v1343_v10  ;;  %v5295_v10 = vld [vmem:[%s3757_s15 + $0x188] sm:$0xff] }
 0x204   : > { %v1940_v22 = vmax.f32 %v1514_v37, %v1754_v25 }
 0x206   : > { %1265 = vrot.lane.b32.xlu1 %v5240_v33, %s3686_s19  ;;  %1705 = vrot.lane.b32.xlu2 %v5238_v11, %s3687_s20  ;;  %v2022_v63 = vadd.f32 %v4332_v13, %v1940_v22  ;;  %v979_v33 = vmul.f32 %v3918_v39, %v787_v12  ;;  %v1523_v12 = vmax.f32 %v4617_v9, %v1336_v23  ;;  %v3639_v23 = vld [vmem:[%s3757_s15 + $0xf0] sm:$0xff] }
 0x207   : > { %1301 = vrot.lane.b32.xlu0 %v5267_v42, %s3686_s19  ;;  %v2415_v55 = vpop.f32.mrf.mxu1  ;;  %v786_v9 = vsel %vm726_vm0, %v4970_v30, %v5170_v58  ;;  %v3641_v58 = vld [vmem:[%s3757_s15 + $0x38] sm:$0xff] }
 0x208   : > { %v5283_v27 = vadd.f32 %v2415_v55, %v2374_v50  ;;  %v1646_v51 = vpop.permute.xlu2 %1645  ;;  %v5285_v37 = vpop.permute.xlu1 %584  ;;  %v2102_v25 = vmax.f32 %v2022_v63, 0.0  ;;  %v6786_v55 = vld [vmem:[#allocation18_spill] sm:$0xff]  ;;  %v5301_v4 = vadd.f32 %v979_v33, %v472_v47 }
 0x209   : > { %v1769_v22 = vsel %vm1739_vm2, %v4519_v35, %v1646_v51  ;;  %v5292_v48 = vpop.permute.xlu0 %602  ;;  %v793_v63 = vsel %vm726_vm0, %v6786_v55, %v5059_v60  ;;  %v384_v55 = vld [vmem:[%s3757_s15 + $0x1d8] sm:$0xff] }
 0x20a   : > { %6785 = vst [vmem:[#allocation24_spill] sm:$0xff] %v5283_v27  ;;  %2566 = vmatmul.f32.gmra.mxu1 %v2102_v25  ;;  %v1957_v16 = vmax.f32 %v1531_v5, %v1769_v22  ;;  %v986_v33 = vmul.f32 %v3918_v39, %v793_v63  ;;  %v734_v63 = vsel %vm726_vm0, %v4462_v45, %v5174_v24 }
 0x20b   : > { %6787 = vst [vmem:[#allocation16_spill] sm:$0xff] %v5301_v4  ;;  %v413_v45 = vmul.f32 %v3641_v58, %v3916_v38 }
 0x20c   : > { %v2039_v50 = vadd.f32 %v4332_v13, %v1957_v16  ;;  %v3638_v16 = vld [vmem:[%s3757_s15 + $0x248] sm:$0xff] }
 0x20d   : > { %v479_v60 = vmul.f32 %v3638_v16, %v3916_v38 }
 0x20e   : > { %664 = vrot.lane.b32.xlu1 %v5295_v10, %s3685_s16  ;;  %1689 = vrot.lane.b32.xlu2 %v5154_v52, %s3687_s20  ;;  %v2119_v35 = vmax.f32 %v2039_v50, 0.0 }
 0x20f   : > { %1285 = vrot.lane.b32.xlu0 %v5301_v4, %s3686_s19  ;;  %v5321_v50 = vadd.f32 %v986_v33, %v479_v60  ;;  %v978_v33 = vmul.f32 %v3918_v39, %v786_v9 }
 0x210   : > { %v5315_v21 = vpop.permute.xlu1 %720  ;;  %v1630_v5 = vpop.permute.xlu2 %1629  ;;  %2449 = vmatmul.f32.gmra.mxu2 %v2119_v35  ;;  %v3640_v35 = vld [vmem:[%s3757_s15 + $0x208] sm:$0xff] }
 0x211   : > { %v1762_v25 = vsel %vm1739_vm2, %v5203_v3, %v1630_v5  ;;  %v5319_v47 = vpop.permute.xlu0 %1647  ;;  %v471_v60 = vmul.f32 %v3640_v35, %v3916_v38 }
 0x212   : > { %v1949_v22 = vmax.f32 %v1523_v12, %v1762_v25  ;;  %v920_v25 = vmul.f32 %v3918_v39, %v734_v63  ;;  %v1770_v9 = vsel %vm1739_vm2, %v1646_v51, %v5319_v47 }
 0x214   : > { %v2031_v16 = vadd.f32 %v4332_v13, %v1949_v22  ;;  %v5354_v35 = vadd.f32 %v920_v25, %v413_v45  ;;  %v5376_v25 = vld [vmem:[%s3757_s15 + $0x1d0] sm:$0xff] }
 0x216   : > { %885 = vrot.lane.b32.xlu2 %v3639_v23, %s3688_s22  ;;  %1299 = vrot.lane.b32.xlu1 %v5321_v50, %s3686_s19  ;;  %v2111_v3 = vmax.f32 %v2031_v16, 0.0  ;;  %v5352_v23 = vadd.f32 %v978_v33, %v471_v60 }
 0x217   : > { %684 = vrot.lane.b32.xlu0 %v384_v55, %s3685_s16 }
 0x218   : > { %v5339_v12 = vpop.permute.xlu1 %1221  ;;  %v880_v30 = vpop.permute.xlu2 %879  ;;  %2528 = vmatmul.f32.gmra.mxu0 %v2111_v3 }
 0x219   : > { %v1344_v22 = vsel %vm1313_vm1, %v5252_v32, %v5339_v12  ;;  %v5347_v16 = vpop.permute.xlu0 %1631 }
 0x21a   : > { %6788 = vst [vmem:[#allocation18_spill] sm:$0xff] %v5347_v16  ;;  %v1532_v55 = vmax.f32 %v4834_v8, %v1344_v22  ;;  %v1763_v45 = vsel %vm1739_vm2, %v1630_v5, %v5347_v16  ;;  %v6793_v16 = vld [vmem:[#allocation15_spill] sm:$0xff] }
 0x21c   : > { %v1958_v3 = vmax.f32 %v1532_v55, %v1770_v9  ;;  %v735_v55 = vsel %vm726_vm0, %v5174_v24, %v5285_v37 }
 0x21e   : > { %1283 = vrot.lane.b32.xlu2 %v5352_v23, %s3686_s19  ;;  %1725 = vrot.lane.b32.xlu1 %v5321_v50, %s3687_s20  ;;  %v2040_v32 = vadd.f32 %v4332_v13, %v1958_v3  ;;  %v3642_v3 = vld [vmem:[%s3757_s15 + $0x40] sm:$0xff] }
 0x21f   : > { %1167 = vrot.lane.b32.xlu0 %v5354_v35, %s3686_s19  ;;  %v414_v24 = vmul.f32 %v3642_v3, %v3916_v38 }
 0x220   : > { %v5363_v8 = vpop.permute.xlu2 %1223  ;;  %v5365_v51 = vpop.permute.xlu1 %1205  ;;  %v2120_v63 = vmax.f32 %v2040_v32, 0.0  ;;  %v921_v32 = vmul.f32 %v3918_v39, %v735_v55 }
 0x221   : > { %6789 = vst [vmem:[#allocation41_spill] sm:$0xff] %v5365_v51  ;;  %v1337_v60 = vsel %vm1313_vm1, %v5262_v57, %v5365_v51  ;;  %v5370_v33 = vpop.permute.xlu0 %1241 }
 0x222   : > { %v1524_v58 = vmax.f32 %v4694_v44, %v1337_v60  ;;  %2490 = vmatmul.f32.gmra.mxu3 %v2120_v63  ;;  %v5397_v60 = vadd.f32 %v921_v32, %v414_v24  ;;  %v795_v24 = vsel %vm726_vm0, %v5104_v29, %v5226_v43  ;;  %v3645_v29 = vld [vmem:[%s3757_s15 + $0x258] sm:$0xff] }
 0x224   : > { %v1950_v22 = vmax.f32 %v1524_v58, %v1763_v45  ;;  %6791 = vst [vmem:[#allocation43_spill] sm:$0xff] %v5397_v60 }
 0x225   : > { %v2377_v58 = vpop.f32.mrf.mxu0 }
 0x226   : > { %682 = vrot.lane.b32.xlu2 %v5376_v25, %s3685_s16  ;;  %1709 = vrot.lane.b32.xlu1 %v5352_v23, %s3687_s20  ;;  %v2032_v44 = vadd.f32 %v4332_v13, %v1950_v22 }
 0x227   : > { %1593 = vrot.lane.b32.xlu0 %v5354_v35, %s3687_s20 }
 0x228   : > { %v5388_v57 = vpop.permute.xlu2 %622  ;;  %v5390_v5 = vpop.permute.xlu1 %604  ;;  %v2112_v9 = vmax.f32 %v2032_v44, 0.0  ;;  %v3643_v44 = vld [vmem:[%s3757_s15 + $0x140] sm:$0xff] }
 0x229   : > { %v5395_v63 = vpop.permute.xlu0 %1225 }
 0x22a   : > { %6790 = vst [vmem:[#allocation42_spill] sm:$0xff] %v5395_v63  ;;  %2569 = vmatmul.f32.gmra.mxu1 %v2112_v9 }
 0x22d   : > { %v2418_v45 = vpop.f32.mrf.mxu1 }
 0x22e   : > { %v5399_v22 = vadd.f32 %v2418_v45, %v2377_v58  ;;  %1727 = vrot.lane.b32.xlu2 %v5267_v42, %s3687_s20  ;;  %887 = vrot.lane.b32.xlu1 %v3643_v44, %s3688_s22  ;;  %v904_v45 = vsel %vm903_vm3, %v5285_v37, %v880_v30  ;;  %v3644_v44 = vld [vmem:[%s3757_s15 + $0x190] sm:$0xff] }
 0x22f   : > { %1595 = vrot.lane.b32.xlu0 %v5397_v60, %s3687_s20 }
 0x230   : > { %6792 = vst [vmem:[#allocation44_spill] sm:$0xff] %v5399_v22  ;;  %v5407_v55 = vpop.permute.xlu2 %1667  ;;  %v1240_v9 = vpop.permute.xlu1 %1239  ;;  %v481_v22 = vmul.f32 %v3645_v29, %v3916_v38 }
 0x231   : > { %v5409_v3 = vpop.permute.xlu0 %624  ;;  %v1352_v32 = vsel %vm1313_vm1, %v4501_v49, %v1240_v9  ;;  %v1353_v58 = vsel %vm1313_vm1, %v1240_v9, %v5370_v33  ;;  %v988_v49 = vmul.f32 %v3918_v39, %v795_v24 }
 0x232   : > { %v1541_v9 = vmax.f32 %v6793_v16, %v1352_v32  ;;  %v1542_v51 = vmax.f32 %v4988_v56, %v1353_v58  ;;  %v5443_v32 = vld [vmem:[%s3757_s15 + $0x220] sm:$0xff] }
 0x233   : > { %v5445_v56 = vadd.f32 %v988_v49, %v481_v22  ;;  %v6796_v49 = vld [vmem:[#allocation32_spill] sm:$0xff] }
 0x236   : > { %1711 = vrot.lane.b32.xlu2 %v5301_v4, %s3687_s20  ;;  %1169 = vrot.lane.b32.xlu1 %v5397_v60, %s3686_s19  ;;  %v6794_v4 = vld [vmem:[#allocation35_spill] sm:$0xff]  ;;  %v922_v60 = vmul.f32 %v3918_v39, %v904_v45  ;;  %v796_v45 = vsel %vm726_vm0, %v5226_v43, %v5315_v21  ;;  %v2380_v22 = vpop.f32.mrf.mxu0 }
 0x237   : > { %889 = vrot.lane.b32.xlu0 %v3644_v44, %s3688_s22  ;;  %v415_v27 = vmul.f32 %v3916_v38, %v6794_v4 }
 0x238   : > { %v5431_v37 = vpop.permute.xlu2 %1651  ;;  %v1666_v30 = vpop.permute.xlu1 %1665 }
 0x239   : > { %v1778_v44 = vsel %vm1739_vm2, %v6795_v17, %v1666_v30  ;;  %v1779_v29 = vsel %vm1739_vm2, %v1666_v30, %v5407_v55  ;;  %v5440_v42 = vpop.permute.xlu0 %1259  ;;  %v5452_v17 = vadd.f32 %v922_v60, %v415_v27  ;;  %v1345_v30 = vsel %vm1313_vm1, %v5339_v12, %v5363_v8  ;;  %v6797_v60 = vld [vmem:[#allocation37_spill] sm:$0xff] }
 0x23a   : > { %v1967_v24 = vmax.f32 %v1541_v9, %v1778_v44  ;;  %v1968_v16 = vmax.f32 %v1542_v51, %v1779_v29  ;;  %v1346_v51 = vsel %vm1313_vm1, %v5363_v8, %v5395_v63  ;;  %v1361_v9 = vsel %vm1313_vm1, %v6796_v49, %v5440_v42 }
 0x23b   : > { %v482_v12 = vmul.f32 %v3916_v38, %v6797_v60  ;;  %v989_v8 = vmul.f32 %v3918_v39, %v796_v45 }
 0x23c   : > { %v2049_v58 = vadd.f32 %v4332_v13, %v1967_v24  ;;  %v2050_v4 = vadd.f32 %v4332_v13, %v1968_v16  ;;  %v1533_v24 = vmax.f32 %v4789_v31, %v1345_v30  ;;  %v1534_v16 = vmax.f32 %v5031_v59, %v1346_v51  ;;  %v6800_v31 = vld [vmem:[#allocation31_spill] sm:$0xff] }
 0x23d   : > { %v5488_v51 = vadd.f32 %v989_v8, %v482_v12 }
 0x23e   : > { %v2421_v44 = vpop.f32.mrf.mxu1  ;;  %1303 = vrot.lane.b32.xlu2 %v5445_v56, %s3686_s19  ;;  %702 = vrot.lane.b32.xlu1 %v5443_v32, %s3685_s16  ;;  %v2129_v43 = vmax.f32 %v2049_v58, 0.0  ;;  %v2130_v27 = vmax.f32 %v2050_v4, 0.0  ;;  %v6799_v58 = vld [vmem:[#allocation20_spill] sm:$0xff] }
 0x23f   : > { %v5469_v29 = vadd.f32 %v2421_v44, %v2380_v22  ;;  %1171 = vrot.lane.b32.xlu0 %v5452_v17, %s3686_s19  ;;  %v1551_v4 = vmax.f32 %v6799_v58, %v1361_v9  ;;  %6801 = vst [vmem:[#allocation35_spill] sm:$0xff] %v5488_v51  ;;  %v3646_v58 = vld [vmem:[%s3757_s15 + $0x90] sm:$0xff] }
 0x240   : > { %v1650_v49 = vpop.permute.xlu1 %1649  ;;  %v5476_v63 = vpop.permute.xlu2 %1261  ;;  %2452 = vmatmul.f32.gmra.mxu2 %v2129_v43  ;;  %2493 = vmatmul.f32.gmra.mxu3 %v2130_v27  ;;  %v5491_v43 = vld [vmem:[%s3757_s15 + $0x270] sm:$0xff] }
 0x241   : > { %6798 = vst [vmem:[#allocation15_spill] sm:$0xff] %v5469_v29  ;;  %v1771_v22 = vsel %vm1739_vm2, %v5319_v47, %v1650_v49  ;;  %v1772_v44 = vsel %vm1739_vm2, %v1650_v49, %v5431_v37  ;;  %v5483_v60 = vpop.permute.xlu0 %1685 }
 0x242   : > { %v1959_v45 = vmax.f32 %v1533_v24, %v1771_v22  ;;  %v1960_v29 = vmax.f32 %v1534_v16, %v1772_v44  ;;  %v1787_v59 = vsel %vm1739_vm2, %v6800_v31, %v5483_v60  ;;  %v744_v24 = vsel %vm726_vm0, %v5292_v48, %v5390_v5  ;;  %v6802_v31 = vld [vmem:[#allocation26_spill] sm:$0xff] }
 0x243   : > { %v1977_v30 = vmax.f32 %v1551_v4, %v1787_v59  ;;  %v424_v4 = vmul.f32 %v3646_v58, %v3916_v38  ;;  %v931_v22 = vmul.f32 %v3918_v39, %v744_v24  ;;  %v743_v59 = vsel %vm726_vm0, %v6802_v31, %v5292_v48 }
 0x244   : > { %v2041_v9 = vadd.f32 %v4332_v13, %v1959_v45  ;;  %v2042_v47 = vadd.f32 %v4332_v13, %v1960_v29  ;;  %v5513_v45 = vld [vmem:[%s3757_s15 + $0x228] sm:$0xff]  ;;  %v435_v48 = vmul.f32 %v3916_v38, %v4986_v15  ;;  %v753_v15 = vsel %vm726_vm0, %v5388_v57, %v5409_v3 }
 0x245   : > { %v2059_v27 = vadd.f32 %v4332_v13, %v1977_v30  ;;  %v5518_v30 = vadd.f32 %v931_v22, %v424_v4 }
 0x246   : > { %1305 = vrot.lane.b32.xlu2 %v5488_v51, %s3686_s19  ;;  %1729 = vrot.lane.b32.xlu1 %v5445_v56, %s3687_s20  ;;  %v2121_v12 = vmax.f32 %v2041_v9, 0.0  ;;  %v2122_v8 = vmax.f32 %v2042_v47, 0.0  ;;  %v3647_v9 = vld [vmem:[%s3757_s15 + $0x88] sm:$0xff] }
 0x247   : > { %722 = vrot.lane.b32.xlu0 %v5491_v43, %s3685_s16  ;;  %v2139_v16 = vmax.f32 %v2059_v27, 0.0  ;;  %v423_v47 = vmul.f32 %v3647_v9, %v3916_v38  ;;  %v930_v27 = vmul.f32 %v3918_v39, %v743_v59 }
 0x248   : > { %v882_v29 = vpop.permute.xlu1 %881  ;;  %v5505_v49 = vpop.permute.xlu2 %1245  ;;  %2531 = vmatmul.f32.gmra.mxu0 %v2121_v12  ;;  %2572 = vmatmul.f32.gmra.mxu1 %v2122_v8 }
 0x249   : > { %2455 = vmatmul.f32.gmra.mxu2 %v2139_v16  ;;  %v5510_v44 = vpop.permute.xlu0 %1669  ;;  %v5542_v59 = vadd.f32 %v930_v27, %v423_v47 }
 0x24a   : > { %v1780_v22 = vsel %vm1739_vm2, %v5407_v55, %v5510_v44 }
 0x24e   : > { %704 = vrot.lane.b32.xlu2 %v5513_v45, %s3685_s16  ;;  %1731 = vrot.lane.b32.xlu1 %v5488_v51, %s3687_s20 }
 0x24f   : > { %1615 = vrot.lane.b32.xlu0 %v5518_v30, %s3687_s20 }
 0x250   : > { %v1244_v24 = vpop.permute.xlu1 %1243  ;;  %v5529_v12 = vpop.permute.xlu2 %644 }
 0x251   : > { %v1354_v8 = vsel %vm1313_vm1, %v5370_v33, %v1244_v24  ;;  %v884_v16 = vpop.permute.xlu0 %883  ;;  %v6803_v33 = vld [vmem:[#allocation5_spill] sm:$0xff] }
 0x252   : > { %v1543_v58 = vmax.f32 %v4893_v0, %v1354_v8  ;;  %v906_v4 = vsel %vm903_vm3, %v5409_v3, %v884_v16  ;;  %v434_v3 = vmul.f32 %v3916_v38, %v5065_v46  ;;  %v6804_v46 = vld [vmem:[#allocation22_spill] sm:$0xff] }
 0x253   : > { %v942_v31 = vmul.f32 %v3918_v39, %v906_v4 }
 0x254   : > { %v1969_v9 = vmax.f32 %v1543_v58, %v1780_v22  ;;  %v1362_v58 = vsel %vm1313_vm1, %v5440_v42, %v5476_v63  ;;  %v905_v22 = vsel %vm903_vm3, %v5390_v5, %v882_v29  ;;  %v425_v5 = vmul.f32 %v3916_v38, %v4932_v41  ;;  %v5598_v41 = vpop.f32.mrf.mxu2 }
 0x255   : > { %v5544_v51 = vadd.f32 %v942_v31, %v435_v48  ;;  %v941_v48 = vmul.f32 %v3918_v39, %v753_v15  ;;  %v1552_v42 = vmax.f32 %v5037_v40, %v1362_v58  ;;  %v932_v29 = vmul.f32 %v3918_v39, %v905_v22  ;;  %v2278_v40 = vld [vmem:[%s6664_s1 + $0x378] sm:$0xff] }
 0x256   : > { %1189 = vrot.lane.b32.xlu1 %v5518_v30, %s3686_s19  ;;  %1187 = vrot.lane.b32.xlu2 %v5542_v59, %s3686_s19  ;;  %v2051_v0 = vadd.f32 %v4332_v13, %v1969_v9 }
 0x257   : > { %1892 = vrot.lane.b32.xlu0 %v6803_v33, %s3689_s24  ;;  %v5565_v16 = vadd.f32 %v941_v48, %v434_v3  ;;  %2588 = vmatpush.msrb.mxu2 %v2278_v40  ;;  %v5601_v48 = vld [vmem:[%s3757_s15 + $0x278] sm:$0xff] }
 0x258   : > { %v5556_v55 = vpop.permute.xlu1 %642  ;;  %v5558_v47 = vpop.permute.xlu2 %1279  ;;  %v2131_v27 = vmax.f32 %v2051_v0, 0.0 }
 0x259   : > { %v5563_v8 = vpop.permute.xlu0 %1263  ;;  %v1370_v4 = vsel %vm1313_vm1, %v4672_v2, %v5558_v47 }
 0x25a   : > { %2534 = vmatmul.f32.gmra.mxu0 %v2131_v27  ;;  %v1561_v31 = vmax.f32 %v6804_v46, %v1370_v4  ;;  %v6805_v4 = vld [vmem:[#allocation29_spill] sm:$0xff]  ;;  %v1355_v46 = vsel %vm1313_vm1, %v1244_v24, %v5505_v49 }
 0x25b   : > { %v752_v22 = vsel %vm726_vm0, %v6805_v4, %v5388_v57  ;;  %v1544_v40 = vmax.f32 %v5096_v6, %v1355_v46  ;;  %v2274_v6 = vld [vmem:[%s6664_s1 + $0x358] sm:$0xff] }
 0x25c   : > { %v940_v24 = vmul.f32 %v3918_v39, %v752_v22  ;;  %v5649_v46 = vpop.f32.mrf.mxu2 }
 0x25d   : > { %6806 = vst [vmem:[#allocation28_spill] sm:$0xff] %v5649_v46  ;;  %v2280_v46 = vld [vmem:[%s6664_s1 + $0x388] sm:$0xff] }
 0x25e   : > { %1466 = vrot.lane.b32.xlu1 %v6803_v33, %s3690_s25  ;;  %1613 = vrot.lane.b32.xlu2 %v5542_v59, %s3687_s20 }
 0x25f   : > { %1209 = vrot.lane.b32.xlu0 %v5565_v16, %s3686_s19 }
 0x260   : > { %v1688_v9 = vpop.permute.xlu1 %1687  ;;  %v5583_v2 = vpop.permute.xlu2 %1705 }
 0x261   : > { %v1788_v15 = vsel %vm1739_vm2, %v5483_v60, %v1688_v9  ;;  %v1796_v0 = vsel %vm1739_vm2, %v4863_v54, %v5583_v2  ;;  %v5593_v33 = vpop.permute.xlu0 %662  ;;  %v2277_v60 = vld [vmem:[%s6664_s1 + $0x370] sm:$0xff] }
 0x262   : > { %v1978_v27 = vmax.f32 %v1552_v42, %v1788_v15  ;;  %v1987_v3 = vmax.f32 %v1561_v31, %v1796_v0  ;;  %2589 = vmatpush.msrb.mxu2 %v2277_v60  ;;  %v5611_v42 = vadd.f32 %v932_v29, %v425_v5  ;;  %v1363_v31 = vsel %vm1313_vm1, %v5476_v63, %v5563_v8  ;;  %v2276_v15 = vld [vmem:[%s6664_s1 + $0x368] sm:$0xff]  ;;  %v3648_v29 = vld [vmem:[%s3757_s15 + $0xd8] sm:$0xff]  ;;  %v2275_v63 = vld [vmem:[%s6664_s1 + $0x360] sm:$0xff] }
 0x263   : > { %v433_v0 = vmul.f32 %v3648_v29, %v3916_v38  ;;  %v3649_v29 = vld [vmem:[%s3757_s15 + $0x1e0] sm:$0xff] }
 0x264   : > { %v2069_v54 = vadd.f32 %v4332_v13, %v1987_v3  ;;  %v2060_v58 = vadd.f32 %v4332_v13, %v1978_v27  ;;  %2590 = vmatpush.msrb.mxu2 %v2276_v15  ;;  %v1553_v27 = vmax.f32 %v5149_v28, %v1363_v31 }
 0x265   : > { %v5654_v31 = vadd.f32 %v940_v24, %v433_v0  ;;  %v6807_v24 = vld [vmem:[#allocation7_spill] sm:$0xff] }
 0x266   : > { %724 = vrot.lane.b32.xlu1 %v5601_v48, %s3685_s16  ;;  %1597 = vrot.lane.b32.xlu2 %v5452_v17, %s3687_s20  ;;  %v2149_v57 = vmax.f32 %v2069_v54, 0.0  ;;  %v2140_v5 = vmax.f32 %v2060_v58, 0.0 }
 0x267   : > { %1617 = vrot.lane.b32.xlu0 %v5611_v42, %s3687_s20  ;;  %2591 = vmatpush.msrb.mxu2 %v2275_v63 }
 0x268   : > { %v5635_v3 = vpop.permute.xlu1 %1671  ;;  %v5637_v60 = vpop.permute.xlu2 %1689  ;;  %2458 = vmatmul.f32.gmra.mxu2 %v2149_v57  ;;  %2496 = vmatmul.f32.gmra.mxu3 %v2140_v5  ;;  %v2272_v57 = vld [vmem:[%s6664_s1 + $0x348] sm:$0xff]  ;;  %v762_v5 = vsel %vm726_vm0, %v5556_v55, %v5529_v12 }
 0x269   : > { %v1781_v54 = vsel %vm1739_vm2, %v5510_v44, %v5635_v3  ;;  %v1789_v58 = vsel %vm1739_vm2, %v1688_v9, %v5637_v60  ;;  %v5644_v4 = vpop.permute.xlu0 %1707  ;;  %2592 = vmatpush.msrb.mxu2 %v2274_v6  ;;  %v2273_v44 = vld [vmem:[%s6664_s1 + $0x350] sm:$0xff]  ;;  %v444_v6 = vmul.f32 %v3916_v38, %v5147_v1 }
 0x26a   : > { %v1970_v28 = vmax.f32 %v1544_v40, %v1781_v54  ;;  %v1979_v22 = vmax.f32 %v1553_v27, %v1789_v58  ;;  %v2271_v40 = vld [vmem:[%s6664_s1 + $0x340] sm:$0xff]  ;;  %v445_v27 = vmul.f32 %v3916_v38, %v5206_v62  ;;  %v2270_v62 = vld [vmem:[%s6664_s1 + $0x338] sm:$0xff] }
 0x26b   : > { %2593 = vmatpush.msrb.mxu2 %v2273_v44 }
 0x26c   : > { %v2061_v9 = vadd.f32 %v4332_v13, %v1979_v22  ;;  %v2052_v15 = vadd.f32 %v4332_v13, %v1970_v28  ;;  %v951_v28 = vmul.f32 %v3918_v39, %v762_v5 }
 0x26d   : > { %2594 = vmatpush.msrb.mxu2 %v2272_v57  ;;  %v1797_v57 = vsel %vm1739_vm2, %v5583_v2, %v5644_v4 }
 0x26e   : > { %1207 = vrot.lane.b32.xlu1 %v5654_v31, %s3686_s19  ;;  %891 = vrot.lane.b32.xlu2 %v3649_v29, %s3688_s22  ;;  %v2141_v0 = vmax.f32 %v2061_v9, 0.0  ;;  %v2132_v63 = vmax.f32 %v2052_v15, 0.0  ;;  %v5708_v2 = vadd.f32 %v951_v28, %v444_v6 }
 0x26f   : > { %1894 = vrot.lane.b32.xlu0 %v6807_v24, %s3689_s24  ;;  %2595 = vmatpush.msrb.mxu2 %v2271_v40  ;;  %v2268_v40 = vld [vmem:[%s6664_s1 + $0x328] sm:$0xff] }
 0x270   : > { %v5675_v54 = vpop.permute.xlu1 %1281  ;;  %v886_v58 = vpop.permute.xlu2 %885  ;;  %2537 = vmatmul.f32.gmra.mxu0 %v2141_v0  ;;  %2575 = vmatmul.f32.gmra.mxu1 %v2132_v63 }
 0x271   : > { %v1371_v22 = vsel %vm1313_vm1, %v5558_v47, %v5675_v54  ;;  %v907_v44 = vsel %vm903_vm3, %v5529_v12, %v886_v58  ;;  %v5685_v9 = vpop.permute.xlu0 %1691  ;;  %2596 = vmatpush.msrb.mxu2 %v2270_v62  ;;  %v2269_v12 = vld [vmem:[%s6664_s1 + $0x330] sm:$0xff]  ;;  %v2294_v47 = vld [vmem:[%s6664_s1 + $0x3f8] sm:$0xff]  ;;  %v5706_v63 = vpop.f32.mrf.mxu3 }
 0x272   : > { %v1562_v15 = vmax.f32 %v5238_v11, %v1371_v22  ;;  %v952_v1 = vmul.f32 %v3918_v39, %v907_v44  ;;  %2629 = vmatpush.msrb.mxu3 %v2294_v47  ;;  %6808 = vst [vmem:[#allocation32_spill] sm:$0xff] %v5706_v63  ;;  %v2293_v58 = vld [vmem:[%s6664_s1 + $0x3f0] sm:$0xff]  ;;  %v2292_v44 = vld [vmem:[%s6664_s1 + $0x3e8] sm:$0xff] }
 0x273   : > { %v2447_v5 = vpop.f32.mrf.mxu2  ;;  %2597 = vmatpush.msrb.mxu2 %v2269_v12  ;;  %v1790_v12 = vsel %vm1739_vm2, %v5637_v60, %v5685_v9  ;;  %v2264_v60 = vld [vmem:[%s6664_s1 + $0x308] sm:$0xff] }
 0x274   : > { %v5701_v29 = vadd.f32 %v952_v1, %v445_v27  ;;  %v5704_v11 = vadd.f32 %v2447_v5, %v4968_v36  ;;  %v1988_v0 = vmax.f32 %v1562_v15, %v1797_v57  ;;  %v2267_v27 = vld [vmem:[%s6664_s1 + $0x320] sm:$0xff]  ;;  %2630 = vmatpush.msrb.mxu3 %v2293_v58  ;;  %v2266_v1 = vld [vmem:[%s6664_s1 + $0x318] sm:$0xff] }
 0x275   : > { %2598 = vmatpush.msrb.mxu2 %v2268_v40  ;;  %v2291_v5 = vld [vmem:[%s6664_s1 + $0x3e0] sm:$0xff] }
 0x276   : > { %1633 = vrot.lane.b32.xlu1 %v5654_v31, %s3687_s20  ;;  %1191 = vrot.lane.b32.xlu2 %v5611_v42, %s3686_s19  ;;  %v2070_v36 = vadd.f32 %v4332_v13, %v1988_v0  ;;  %v6809_v0 = vld [vmem:[#allocation34_spill] sm:$0xff] }
 0x277   : > { %1229 = vrot.lane.b32.xlu0 %v5708_v2, %s3686_s19  ;;  %2599 = vmatpush.msrb.mxu2 %v2267_v27  ;;  %v761_v40 = vsel %vm726_vm0, %v6809_v0, %v5556_v55  ;;  %v2289_v27 = vld [vmem:[%s6664_s1 + $0x3d0] sm:$0xff]  ;;  %v2287_v0 = vld [vmem:[%s6664_s1 + $0x3c0] sm:$0xff] }
 0x278   : > { %v5726_v6 = vpop.permute.xlu1 %1265  ;;  %v5728_v28 = vpop.permute.xlu2 %1283  ;;  %v2150_v22 = vmax.f32 %v2070_v36, 0.0  ;;  %2631 = vmatpush.msrb.mxu3 %v2292_v44  ;;  %v770_v36 = vsel %vm726_vm0, %v4754_v61, %v5593_v33  ;;  %v2263_v61 = vld [vmem:[%s6664_s1 + $0x300] sm:$0xff]  ;;  %v950_v44 = vmul.f32 %v3918_v39, %v761_v40 }
 0x279   : > { %v1364_v62 = vsel %vm1313_vm1, %v5563_v8, %v5726_v6  ;;  %v5736_v15 = vpop.permute.xlu0 %1301  ;;  %2600 = vmatpush.msrb.mxu2 %v2266_v1  ;;  %v2265_v8 = vld [vmem:[%s6664_s1 + $0x310] sm:$0xff]  ;;  %v5757_v58 = vpop.f32.mrf.mxu3 }
 0x27a   : > { %v1554_v57 = vmax.f32 %v5154_v52, %v1364_v62  ;;  %2499 = vmatmul.f32.gmra.mxu3 %v2150_v22  ;;  %v2290_v52 = vld [vmem:[%s6664_s1 + $0x3d8] sm:$0xff]  ;;  %6810 = vst [vmem:[#allocation37_spill] sm:$0xff] %v5757_v58  ;;  %v3650_v22 = vld [vmem:[%s3757_s15 + $0x128] sm:$0xff] }
 0x27b   : > { %2632 = vmatpush.msrb.mxu3 %v2291_v5  ;;  %2601 = vmatpush.msrb.mxu2 %v2265_v8  ;;  %v2288_v5 = vld [vmem:[%s6664_s1 + $0x3c8] sm:$0xff] }
 0x27c   : > { %v1980_v47 = vmax.f32 %v1554_v57, %v1790_v12  ;;  %v3651_v12 = vld [vmem:[%s3757_s15 + $0x178] sm:$0xff] }
 0x27d   : > { %2633 = vmatpush.msrb.mxu3 %v2290_v52  ;;  %2602 = vmatpush.msrb.mxu2 %v2264_v60  ;;  %v453_v8 = vmul.f32 %v3651_v12, %v3916_v38  ;;  %v2286_v60 = vld [vmem:[%s6664_s1 + $0x3b8] sm:$0xff] }
 0x27e   : > { %1468 = vrot.lane.b32.xlu2 %v6807_v24, %s3690_s25  ;;  %1635 = vrot.lane.b32.xlu1 %v5565_v16, %s3687_s20  ;;  %v2062_v55 = vadd.f32 %v4332_v13, %v1980_v47  ;;  %v443_v24 = vmul.f32 %v3650_v22, %v3916_v38  ;;  %v960_v47 = vmul.f32 %v3918_v39, %v770_v36  ;;  %v2310_v12 = vld [vmem:[%s6664_s1 + $0x478] sm:$0xff] }
 0x27f   : > { %1637 = vrot.lane.b32.xlu0 %v5544_v51, %s3687_s20  ;;  %2634 = vmatpush.msrb.mxu3 %v2289_v27 }
 0x280   : > { %v5781_v62 = vpop.permute.xlu1 %664  ;;  %v5783_v1 = vpop.permute.xlu2 %682  ;;  %v2142_v57 = vmax.f32 %v2062_v55, 0.0  ;;  %2603 = vmatpush.msrb.mxu2 %v2263_v61  ;;  %v5796_v40 = vadd.f32 %v950_v44, %v443_v24  ;;  %v5803_v22 = vadd.f32 %v960_v47, %v453_v8  ;;  %v3652_v61 = vld [vmem:[%s3757_s15 + $0x230] sm:$0xff]  ;;  %v2283_v8 = vld [vmem:[%s6664_s1 + $0x3a0] sm:$0xff]  ;;  %2670 = vmatpush.msra.mxu0 %v2310_v12 }
 0x281   : > { %v5791_v52 = vpop.permute.xlu0 %1285  ;;  %2635 = vmatpush.msrb.mxu3 %v2288_v5  ;;  %v5801_v55 = vpop.f32.mrf.mxu0  ;;  %v2285_v24 = vld [vmem:[%s6664_s1 + $0x3b0] sm:$0xff]  ;;  %v771_v12 = vsel %vm726_vm0, %v5593_v33, %v5781_v62 }
 0x282   : > { %2578 = vmatmul.f32.gmra.mxu1 %v2142_v57  ;;  %6811 = vst [vmem:[#allocation20_spill] sm:$0xff] %v5801_v55  ;;  %v2309_v47 = vld [vmem:[%s6664_s1 + $0x470] sm:$0xff]  ;;  %v454_v55 = vmul.f32 %v3916_v38, %v5179_v18  ;;  %v2279_v18 = vld [vmem:[%s6664_s1 + $0x380] sm:$0xff] }
 0x283   : > { %2636 = vmatpush.msrb.mxu3 %v2287_v0  ;;  %v2282_v0 = vld [vmem:[%s6664_s1 + $0x398] sm:$0xff]  ;;  %2671 = vmatpush.msra.mxu0 %v2309_v47  ;;  %v2281_v47 = vld [vmem:[%s6664_s1 + $0x390] sm:$0xff] }
 0x285   : > { %v2488_v36 = vpop.f32.mrf.mxu3  ;;  %2637 = vmatpush.msrb.mxu3 %v2286_v60 }
 0x286   : > { %v2489_v27 = vadd.f32 %v2488_v36, %v5704_v11  ;;  %893 = vrot.lane.b32.xlu2 %v3652_v61, %s3688_s22  ;;  %1227 = vrot.lane.b32.xlu1 %v5796_v40, %s3686_s19  ;;  %v2284_v11 = vld [vmem:[%s6664_s1 + $0x3a8] sm:$0xff]  ;;  %v6813_v36 = vld [vmem:[#allocation40_spill] sm:$0xff] }
 0x287   : > { %1247 = vrot.lane.b32.xlu0 %v5803_v22, %s3686_s19  ;;  %2638 = vmatpush.msrb.mxu3 %v2285_v24 }
 0x288   : > { %v5815_v44 = vpop.permute.xlu2 %1727  ;;  %v1300_v57 = vpop.permute.xlu1 %1299 }
 0x289   : > { %v5820_v5 = vpop.permute.xlu0 %684  ;;  %2639 = vmatpush.msrb.mxu3 %v2284_v11  ;;  %v5834_v60 = vpop.f32.mrf.mxu0  ;;  %v1379_v61 = vsel %vm1313_vm1, %v6813_v36, %v1300_v57  ;;  %v1380_v24 = vsel %vm1313_vm1, %v1300_v57, %v5736_v15  ;;  %v2308_v11 = vld [vmem:[%s6664_s1 + $0x468] sm:$0xff]  ;;  %v2307_v57 = vld [vmem:[%s6664_s1 + $0x460] sm:$0xff] }
 0x28a   : > { %6812 = vst [vmem:[#allocation31_spill] sm:$0xff] %v5834_v60  ;;  %v1572_v36 = vmax.f32 %v5321_v50, %v1380_v24  ;;  %2672 = vmatpush.msra.mxu0 %v2308_v11  ;;  %v2306_v24 = vld [vmem:[%s6664_s1 + $0x458] sm:$0xff] }
 0x28b   : > { %2640 = vmatpush.msrb.mxu3 %v2283_v8  ;;  %v6814_v8 = vld [vmem:[#allocation23_spill] sm:$0xff] }
 0x28c   : > { %v1571_v33 = vmax.f32 %v6814_v8, %v1379_v61  ;;  %2673 = vmatpush.msra.mxu0 %v2307_v57  ;;  %v1372_v57 = vsel %vm1313_vm1, %v5675_v54, %v5728_v28 }
 0x28d   : > { %2641 = vmatpush.msrb.mxu3 %v2282_v0  ;;  %v961_v0 = vmul.f32 %v3918_v39, %v771_v12 }
 0x28e   : > { %1653 = vrot.lane.b32.xlu1 %v5796_v40, %s3687_s20  ;;  %1211 = vrot.lane.b32.xlu2 %v5544_v51, %s3686_s19 }
 0x28f   : > { %1673 = vrot.lane.b32.xlu0 %v5803_v22, %s3687_s20  ;;  %2642 = vmatpush.msrb.mxu3 %v2281_v47 }
 0x290   : > { %v5860_v60 = vpop.permute.xlu2 %1711  ;;  %v1726_v58 = vpop.permute.xlu1 %1725  ;;  %2674 = vmatpush.msra.mxu0 %v2306_v24  ;;  %v6815_v24 = vld [vmem:[#allocation9_spill] sm:$0xff] }
 0x291   : > { %v1805_v63 = vsel %vm1739_vm2, %v4975_v7, %v1726_v58  ;;  %v1806_v61 = vsel %vm1739_vm2, %v1726_v58, %v5815_v44  ;;  %v5872_v50 = vpop.permute.xlu0 %1167  ;;  %2643 = vmatpush.msrb.mxu3 %v2280_v46 }
 0x292   : > { %v1997_v11 = vmax.f32 %v1571_v33, %v1805_v63  ;;  %v1998_v8 = vmax.f32 %v1572_v36, %v1806_v61  ;;  %v2305_v63 = vld [vmem:[%s6664_s1 + $0x450] sm:$0xff]  ;;  %v5891_v33 = vadd.f32 %v961_v0, %v454_v55  ;;  %v1320_v36 = vsel %vm1313_vm1, %v5131_v20, %v5872_v50  ;;  %v5908_v0 = vpop.f32.mrf.mxu1 }
 0x293   : > { %v2450_v12 = vpop.f32.mrf.mxu2  ;;  %2644 = vmatpush.msrb.mxu3 %v2279_v18  ;;  %2675 = vmatpush.msra.mxu0 %v2305_v63  ;;  %v1563_v20 = vmax.f32 %v5212_v19, %v1372_v57  ;;  %v2303_v18 = vld [vmem:[%s6664_s1 + $0x440] sm:$0xff] }
 0x294   : > { %v5881_v7 = vadd.f32 %v2450_v12, %v5119_v34  ;;  %v2079_v58 = vadd.f32 %v4332_v13, %v1997_v11  ;;  %v2080_v47 = vadd.f32 %v4332_v13, %v1998_v8  ;;  %v1373_v34 = vsel %vm1313_vm1, %v5728_v28, %v5791_v52  ;;  %v2304_v28 = vld [vmem:[%s6664_s1 + $0x448] sm:$0xff] }
 0x295   : > { %v2529_v46 = vpop.f32.mrf.mxu0  ;;  %v6816_v12 = vld [vmem:[#allocation30_spill] sm:$0xff]  ;;  %2676 = vmatpush.msra.mxu0 %v2304_v28 }
 0x296   : > { %v5899_v61 = vadd.f32 %v2529_v46, %v2489_v27  ;;  %1655 = vrot.lane.b32.xlu1 %v5708_v2, %s3687_s20  ;;  %1470 = vrot.lane.b32.xlu2 %v6815_v24, %s3690_s25  ;;  %v2159_v54 = vmax.f32 %v2079_v58, 0.0  ;;  %v2160_v55 = vmax.f32 %v2080_v47, 0.0  ;;  %v1564_v27 = vmax.f32 %v5352_v23, %v1373_v34  ;;  %v2302_v46 = vld [vmem:[%s6664_s1 + $0x438] sm:$0xff] }
 0x297   : > { %1675 = vrot.lane.b32.xlu0 %v5891_v33, %s3687_s20  ;;  %v1505_v58 = vmax.f32 %v6816_v12, %v1320_v36  ;;  %2677 = vmatpush.msra.mxu0 %v2303_v18  ;;  %v455_v12 = vmul.f32 %v3916_v38, %v5295_v10  ;;  %v2298_v10 = vld [vmem:[%s6664_s1 + $0x418] sm:$0xff] }
 0x298   : > { %v5914_v11 = vpop.permute.xlu2 %1303  ;;  %v1710_v8 = vpop.permute.xlu1 %1709  ;;  %2461 = vmatmul.f32.gmra.mxu2 %v2159_v54  ;;  %2502 = vmatmul.f32.gmra.mxu3 %v2160_v55  ;;  %v2301_v55 = vld [vmem:[%s6664_s1 + $0x430] sm:$0xff] }
 0x299   : > { %v1798_v47 = vsel %vm1739_vm2, %v5644_v4, %v1710_v8  ;;  %v1799_v63 = vsel %vm1739_vm2, %v1710_v8, %v5860_v60  ;;  %v1594_v19 = vpop.permute.xlu0 %1593  ;;  %2678 = vmatpush.msra.mxu0 %v2302_v46  ;;  %v2297_v46 = vld [vmem:[%s6664_s1 + $0x410] sm:$0xff] }
 0x29a   : > { %v1989_v23 = vmax.f32 %v1563_v20, %v1798_v47  ;;  %v1990_v57 = vmax.f32 %v1564_v27, %v1799_v63  ;;  %v1746_v34 = vsel %vm1739_vm2, %v5108_v53, %v1594_v19  ;;  %v2300_v27 = vld [vmem:[%s6664_s1 + $0x428] sm:$0xff]  ;;  %v5942_v8 = vpop.f32.mrf.mxu1 }
 0x29b   : > { %v1931_v54 = vmax.f32 %v1505_v58, %v1746_v34  ;;  %2679 = vmatpush.msra.mxu0 %v2301_v55 }
 0x29c   : > { %v2071_v36 = vadd.f32 %v4332_v13, %v1989_v23  ;;  %v2072_v4 = vadd.f32 %v4332_v13, %v1990_v57 }
 0x29d   : > { %v2013_v28 = vadd.f32 %v4332_v13, %v1931_v54  ;;  %2680 = vmatpush.msra.mxu0 %v2300_v27 }
 0x29e   : > { %1231 = vrot.lane.b32.xlu1 %v5701_v29, %s3686_s19  ;;  %1896 = vrot.lane.b32.xlu2 %v6815_v24, %s3689_s24  ;;  %v2151_v53 = vmax.f32 %v2071_v36, 0.0  ;;  %v2152_v20 = vmax.f32 %v2072_v4, 0.0  ;;  %v2299_v24 = vld [vmem:[%s6664_s1 + $0x420] sm:$0xff]  ;;  %v6817_v36 = vld [vmem:[#allocation11_spill] sm:$0xff]  ;;  %v2296_v4 = vld [vmem:[%s6664_s1 + $0x408] sm:$0xff] }
 0x29f   : > { %v2093_v18 = vmax.f32 %v2013_v28, 0.0  ;;  %2681 = vmatpush.msra.mxu0 %v2299_v24  ;;  %v779_v24 = vsel %vm726_vm0, %v5087_v14, %v5783_v1  ;;  %v2316_v14 = vld [vmem:[%s6664_s1 + $0x4a8] sm:$0xff] }
 0x2a0   : > { %v5946_v58 = vpop.permute.xlu2 %1305  ;;  %v888_v47 = vpop.permute.xlu1 %887  ;;  %2540 = vmatmul.f32.gmra.mxu0 %v2151_v53  ;;  %2581 = vmatmul.f32.gmra.mxu1 %v2152_v20  ;;  %v2295_v20 = vld [vmem:[%s6664_s1 + $0x400] sm:$0xff] }
 0x2a1   : > { %v908_v63 = vsel %vm903_vm3, %v5781_v62, %v888_v47  ;;  %2604 = vmatmul.f32.vlgmr.msrb.gmra.mxu2 %v2093_v18  ;;  %v5953_v23 = vpop.permute.xlu0 %1595  ;;  %2682 = vmatpush.msra.mxu0 %v2298_v10  ;;  %v970_v10 = vmul.f32 %v3918_v39, %v779_v24  ;;  %v2313_v24 = vld [vmem:[%s6664_s1 + $0x490] sm:$0xff] }
 0x2a2   : > { %v962_v57 = vmul.f32 %v3918_v39, %v908_v63  ;;  %v1747_v47 = vsel %vm1739_vm2, %v1594_v19, %v5953_v23  ;;  %v780_v63 = vsel %vm726_vm0, %v5783_v1, %v5820_v5  ;;  %v464_v1 = vmul.f32 %v3916_v38, %v5376_v25  ;;  %2721 = vmatpush.msra.mxu1 %v2316_v14  ;;  %v2314_v25 = vld [vmem:[%s6664_s1 + $0x498] sm:$0xff] }
 0x2a3   : > { %2683 = vmatpush.msra.mxu0 %v2297_v46  ;;  %v971_v46 = vmul.f32 %v3918_v39, %v780_v63 }
 0x2a4   : > { %v5959_v34 = vadd.f32 %v962_v57, %v455_v12  ;;  %v6818_v57 = vld [vmem:[#allocation14_spill] sm:$0xff] }
 0x2a5   : > { %v2491_v54 = vpop.f32.mrf.mxu3  ;;  %2684 = vmatpush.msra.mxu0 %v2296_v4 }
 0x2a6   : > { %v5965_v62 = vadd.f32 %v2491_v54, %v5881_v7  ;;  %1472 = vrot.lane.b32.xlu1 %v6817_v36, %s3690_s25  ;;  %1249 = vrot.lane.b32.xlu2 %v5891_v33, %s3686_s19 }
 0x2a7   : > { %1251 = vrot.lane.b32.xlu0 %v5959_v34, %s3686_s19  ;;  %v2570_v55 = vpop.f32.mrf.mxu1  ;;  %2685 = vmatpush.msra.mxu0 %v2295_v20  ;;  %v2315_v20 = vld [vmem:[%s6664_s1 + $0x4a0] sm:$0xff] }
 0x2a8   : > { %v5977_v28 = vadd.f32 %v2570_v55, %v5899_v61  ;;  %v5979_v7 = vpop.permute.xlu2 %704  ;;  %v1170_v53 = vpop.permute.xlu1 %1169  ;;  %2722 = vmatpush.msra.mxu1 %v2315_v20 }
 0x2a9   : > { %v1321_v27 = vsel %vm1313_vm1, %v5872_v50, %v1170_v53  ;;  %v890_v18 = vpop.permute.xlu0 %889  ;;  %v3653_v50 = vld [vmem:[%s3757_s15 + $0x1c8] sm:$0xff] }
 0x2aa   : > { %v1506_v12 = vmax.f32 %v5354_v35, %v1321_v27  ;;  %v463_v19 = vmul.f32 %v3653_v50, %v3916_v38  ;;  %2723 = vmatpush.msra.mxu1 %v2314_v25  ;;  %v6820_v50 = vld [vmem:[#allocation33_spill] sm:$0xff] }
 0x2ac   : > { %v1932_v61 = vmax.f32 %v1506_v12, %v1747_v47  ;;  %v6021_v27 = vadd.f32 %v970_v10, %v463_v19  ;;  %v6023_v12 = vadd.f32 %v971_v46, %v464_v1  ;;  %v1381_v47 = vsel %vm1313_vm1, %v5736_v15, %v5914_v11  ;;  %2724 = vmatpush.msra.mxu1 %v2313_v24  ;;  %v6819_v15 = vld [vmem:[#allocation27_spill] sm:$0xff] }
 0x2ad   : > { %v474_v10 = vmul.f32 %v3916_v38, %v5443_v32 }
 0x2ae   : > { %1898 = vrot.lane.b32.xlu1 %v6817_v36, %s3689_s24  ;;  %1657 = vrot.lane.b32.xlu2 %v5701_v29, %s3687_s20  ;;  %v2014_v35 = vadd.f32 %v4332_v13, %v1932_v61 }
 0x2af   : > { %1474 = vrot.lane.b32.xlu0 %v6818_v57, %s3690_s25 }
 0x2b0   : > { %v703_v54 = vpop.permute.xlu1 %702  ;;  %v6011_v36 = vpop.permute.xlu2 %1187  ;;  %v2094_v4 = vmax.f32 %v2014_v35, 0.0  ;;  %v1573_v35 = vmax.f32 %v6819_v15, %v1381_v47  ;;  %v2311_v47 = vld [vmem:[%s6664_s1 + $0x480] sm:$0xff] }
 0x2b1   : > { %v6013_v55 = vpop.permute.xlu0 %1171  ;;  %v1329_v61 = vsel %vm1313_vm1, %v5254_v26, %v6011_v36  ;;  %v789_v63 = vsel %vm726_vm0, %v703_v54, %v5979_v7  ;;  %v2312_v26 = vld [vmem:[%s6664_s1 + $0x488] sm:$0xff]  ;;  %v6822_v15 = vld [vmem:[#allocation13_spill] sm:$0xff] }
 0x2b2   : > { %2645 = vmatmul.f32.vlgmr.msrb.gmra.mxu3 %v2094_v4  ;;  %v1515_v19 = vmax.f32 %v6820_v50, %v1329_v61  ;;  %v981_v46 = vmul.f32 %v3918_v39, %v789_v63  ;;  %v6821_v4 = vld [vmem:[#allocation8_spill] sm:$0xff]  ;;  %2725 = vmatpush.msra.mxu1 %v2312_v26  ;;  %v788_v50 = vsel %vm726_vm0, %v6822_v15, %v703_v54 }
 0x2b4   : > { %2726 = vmatpush.msra.mxu1 %v2311_v47  ;;  %v6069_v26 = vadd.f32 %v981_v46, %v474_v10  ;;  %v980_v10 = vmul.f32 %v3918_v39, %v788_v50  ;;  %v6823_v46 = vld [vmem:[#allocation43_spill] sm:$0xff]  ;;  %v3655_v47 = vld [vmem:[%s3757_s15 + $0x1d8] sm:$0xff] }
 0x2b6   : > { %1267 = vrot.lane.b32.xlu2 %v6021_v27, %s3686_s19  ;;  %1269 = vrot.lane.b32.xlu1 %v6023_v12, %s3686_s19 }
 0x2b7   : > { %1900 = vrot.lane.b32.xlu0 %v6818_v57, %s3689_s24 }
 0x2b8   : > { %v1730_v14 = vpop.permute.xlu1 %1729  ;;  %v6047_v1 = vpop.permute.xlu2 %1613 }
 0x2b9   : > { %v1807_v57 = vsel %vm1739_vm2, %v5815_v44, %v1730_v14  ;;  %v1755_v20 = vsel %vm1739_vm2, %v6821_v4, %v6047_v1  ;;  %v6057_v25 = vpop.permute.xlu0 %722  ;;  %v1382_v44 = vsel %vm1313_vm1, %v5914_v11, %v5946_v58  ;;  %v1322_v4 = vsel %vm1313_vm1, %v1170_v53, %v6013_v55 }
 0x2ba   : > { %v1999_v61 = vmax.f32 %v1573_v35, %v1807_v57  ;;  %v1941_v24 = vmax.f32 %v1515_v19, %v1755_v20  ;;  %v909_v35 = vsel %vm903_vm3, %v5820_v5, %v890_v18  ;;  %v3654_v57 = vld [vmem:[%s3757_s15 + $0x218] sm:$0xff]  ;;  %v1574_v53 = vmax.f32 %v5445_v56, %v1382_v44 }
 0x2bb   : > { %v473_v54 = vmul.f32 %v3654_v57, %v3916_v38  ;;  %v1507_v5 = vmax.f32 %v6823_v46, %v1322_v4 }
 0x2bc   : > { %v2081_v32 = vadd.f32 %v4332_v13, %v1999_v61  ;;  %v2023_v63 = vadd.f32 %v4332_v13, %v1941_v24  ;;  %v465_v61 = vmul.f32 %v3655_v47, %v3916_v38  ;;  %v972_v24 = vmul.f32 %v3918_v39, %v909_v35 }
 0x2bd   : > { %v6097_v4 = vadd.f32 %v980_v10, %v473_v54 }
 0x2be   : > { %1693 = vrot.lane.b32.xlu2 %v6021_v27, %s3687_s20  ;;  %1677 = vrot.lane.b32.xlu1 %v5959_v34, %s3687_s20  ;;  %v2161_v19 = vmax.f32 %v2081_v32, 0.0  ;;  %v2103_v11 = vmax.f32 %v2023_v63, 0.0  ;;  %v6102_v35 = vadd.f32 %v972_v24, %v465_v61 }
 0x2bf   : > { %1289 = vrot.lane.b32.xlu0 %v6069_v26, %s3686_s19 }
 0x2c0   : > { %v6086_v18 = vpop.permute.xlu1 %1731  ;;  %v1598_v20 = vpop.permute.xlu2 %1597  ;;  %2543 = vmatmul.f32.gmra.mxu0 %v2161_v19  ;;  %2607 = vmatmul.f32.gmra.mxu2 %v2103_v11  ;;  %v6824_v11 = vld [vmem:[#allocation6_spill] sm:$0xff] }
 0x2c1   : > { %v1808_v32 = vsel %vm1739_vm2, %v1730_v14, %v6086_v18  ;;  %v1748_v56 = vsel %vm1739_vm2, %v5953_v23, %v1598_v20  ;;  %v6095_v63 = vpop.permute.xlu0 %1615  ;;  %v797_v14 = vsel %vm726_vm0, %v5315_v21, %v6057_v25 }
 0x2c2   : > { %v2000_v44 = vmax.f32 %v1574_v53, %v1808_v32  ;;  %v1933_v15 = vmax.f32 %v1507_v5, %v1748_v56  ;;  %v3656_v56 = vld [vmem:[%s3757_s15 + $0x268] sm:$0xff]  ;;  %s3691_s15 = smov 78  }
 0x2c3   : > { %v2453_v50 = vpop.f32.mrf.mxu2  ;;  %v2494_v23 = vpop.f32.mrf.mxu3 }
 0x2c4   : > { %v2015_v19 = vadd.f32 %v4332_v13, %v1933_v15  ;;  %v2454_v57 = vadd.f32 %v2453_v50, %v6824_v11  ;;  %v2082_v46 = vadd.f32 %v4332_v13, %v2000_v44  ;;  %v990_v44 = vmul.f32 %v3918_v39, %v797_v14 }
 0x2c5   : > { %v2532_v47 = vpop.f32.mrf.mxu0  ;;  %v2573_v61 = vpop.f32.mrf.mxu1  ;;  %v1756_v11 = vsel %vm1739_vm2, %v6047_v1, %v6095_v63 }
 0x2c6   : > { %v2095_v53 = vmax.f32 %v2015_v19, 0.0  ;;  %v2495_v5 = vadd.f32 %v2494_v23, %v2454_v57  ;;  %v2533_v54 = vadd.f32 %v2532_v47, %v5965_v62  ;;  %1695 = vrot.lane.b32.xlu2 %v6023_v12, %s3687_s20  ;;  %1287 = vrot.lane.b32.xlu1 %v6097_v4, %s3686_s19  ;;  %v2162_v10 = vmax.f32 %v2082_v46, 0.0  ;;  %v6825_v47 = vld [vmem:[#allocation24_spill] sm:$0xff] }
 0x2c7   : > { %1697 = vrot.lane.b32.xlu0 %v6102_v35, %s3687_s20  ;;  %v483_v62 = vmul.f32 %v3656_v56, %v3916_v38 }
 0x2c8   : > { %v6114_v24 = vadd.f32 %v2573_v61, %v2533_v54  ;;  %v1190_v21 = vpop.permute.xlu1 %1189  ;;  %v892_v32 = vpop.permute.xlu2 %891  ;;  %2584 = vmatmul.f32.gmra.mxu1 %v2162_v10  ;;  %2686 = vmatmul.f32.vlgmr.msra.gmra.mxu0 %v2095_v53 }
 0x2c9   : > { %v1330_v15 = vsel %vm1313_vm1, %v6011_v36, %v1190_v21  ;;  %v1893_v50 = vpop.permute.xlu0 %1892  ;;  %v6125_v23 = vadd.f32 %v990_v44, %v483_v62  ;;  %v910_v44 = vsel %vm903_vm3, %v5979_v7, %v892_v32  ;;  %v475_v7 = vmul.f32 %v3916_v38, %v5513_v45 }
 0x2ca   : > { %v1516_v19 = vmax.f32 %v5542_v59, %v1330_v15  ;;  %v1917_v56 = vsel %vm1916_vm5, %v1598_v20, %v1893_v50  ;;  %v982_v32 = vmul.f32 %v3918_v39, %v910_v44 }
 0x2cc   : > { %v2456_v57 = vpop.f32.mrf.mxu2  ;;  %v1942_v46 = vmax.f32 %v1516_v19, %v1756_v11 }
 0x2cd   : > { %v6128_v53 = vadd.f32 %v2456_v57, %v6825_v47 }
 0x2ce   : > { %1713 = vrot.lane.b32.xlu1 %v6097_v4, %s3687_s20  ;;  %1271 = vrot.lane.b32.xlu2 %v6102_v35, %s3686_s19  ;;  %v2024_v59 = vadd.f32 %v4332_v13, %v1942_v46 }
 0x2cf   : > { %1307 = vrot.lane.b32.xlu0 %v6125_v23, %s3686_s19 }
 0x2d0   : > { %v1467_v36 = vpop.permute.xlu1 %1466  ;;  %v1192_v1 = vpop.permute.xlu2 %1191  ;;  %v2104_v14 = vmax.f32 %v2024_v59, 0.0 }
 0x2d1   : > { %v1491_v54 = vsel %vm1490_vm4, %v6013_v55, %v1467_v36  ;;  %v6139_v10 = vpop.permute.xlu0 %1209  ;;  %v1331_v19 = vsel %vm1313_vm1, %v1190_v21, %v1192_v1  ;;  %v6826_v55 = vld [vmem:[#allocation19_spill] sm:$0xff] }
 0x2d2   : > { %v1508_v61 = vmax.f32 %v5452_v17, %v1491_v54  ;;  %2648 = vmatmul.f32.gmra.mxu3 %v2104_v14  ;;  %v484_v17 = vmul.f32 %v3916_v38, %v5491_v43  ;;  %v1517_v46 = vmax.f32 %v5518_v30, %v1331_v19  ;;  %v6165_v14 = vadd.f32 %v982_v32, %v475_v7  ;;  %v6830_v7 = vld [vmem:[#allocation38_spill] sm:$0xff] }
 0x2d4   : > { %v1934_v62 = vmax.f32 %v1508_v61, %v1917_v56 }
 0x2d6   : > { %v2016_v15 = vadd.f32 %v4332_v13, %v1934_v62  ;;  %1715 = vrot.lane.b32.xlu1 %v6069_v26, %s3687_s20  ;;  %1476 = vrot.lane.b32.xlu2 %v6826_v55, %s3690_s25 }
 0x2d7   : > { %1733 = vrot.lane.b32.xlu0 %v6125_v23, %s3687_s20  ;;  %v2535_v20 = vpop.f32.mrf.mxu0 }
 0x2d8   : > { %v2096_v21 = vmax.f32 %v2016_v15, 0.0  ;;  %v2536_v50 = vadd.f32 %v2535_v20, %v2495_v5  ;;  %v725_v11 = vpop.permute.xlu1 %724  ;;  %v1469_v57 = vpop.permute.xlu2 %1468  ;;  %v6829_v20 = vld [vmem:[#allocation25_spill] sm:$0xff] }
 0x2d9   : > { %v798_v47 = vsel %vm726_vm0, %v6057_v25, %v725_v11  ;;  %v1618_v43 = vpop.permute.xlu0 %1617  ;;  %v1492_v30 = vsel %vm1490_vm4, %v1192_v1, %v1469_v57  ;;  %v6827_v1 = vld [vmem:[#allocation41_spill] sm:$0xff]  ;;  %vm6729_vm0 = vcmask 1045509  }
 0x2da   : > { %v991_v59 = vmul.f32 %v3918_v39, %v798_v47  ;;  %v1757_v36 = vsel %vm1739_vm2, %v6095_v63, %v1618_v43  ;;  %3532 = vmatmul.msk.f32.vlgmr.msra.gmra.mxu1 %vm2317_vm6, %v2096_v21  ;;  %v1518_v56 = vmax.f32 %v5611_v42, %v1492_v30 }
 0x2db   : > { %v1943_v45 = vmax.f32 %v1517_v46, %v1757_v36  ;;  %v6831_v46 = vld [vmem:[#allocation18_spill] sm:$0xff] }
 0x2dc   : > { %v6167_v54 = vadd.f32 %v991_v59, %v484_v17 }
 0x2dd   : > { %v2025_v5 = vadd.f32 %v4332_v13, %v1943_v45 }
 0x2de   : > { %1291 = vrot.lane.b32.xlu1 %v6165_v14, %s3686_s19  ;;  %1902 = vrot.lane.b32.xlu2 %v6826_v55, %s3689_s24  ;;  %v6828_v55 = vld [vmem:[#allocation21_spill] sm:$0xff] }
 0x2df   : > { %1735 = vrot.lane.b32.xlu0 %v6167_v54, %s3687_s20  ;;  %v2105_v25 = vmax.f32 %v2025_v5, 0.0  ;;  %v6832_v5 = vld [vmem:[#allocation44_spill] sm:$0xff] }
 0x2e0   : > { %v1208_v63 = vpop.permute.xlu1 %1207  ;;  %v894_v61 = vpop.permute.xlu2 %893 }
 0x2e1   : > { %2689 = vmatmul.f32.gmra.mxu0 %v2105_v25  ;;  %v1895_v62 = vpop.permute.xlu0 %1894  ;;  %v1338_v19 = vsel %vm1313_vm1, %v6827_v1, %v1208_v63 }
 0x2e2   : > { %v1918_v44 = vsel %vm1916_vm5, %v1618_v43, %v1895_v62  ;;  %v1525_v32 = vmax.f32 %v6830_v7, %v1338_v19  ;;  %v1339_v62 = vsel %vm1313_vm1, %v1208_v63, %v6139_v10  ;;  %v485_v63 = vmul.f32 %v3916_v38, %v5601_v48 }
 0x2e3   : > { %v1944_v15 = vmax.f32 %v1518_v56, %v1918_v44  ;;  %v911_v44 = vsel %vm903_vm3, %v725_v11, %v894_v61  ;;  %v1526_v11 = vmax.f32 %v5654_v31, %v1339_v62 }
 0x2e4   : > { %v992_v61 = vmul.f32 %v3918_v39, %v911_v44  ;;  %v6833_v44 = vld [vmem:[#allocation42_spill] sm:$0xff] }
 0x2e5   : > { %v2026_v17 = vadd.f32 %v4332_v13, %v1944_v15 }
 0x2e6   : > { %1478 = vrot.lane.b32.xlu1 %v6828_v55, %s3690_s25  ;;  %1309 = vrot.lane.b32.xlu2 %v6167_v54, %s3686_s19 }
 0x2e7   : > { %1480 = vrot.lane.b32.xlu0 %v6829_v20, %s3690_s25  ;;  %v2106_v42 = vmax.f32 %v2026_v17, 0.0  ;;  %s3529_s25 = sshll.u32 %s6871_s28, 3 }
 0x2e8   : > { %v1634_v21 = vpop.permute.xlu1 %1633  ;;  %v1212_v57 = vpop.permute.xlu2 %1211  ;;  %s322_s16 = scalar_lea.vmem %s6671_s8, %s3529_s25 }
 0x2e9   : > { %v1764_v47 = vsel %vm1739_vm2, %v6831_v46, %v1634_v21  ;;  %3533 = vmatmul.msk.f32.gmra.mxu1 %vm2317_vm6, %v2106_v42  ;;  %v6192_v43 = vpop.permute.xlu0 %1229  ;;  %v1340_v19 = vsel %vm1313_vm1, %v6139_v10, %v1212_v57 }
 0x2ea   : > { %v1951_v59 = vmax.f32 %v1525_v32, %v1764_v47  ;;  %v1527_v10 = vmax.f32 %v5565_v16, %v1340_v19 }
 0x2eb   : > { %v2459_v36 = vpop.f32.mrf.mxu2  ;;  %v2497_v45 = vpop.f32.mrf.mxu3 }
 0x2ec   : > { %v2460_v30 = vadd.f32 %v2459_v36, %v6832_v5  ;;  %v2498_v25 = vadd.f32 %v2497_v45, %v6128_v53  ;;  %v2033_v56 = vadd.f32 %v4332_v13, %v1951_v59  ;;  %v6215_v36 = vadd.f32 %v992_v61, %v485_v63  ;;  %v6834_v63 = vld [vmem:[#allocation12_spill] sm:$0xff] }
 0x2ed   : > { %v2538_v15 = vpop.f32.mrf.mxu0  ;;  %v2576_v1 = vpop.f32.mrf.mxu1 }
 0x2ee   : > { %v2539_v17 = vadd.f32 %v2538_v15, %v2498_v25  ;;  %v6202_v42 = vadd.f32 %v2576_v1, %v2536_v50  ;;  %1904 = vrot.lane.b32.xlu1 %v6828_v55, %s3689_s24  ;;  %1717 = vrot.lane.b32.xlu2 %v6165_v14, %s3687_s20  ;;  %v2113_v53 = vmax.f32 %v2033_v56, 0.0 }
 0x2f0   : > { %v1636_v7 = vpop.permute.xlu1 %1635  ;;  %v1471_v32 = vpop.permute.xlu2 %1470  ;;  %2610 = vmatmul.f32.gmra.mxu2 %v2113_v53 }
 0x2f1   : > { %v1765_v50 = vsel %vm1739_vm2, %v1634_v21, %v1636_v7  ;;  %v1638_v46 = vpop.permute.xlu0 %1637  ;;  %v1493_v48 = vsel %vm1490_vm4, %v1212_v57, %v1471_v32 }
 0x2f2   : > { %v1952_v55 = vmax.f32 %v1526_v11, %v1765_v50  ;;  %v1766_v47 = vsel %vm1739_vm2, %v1636_v7, %v1638_v46  ;;  %v1528_v21 = vmax.f32 %v5544_v51, %v1493_v48 }
 0x2f3   : > { %v1953_v59 = vmax.f32 %v1527_v10, %v1766_v47 }
 0x2f4   : > { %v2034_v38 = vadd.f32 %v4332_v13, %v1952_v55  ;;  %v6835_v55 = vld [vmem:[#allocation17_spill] sm:$0xff] }
 0x2f5   : > { %v2035_v39 = vadd.f32 %v4332_v13, %v1953_v59 }
 0x2f6   : > { %1737 = vrot.lane.b32.xlu1 %v6215_v36, %s3687_s20  ;;  %1311 = vrot.lane.b32.xlu2 %v6215_v36, %s3686_s19  ;;  %v2114_v16 = vmax.f32 %v2034_v38, 0.0  ;;  %s3550_s19 = sld [smem:[#allocation2 + $0x4]]  ;;  %s3693_s20 = smov 125  }
 0x2f7   : > { %v2115_v31 = vmax.f32 %v2035_v39, 0.0 }
 0x2f8   : > { %v1228_v45 = vpop.permute.xlu1 %1227  ;;  %v1897_v5 = vpop.permute.xlu2 %1896  ;;  %2651 = vmatmul.f32.gmra.mxu3 %v2114_v16 }
 0x2f9   : > { %v1919_v25 = vsel %vm1916_vm5, %v1638_v46, %v1897_v5  ;;  %2692 = vmatmul.f32.gmra.mxu0 %v2115_v31  ;;  %v1248_v56 = vpop.permute.xlu0 %1247  ;;  %v1347_v15 = vsel %vm1313_vm1, %v6833_v44, %v1228_v45  ;;  %v1348_v59 = vsel %vm1313_vm1, %v1228_v45, %v6192_v43 }
 0x2fa   : > { %v1954_v57 = vmax.f32 %v1528_v21, %v1919_v25  ;;  %v1535_v11 = vmax.f32 %v6834_v63, %v1347_v15  ;;  %v1356_v10 = vsel %vm1313_vm1, %v5505_v49, %v1248_v56  ;;  %v1536_v39 = vmax.f32 %v5796_v40, %v1348_v59  ;;  %v6837_v59 = vld [vmem:[#allocation15_spill] sm:$0xff] }
 0x2fb   : > { %v1545_v47 = vmax.f32 %v6835_v55, %v1356_v10 }
 0x2fc   : > { %v2036_v62 = vadd.f32 %v4332_v13, %v1954_v57 }
 0x2fd   : > { %v2500_v1 = vpop.f32.mrf.mxu3 }
 0x2fe   : > { %v2501_v19 = vadd.f32 %v2500_v1, %v2460_v30  ;;  %1906 = vrot.lane.b32.xlu2 %v6829_v20, %s3689_s24  ;;  %v2116_v53 = vmax.f32 %v2036_v62, 0.0  ;;  %s3560_s24 = sld [smem:[#allocation2 + $0x5]] }
 0x2ff   : > { %v2579_v51 = vpop.f32.mrf.mxu1 }
 0x300   : > { %v6232_v61 = vadd.f32 %v2579_v51, %v2539_v17  ;;  %v1654_v7 = vpop.permute.xlu1 %1653  ;;  %v6234_v32 = vpop.permute.xlu2 %1249  ;;  %3534 = vmatmul.msk.f32.gmra.mxu1 %vm2317_vm6, %v2116_v53 }
 0x301   : > { %v1773_v30 = vsel %vm1739_vm2, %v5431_v37, %v1654_v7  ;;  %v1674_v50 = vpop.permute.xlu0 %1673  ;;  %v1357_v37 = vsel %vm1313_vm1, %v1248_v56, %v6234_v32 }
 0x302   : > { %v1961_v46 = vmax.f32 %v1535_v11, %v1773_v30  ;;  %v1782_v20 = vsel %vm1739_vm2, %v5635_v3, %v1674_v50  ;;  %v1546_v25 = vmax.f32 %v5803_v22, %v1357_v37  ;;  %v6836_v30 = vld [vmem:[#allocation10_spill] sm:$0xff] }
 0x303   : > { %v1971_v38 = vmax.f32 %v1545_v47, %v1782_v20 }
 0x304   : > { %v2043_v17 = vadd.f32 %v4332_v13, %v1961_v46 }
 0x305   : > { %v2053_v5 = vadd.f32 %v4332_v13, %v1971_v38 }
 0x306   : > { %v2123_v48 = vmax.f32 %v2043_v17, 0.0 }
 0x307   : > { %v2133_v62 = vmax.f32 %v2053_v5, 0.0 }
 0x308   : > { %v1656_v49 = vpop.permute.xlu1 %1655  ;;  %v1658_v16 = vpop.permute.xlu2 %1657  ;;  %2613 = vmatmul.f32.gmra.mxu2 %v2123_v48 }
 0x309   : > { %v1774_v31 = vsel %vm1739_vm2, %v1654_v7, %v1656_v49  ;;  %v6251_v3 = vpop.permute.xlu0 %1675  ;;  %v1775_v63 = vsel %vm1739_vm2, %v1656_v49, %v1658_v16 }
 0x30a   : > { %v1962_v21 = vmax.f32 %v1536_v39, %v1774_v31  ;;  %v1783_v45 = vsel %vm1739_vm2, %v1674_v50, %v6251_v3 }
 0x30b   : > { %v1972_v57 = vmax.f32 %v1546_v25, %v1783_v45 }
 0x30c   : > { %v2044_v40 = vadd.f32 %v4332_v13, %v1962_v21 }
 0x30d   : > { %v2054_v51 = vadd.f32 %v4332_v13, %v1972_v57 }
 0x30e   : > { %v2124_v44 = vmax.f32 %v2044_v40, 0.0 }
 0x30f   : > { %v2134_v7 = vmax.f32 %v2054_v51, 0.0 }
 0x310   : > { %v1232_v15 = vpop.permute.xlu1 %1231  ;;  %v1268_v1 = vpop.permute.xlu2 %1267  ;;  %2616 = vmatmul.f32.gmra.mxu2 %v2133_v62  ;;  %2654 = vmatmul.f32.gmra.mxu3 %v2124_v44 }
 0x311   : > { %v1349_v56 = vsel %vm1313_vm1, %v6192_v43, %v1232_v15  ;;  %v1365_v22 = vsel %vm1313_vm1, %v5726_v6, %v1268_v1 }
 0x312   : > { %v1537_v53 = vmax.f32 %v5708_v2, %v1349_v56  ;;  %v1555_v50 = vmax.f32 %v6836_v30, %v1365_v22 }
 0x314   : > { %v1963_v11 = vmax.f32 %v1537_v53, %v1775_v63 }
 0x316   : > { %v2045_v10 = vadd.f32 %v4332_v13, %v1963_v11 }
 0x318   : > { %v1473_v46 = vpop.permute.xlu1 %1472  ;;  %v1694_v20 = vpop.permute.xlu2 %1693  ;;  %2657 = vmatmul.f32.gmra.mxu3 %v2134_v7  ;;  %v2125_v55 = vmax.f32 %v2045_v10, 0.0 }
 0x319   : > { %v1791_v2 = vsel %vm1739_vm2, %v5685_v9, %v1694_v20  ;;  %v1252_v43 = vpop.permute.xlu0 %1251  ;;  %v1494_v48 = vsel %vm1490_vm4, %v1232_v15, %v1473_v46 }
 0x31a   : > { %v1981_v47 = vmax.f32 %v1555_v50, %v1791_v2  ;;  %2695 = vmatmul.f32.gmra.mxu0 %v2125_v55  ;;  %v1538_v45 = vmax.f32 %v5701_v29, %v1494_v48 }
 0x31b   : > { %v2462_v17 = vpop.f32.mrf.mxu2  ;;  %v2503_v39 = vpop.f32.mrf.mxu3 }
 0x31c   : > { %v2463_v38 = vadd.f32 %v2462_v17, %v6837_v59  ;;  %v2063_v6 = vadd.f32 %v4332_v13, %v1981_v47 }
 0x31d   : > { %v2541_v49 = vpop.f32.mrf.mxu0  ;;  %v2582_v5 = vpop.f32.mrf.mxu1 }
 0x31e   : > { %v2504_v37 = vadd.f32 %v2503_v39, %v2463_v38  ;;  %v2542_v31 = vadd.f32 %v2541_v49, %v2501_v19  ;;  %v2143_v21 = vmax.f32 %v2063_v6, 0.0 }
 0x320   : > { %v6273_v25 = vadd.f32 %v2582_v5, %v2542_v31  ;;  %v1899_v9 = vpop.permute.xlu1 %1898  ;;  %v1696_v40 = vpop.permute.xlu2 %1695  ;;  %2619 = vmatmul.f32.gmra.mxu2 %v2143_v21 }
 0x321   : > { %v1920_v57 = vsel %vm1916_vm5, %v1658_v16, %v1899_v9  ;;  %v1475_v62 = vpop.permute.xlu0 %1474  ;;  %v1792_v11 = vsel %vm1739_vm2, %v1694_v20, %v1696_v40  ;;  %v1358_v16 = vsel %vm1313_vm1, %v6234_v32, %v1252_v43 }
 0x322   : > { %v1964_v44 = vmax.f32 %v1538_v45, %v1920_v57  ;;  %v1495_v7 = vsel %vm1490_vm4, %v1252_v43, %v1475_v62  ;;  %v1547_v30 = vmax.f32 %v5891_v33, %v1358_v16 }
 0x323   : > { %v1548_v50 = vmax.f32 %v5959_v34, %v1495_v7 }
 0x324   : > { %v2046_v56 = vadd.f32 %v4332_v13, %v1964_v44 }
 0x326   : > { %v2126_v15 = vmax.f32 %v2046_v56, 0.0 }
 0x328   : > { %v1270_v53 = vpop.permute.xlu1 %1269  ;;  %v1272_v51 = vpop.permute.xlu2 %1271  ;;  %3535 = vmatmul.msk.f32.gmra.mxu1 %vm2317_vm6, %v2126_v15 }
 0x329   : > { %v1366_v19 = vsel %vm1313_vm1, %v1268_v1, %v1270_v53  ;;  %v1901_v63 = vpop.permute.xlu0 %1900  ;;  %v1367_v33 = vsel %vm1313_vm1, %v1270_v53, %v1272_v51  ;;  %v6838_v53 = vld [vmem:[#allocation16_spill] sm:$0xff] }
 0x32a   : > { %v1556_v29 = vmax.f32 %v6021_v27, %v1366_v19 }
 0x32c   : > { %v1982_v22 = vmax.f32 %v1556_v29, %v1792_v11 }
 0x32e   : > { %v2064_v10 = vadd.f32 %v4332_v13, %v1982_v22 }
 0x330   : > { %v1678_v46 = vpop.permute.xlu1 %1677  ;;  %v1477_v55 = vpop.permute.xlu2 %1476  ;;  %v2144_v1 = vmax.f32 %v2064_v10, 0.0 }
 0x331   : > { %v1784_v27 = vsel %vm1739_vm2, %v6251_v3, %v1678_v46  ;;  %v1921_v20 = vsel %vm1916_vm5, %v1678_v46, %v1901_v63  ;;  %v6290_v2 = vpop.permute.xlu0 %1289  ;;  %v1496_v34 = vsel %vm1490_vm4, %v1272_v51, %v1477_v55  ;;  %v1557_v3 = vmax.f32 %v6023_v12, %v1367_v33  ;;  %v6842_v33 = vld [vmem:[#allocation20_spill] sm:$0xff] }
 0x332   : > { %v1973_v47 = vmax.f32 %v1547_v30, %v1784_v27  ;;  %v1974_v32 = vmax.f32 %v1548_v50, %v1921_v20  ;;  %2660 = vmatmul.f32.gmra.mxu3 %v2144_v1  ;;  %v1558_v39 = vmax.f32 %v6102_v35, %v1496_v34  ;;  %v6839_v30 = vld [vmem:[#allocation35_spill] sm:$0xff]  ;;  %v6840_v1 = vld [vmem:[#allocation36_spill] sm:$0xff] }
 0x333   : > { %v2442_v27 = vadd.f32 %v5598_v41, %v6840_v1 }
 0x334   : > { %v2055_v43 = vadd.f32 %v4332_v13, %v1973_v47  ;;  %v2056_v17 = vadd.f32 %v4332_v13, %v1974_v32  ;;  %v6841_v32 = vld [vmem:[#allocation32_spill] sm:$0xff] }
 0x336   : > { %v2135_v59 = vmax.f32 %v2055_v43, 0.0  ;;  %v2136_v38 = vmax.f32 %v2056_v17, 0.0  ;;  %v2483_v43 = vadd.f32 %v6841_v32, %v2442_v27 }
 0x338   : > { %v1288_v6 = vpop.permute.xlu1 %1287  ;;  %v1903_v48 = vpop.permute.xlu2 %1902  ;;  %2698 = vmatmul.f32.gmra.mxu0 %v2135_v59  ;;  %3536 = vmatmul.msk.f32.gmra.mxu1 %vm2317_vm6, %v2136_v38  ;;  %v2524_v34 = vadd.f32 %v6842_v33, %v2483_v43 }
 0x339   : > { %v1698_v49 = vpop.permute.xlu0 %1697  ;;  %v1374_v9 = vsel %vm1313_vm1, %v5791_v52, %v1288_v6  ;;  %v1375_v29 = vsel %vm1313_vm1, %v1288_v6, %v6290_v2  ;;  %v2605_v6 = vpop.f32.mrf.mxu2 }
 0x33a   : > { %v1793_v31 = vsel %vm1739_vm2, %v1696_v40, %v1698_v49  ;;  %v1922_v21 = vsel %vm1916_vm5, %v1698_v49, %v1903_v48  ;;  %v1565_v35 = vmax.f32 %v6838_v53, %v1374_v9  ;;  %v2565_v41 = vadd.f32 %v5908_v0, %v2524_v34 }
 0x33b   : > { %v1983_v5 = vmax.f32 %v1557_v3, %v1793_v31  ;;  %v1984_v45 = vmax.f32 %v1558_v39, %v1922_v21 }
 0x33d   : > { %v2544_v57 = vpop.f32.mrf.mxu0  ;;  %v2065_v62 = vadd.f32 %v4332_v13, %v1983_v5  ;;  %v2066_v44 = vadd.f32 %v4332_v13, %v1984_v45  ;;  %v2606_v5 = vadd.f32 %v2605_v6, %v2565_v41 }
 0x33e   : > { %v2545_v56 = vadd.f32 %v2544_v57, %v2504_v37 }
 0x33f   : > { %v2145_v15 = vmax.f32 %v2065_v62, 0.0  ;;  %v2146_v12 = vmax.f32 %v2066_v44, 0.0 }
 0x340   : > { %v1714_v51 = vpop.permute.xlu1 %1713  ;;  %v6312_v37 = vpop.permute.xlu2 %1309 }
 0x341   : > { %v1800_v40 = vsel %vm1739_vm2, %v5860_v60, %v1714_v51  ;;  %2701 = vmatmul.f32.gmra.mxu0 %v2145_v15  ;;  %3537 = vmatmul.msk.f32.gmra.mxu1 %vm2317_vm6, %v2146_v12  ;;  %v1308_v19 = vpop.permute.xlu0 %1307  ;;  %v1566_v60 = vmax.f32 %v6097_v4, %v1375_v29 }
 0x342   : > { %v1991_v63 = vmax.f32 %v1565_v35, %v1800_v40  ;;  %v1383_v22 = vsel %vm1313_vm1, %v5946_v58, %v1308_v19  ;;  %v1384_v59 = vsel %vm1313_vm1, %v1308_v19, %v6312_v37  ;;  %v6844_v19 = vld [vmem:[#allocation28_spill] sm:$0xff] }
 0x343   : > { %v1575_v50 = vmax.f32 %v6839_v30, %v1383_v22  ;;  %v1576_v49 = vmax.f32 %v6125_v23, %v1384_v59 }
 0x344   : > { %v2073_v52 = vadd.f32 %v4332_v13, %v1991_v63 }
 0x345   : > { %v2585_v11 = vpop.f32.mrf.mxu1  ;;  %v2687_v57 = vpop.f32.mrf.mxu0 }
 0x346   : > { %v6316_v16 = vadd.f32 %v2585_v11, %v2545_v56  ;;  %v2153_v7 = vmax.f32 %v2073_v52, 0.0  ;;  %v6845_v52 = vld [vmem:[#allocation37_spill] sm:$0xff]  ;;  %v6846_v11 = vld [vmem:[#allocation31_spill] sm:$0xff] }
 0x348   : > { %v1716_v10 = vpop.permute.xlu1 %1715  ;;  %2622 = vmatmul.f32.gmra.mxu2 %v2153_v7  ;;  %v1718_v3 = vpop.permute.xlu2 %1717 }
 0x349   : > { %v1801_v46 = vsel %vm1739_vm2, %v1714_v51, %v1716_v10  ;;  %v1734_v55 = vpop.permute.xlu0 %1733  ;;  %v1802_v62 = vsel %vm1739_vm2, %v1716_v10, %v1718_v3 }
 0x34a   : > { %v1992_v20 = vmax.f32 %v1566_v60, %v1801_v46  ;;  %v1809_v47 = vsel %vm1739_vm2, %v6086_v18, %v1734_v55  ;;  %v2646_v18 = vpop.f32.mrf.mxu3  ;;  %v2608_v60 = vpop.f32.mrf.mxu2 }
 0x34b   : > { %v2001_v58 = vmax.f32 %v1575_v50, %v1809_v47  ;;  %v2647_v44 = vadd.f32 %v2646_v18, %v2606_v5 }
 0x34c   : > { %v2074_v17 = vadd.f32 %v4332_v13, %v1992_v20 }
 0x34d   : > { %v2083_v4 = vadd.f32 %v4332_v13, %v2001_v58  ;;  %v2688_v12 = vadd.f32 %v2687_v57, %v2647_v44 }
 0x34e   : > { %v2154_v38 = vmax.f32 %v2074_v17, 0.0 }
 0x34f   : > { %v2163_v48 = vmax.f32 %v2083_v4, 0.0 }
 0x350   : > { %v1292_v39 = vpop.permute.xlu1 %1291  ;;  %2663 = vmatmul.f32.gmra.mxu3 %v2154_v38  ;;  %v1312_v10 = vpop.permute.xlu2 %1311 }
 0x351   : > { %v1376_v31 = vsel %vm1313_vm1, %v6290_v2, %v1292_v39  ;;  %2625 = vmatmul.f32.gmra.mxu2 %v2163_v48  ;;  %v1736_v21 = vpop.permute.xlu0 %1735  ;;  %v1385_v17 = vsel %vm1313_vm1, %v6312_v37, %v1312_v10  ;;  %vm6728_vm1 = vcmask 1046534  }
 0x352   : > { %v1567_v45 = vmax.f32 %v6069_v26, %v1376_v31  ;;  %v1810_v9 = vsel %vm1739_vm2, %v1734_v55, %v1736_v21  ;;  %v6843_v26 = vld [vmem:[#allocation39_spill] sm:$0xff] }
 0x353   : > { %v2002_v0 = vmax.f32 %v1576_v49, %v1810_v9  ;;  %v2445_v63 = vadd.f32 %v6844_v19, %v6843_v26  ;;  %v2812_v26 = vld [vmem:[%s6665_s2 + $0x10] sm:$0xff] }
 0x354   : > { %v1993_v56 = vmax.f32 %v1567_v45, %v1802_v62 }
 0x355   : > { %v2084_v15 = vadd.f32 %v4332_v13, %v2002_v0  ;;  %v2486_v29 = vadd.f32 %v6845_v52, %v2445_v63  ;;  %v2649_v50 = vpop.f32.mrf.mxu3  ;;  %v2811_v63 = vld [vmem:[%s6665_s2 + $0x8] sm:$0xff] }
 0x356   : > { %v2075_v23 = vadd.f32 %v4332_v13, %v1993_v56 }
 0x357   : > { %v2728_v53 = vpop.f32.mrf.mxu1  ;;  %v2164_v2 = vmax.f32 %v2084_v15, 0.0  ;;  %v2527_v22 = vadd.f32 %v6846_v11, %v2486_v29  ;;  %v2810_v29 = vld [vmem:[%s6665_s2] sm:$0xff] }
 0x358   : > { %v6340_v35 = vadd.f32 %v2728_v53, %v2688_v12  ;;  %v1479_v51 = vpop.permute.xlu1 %1478  ;;  %v2155_v40 = vmax.f32 %v2075_v23, 0.0  ;;  %v1907_v38 = vpop.permute.xlu2 %1906  ;;  %v2815_v23 = vld [vmem:[%s6665_s2 + $0x28] sm:$0xff] }
 0x359   : > { %2666 = vmatmul.f32.gmra.mxu3 %v2164_v2  ;;  %v1497_v7 = vsel %vm1490_vm4, %v1292_v39, %v1479_v51  ;;  %v2568_v30 = vadd.f32 %v5942_v8, %v2527_v22  ;;  %v1481_v20 = vpop.permute.xlu0 %1480  ;;  %v2814_v51 = vld [vmem:[%s6665_s2 + $0x20] sm:$0xff] }
 0x35a   : > { %2760 = vrot.lane.b32.xlu0 %v6340_v35, %s3691_s15  ;;  %2704 = vmatmul.f32.gmra.mxu0 %v2155_v40  ;;  %v1568_v46 = vmax.f32 %v6165_v14, %v1497_v7  ;;  %v1498_v4 = vsel %vm1490_vm4, %v1312_v10, %v1481_v20  ;;  %v1577_v14 = vmax.f32 %v6167_v54, %v1385_v17 }
 0x35b   : > { %v2609_v1 = vadd.f32 %v2608_v60, %v2568_v30  ;;  %v1578_v6 = vmax.f32 %v6215_v36, %v1498_v4 }
 0x35d   : > { %v2650_v32 = vadd.f32 %v2649_v50, %v2609_v1 }
 0x35e   : > { %v2690_v47 = vpop.f32.mrf.mxu0 }
 0x35f   : > { %v2691_v33 = vadd.f32 %v2690_v47, %v2650_v32 }
 0x360   : > { %v1905_v55 = vpop.permute.xlu1 %1904 }
 0x361   : > { %v1923_v27 = vsel %vm1916_vm5, %v1718_v3, %v1905_v55 }
 0x362   : > { %v1994_v58 = vmax.f32 %v1568_v46, %v1923_v27 }
 0x364   : > { %v2076_v43 = vadd.f32 %v4332_v13, %v1994_v58 }
 0x366   : > { %v2731_v8 = vpop.f32.mrf.mxu1  ;;  %v2156_v34 = vmax.f32 %v2076_v43, 0.0 }
 0x367   : > { %v6356_v59 = vadd.f32 %v2731_v8, %v2691_v33 }
 0x368   : > { %v1738_v48 = vpop.permute.xlu1 %1737  ;;  %3538 = vmatmul.msk.f32.gmra.mxu1 %vm2317_vm6, %v2156_v34 }
 0x369   : > { %v1811_v41 = vsel %vm1739_vm2, %v1736_v21, %v1738_v48  ;;  %v1924_v3 = vsel %vm1916_vm5, %v1738_v48, %v1907_v38  ;;  %2762 = vrot.lane.b32.xlu1 %v6356_v59, %s3691_s15  ;;  %vm6727_vm2 = vcmask 1047559  }
 0x36a   : > { %v2003_v37 = vmax.f32 %v1577_v14, %v1811_v41  ;;  %v2004_v39 = vmax.f32 %v1578_v6, %v1924_v3 }
 0x36c   : > { %v2085_v18 = vadd.f32 %v4332_v13, %v2003_v37  ;;  %v2086_v49 = vadd.f32 %v4332_v13, %v2004_v39 }
 0x36e   : > { %v2165_v54 = vmax.f32 %v2085_v18, 0.0  ;;  %v2166_v31 = vmax.f32 %v2086_v49, 0.0 }
 0x370   : > { %2707 = vmatmul.f32.gmra.mxu0 %v2165_v54  ;;  %3539 = vmatmul.msk.f32.gmra.mxu1 %vm2317_vm6, %v2166_v31 }
 0x373   : > { %v2611_v36 = vpop.f32.mrf.mxu2 }
 0x374   : > { %v2612_v5 = vadd.f32 %v2611_v36, %v5977_v28  ;;  %v2816_v28 = vld [vmem:[%s6665_s2 + $0x30] sm:$0x3] }
 0x375   : > { %3541 = vmatpush.msk.msra.mxu2 %vm2842_vm7, %v2816_v28 }
 0x376   : > { %v2693_v9 = vpop.f32.mrf.mxu0 }
 0x377   : > { %2856 = vmatpush.msra.mxu2 %v2815_v23 }
 0x379   : > { %2857 = vmatpush.msra.mxu2 %v2814_v51 }
 0x37b   : > { %v2652_v21 = vpop.f32.mrf.mxu3 }
 0x37c   : > { %v2653_v45 = vadd.f32 %v2652_v21, %v2612_v5 }
 0x37d   : > { %v2734_v62 = vpop.f32.mrf.mxu1 }
 0x37e   : > { %v2694_v57 = vadd.f32 %v2693_v9, %v2653_v45 }
 0x380   : > { %v6369_v0 = vadd.f32 %v2734_v62, %v2694_v57 }
 0x382   : > { %2764 = vrot.lane.b32.xlu2 %v6369_v0, %s3691_s15 }
 0x38b   : > { %v2614_v44 = vpop.f32.mrf.mxu2 }
 0x38c   : > { %v2615_v56 = vadd.f32 %v2614_v44, %v6114_v24  ;;  %v2813_v24 = vld [vmem:[%s6665_s2 + $0x18] sm:$0xff] }
 0x38d   : > { %2858 = vmatpush.msra.mxu2 %v2813_v24 }
 0x38f   : > { %2859 = vmatpush.msra.mxu2 %v2812_v26 }
 0x391   : > { %2860 = vmatpush.msra.mxu2 %v2811_v63 }
 0x393   : > { %v2655_v13 = vpop.f32.mrf.mxu3  ;;  %v2617_v19 = vpop.f32.mrf.mxu2  ;;  %2861 = vmatpush.msra.mxu2 %v2810_v29 }
 0x394   : > { %v2656_v12 = vadd.f32 %v2655_v13, %v2615_v56  ;;  %v2618_v11 = vadd.f32 %v2617_v19, %v6202_v42  ;;  %v2793_v42 = vstv %s3540_s29 }
 0x397   : > { %v2696_v15 = vpop.f32.mrf.mxu0 }
 0x398   : > { %v2697_v53 = vadd.f32 %v2696_v15, %v2656_v12 }
 0x39b   : > { %v2658_v52 = vpop.f32.mrf.mxu3 }
 0x39c   : > { %v2659_v22 = vadd.f32 %v2658_v52, %v2618_v11 }
 0x3a3   : > { %v2620_v30 = vpop.f32.mrf.mxu2 }
 0x3a4   : > { %v2621_v55 = vadd.f32 %v2620_v30, %v6232_v61  ;;  %v2928_v30 = vstv %s3550_s19 }
 0x3a5   : > { %v2737_v2 = vpop.f32.mrf.mxu1 }
 0x3a6   : > { %v6383_v40 = vadd.f32 %v2737_v2, %v2697_v53 }
 0x3a8   : > { %2766 = vrot.lane.b32.xlu0 %v6383_v40, %s3691_s15 }
 0x3b5   : > { %v2699_v7 = vpop.f32.mrf.mxu0  ;;  %v2740_v10 = vpop.f32.mrf.mxu1 }
 0x3b6   : > { %v2700_v60 = vadd.f32 %v2699_v7, %v2659_v22  ;;  %v2661_v46 = vpop.f32.mrf.mxu3  ;;  %v2946_v7 = vld [vmem:[%s6666_s3 + $0x8] sm:$0xf] }
 0x3b7   : > { %v2662_v1 = vadd.f32 %v2661_v46, %v2621_v55  ;;  %3551 = vmatpush.msk.msra.mxu3 %vm2972_vm9, %v2946_v7 }
 0x3b8   : > { %v2741_v50 = vadd.f32 %v2740_v10, %v2700_v60  ;;  %v2945_v60 = vld [vmem:[%s6666_s3] sm:$0xff] }
 0x3b9   : > { %2991 = vmatpush.msra.mxu3 %v2945_v60 }
 0x3ba   : > { %2768 = vrot.lane.b32.xlu1 %v2741_v50, %s3691_s15 }
 0x3be   : > { %v2702_v27 = vpop.f32.mrf.mxu0  ;;  %v2743_v47 = vpop.f32.mrf.mxu1 }
 0x3bf   : > { %v2703_v20 = vadd.f32 %v2702_v27, %v2662_v1 }
 0x3c1   : > { %v2744_v58 = vadd.f32 %v2743_v47, %v2703_v20 }
 0x3c3   : > { %2770 = vrot.lane.b32.xlu2 %v2744_v58, %s3691_s15 }
 0x3cb   : > { %v2623_v8 = vpop.f32.mrf.mxu2 }
 0x3cc   : > { %v2761_v32 = vpop.permute.xlu0 %2760  ;;  %v2624_v6 = vadd.f32 %v2623_v8, %v6273_v25 }
 0x3cd   : > { %v2784_v43 = vmax.f32 %v6340_v35, %v2761_v32 }
 0x3cf   : > { %v2794_v17 = vadd.f32 %v2793_v42, %v2784_v43 }
 0x3d1   : > { %v2802_v4 = vmax.f32 %v2794_v17, 0.0 }
 0x3d3   : > { %3542 = vmatmul.msk.f32.vlgmr.msra.gmra.mxu2 %vm2817_vm8, %v2802_v4  ;;  %v2664_v38 = vpop.f32.mrf.mxu3 }
 0x3d4   : > { %v2665_v37 = vadd.f32 %v2664_v38, %v2624_v6  ;;  %v2626_v54 = vpop.f32.mrf.mxu2 }
 0x3d5   : > { %v2627_v36 = vadd.f32 %v2626_v54, %v6316_v16 }
 0x3d7   : > { %v2705_v3 = vpop.f32.mrf.mxu0 }
 0x3d8   : > { %v2706_v35 = vadd.f32 %v2705_v3, %v2665_v37 }
 0x3db   : > { %v2763_v33 = vpop.permute.xlu1 %2762 }
 0x3dc   : > { %v2785_v61 = vmax.f32 %v6356_v59, %v2763_v33  ;;  %v2765_v34 = vpop.permute.xlu2 %2764  ;;  %v2667_v59 = vpop.f32.mrf.mxu3 }
 0x3dd   : > { %v2786_v41 = vmax.f32 %v6369_v0, %v2765_v34  ;;  %v2668_v25 = vadd.f32 %v2667_v59, %v2627_v36 }
 0x3de   : > { %v2795_v14 = vadd.f32 %v2793_v42, %v2785_v61 }
 0x3df   : > { %v2796_v39 = vadd.f32 %v2793_v42, %v2786_v41 }
 0x3e0   : > { %v2803_v48 = vmax.f32 %v2795_v14, 0.0 }
 0x3e1   : > { %v2804_v31 = vmax.f32 %v2796_v39, 0.0 }
 0x3e2   : > { %3543 = vmatmul.msk.f32.gmra.mxu2 %vm2817_vm8, %v2803_v48 }
 0x3e5   : > { %v2746_v18 = vpop.f32.mrf.mxu1 }
 0x3e6   : > { %v2747_v49 = vadd.f32 %v2746_v18, %v2706_v35 }
 0x3e8   : > { %2772 = vrot.lane.b32.xlu0 %v2747_v49, %s3691_s15 }
 0x3ea   : > { %3544 = vmatmul.msk.f32.gmra.mxu2 %vm2817_vm8, %v2804_v31 }
 0x3ed   : > { %v2708_v5 = vpop.f32.mrf.mxu0  ;;  %v2749_v45 = vpop.f32.mrf.mxu1 }
 0x3ee   : > { %v2709_v21 = vadd.f32 %v2708_v5, %v2668_v25 }
 0x3f0   : > { %v2750_v9 = vadd.f32 %v2749_v45, %v2709_v21 }
 0x3f2   : > { %2774 = vrot.lane.b32.xlu1 %v2750_v9, %s3691_s15 }
 0x41a   : > { %v2767_v57 = vpop.permute.xlu0 %2766 }
 0x41b   : > { %v2787_v62 = vmax.f32 %v6383_v40, %v2767_v57 }
 0x41d   : > { %v2797_v0 = vadd.f32 %v2793_v42, %v2787_v62  ;;  %v2771_v15 = vpop.permute.xlu2 %2770 }
 0x41e   : > { %v2789_v12 = vmax.f32 %v2744_v58, %v2771_v15 }
 0x41f   : > { %v2805_v44 = vmax.f32 %v2797_v0, 0.0 }
 0x420   : > { %v2799_v23 = vadd.f32 %v2793_v42, %v2789_v12  ;;  %v3058_v12 = vstv %s3560_s24 }
 0x421   : > { %3545 = vmatmul.msk.f32.gmra.mxu2 %vm2817_vm8, %v2805_v44 }
 0x422   : > { %v2807_v53 = vmax.f32 %v2799_v23, 0.0 }
 0x42c   : > { %v2769_v13 = vpop.permute.xlu1 %2768 }
 0x42d   : > { %v2788_v56 = vmax.f32 %v2741_v50, %v2769_v13 }
 0x42f   : > { %v2798_v16 = vadd.f32 %v2793_v42, %v2788_v56 }
 0x431   : > { %v2806_v28 = vmax.f32 %v2798_v16, 0.0 }
 0x433   : > { %3546 = vmatmul.msk.f32.gmra.mxu2 %vm2817_vm8, %v2806_v28 }
 0x43b   : > { %3547 = vmatmul.msk.f32.gmra.mxu2 %vm2817_vm8, %v2807_v53  ;;  %v3592_v53 = vld [vmem:[%s6667_s4] ss:$0 sm:$0xff] }
 0x456   : > { %v2863_v2 = vpop.f32.mrf.mxu2 }
 0x457   : > { %2895 = vrot.lane.b32.xlu2 %v2863_v2, %s3692_s30 }
 0x45a   : > { %v2773_v51 = vpop.permute.xlu0 %2772 }
 0x45b   : > { %v2790_v40 = vmax.f32 %v2747_v49, %v2773_v51 }
 0x45d   : > { %v2800_v24 = vadd.f32 %v2793_v42, %v2790_v40 }
 0x45f   : > { %v2808_v26 = vmax.f32 %v2800_v24, 0.0 }
 0x461   : > { %3548 = vmatmul.msk.f32.gmra.mxu2 %vm2817_vm8, %v2808_v26 }
 0x464   : > { %v2775_v19 = vpop.permute.xlu1 %2774 }
 0x465   : > { %v2791_v63 = vmax.f32 %v2750_v9, %v2775_v19  ;;  %v2866_v52 = vpop.f32.mrf.mxu2 }
 0x466   : > { %2897 = vrot.lane.b32.xlu0 %v2866_v52, %s3692_s30 }
 0x467   : > { %v2801_v29 = vadd.f32 %v2793_v42, %v2791_v63 }
 0x469   : > { %v2809_v11 = vmax.f32 %v2801_v29, 0.0 }
 0x46b   : > { %3549 = vmatmul.msk.f32.gmra.mxu2 %vm2817_vm8, %v2809_v11 }
 0x46d   : > { %v2869_v22 = vpop.f32.mrf.mxu2 }
 0x46e   : > { %2899 = vrot.lane.b32.xlu1 %v2869_v22, %s3692_s30 }
 0x4a4   : > { %v2872_v10 = vpop.f32.mrf.mxu2 }
 0x4a5   : > { %2901 = vrot.lane.b32.xlu2 %v2872_v10, %s3692_s30 }
 0x4b1   : > { %v2896_v50 = vpop.permute.xlu2 %2895 }
 0x4b2   : > { %v2919_v46 = vmax.f32 %v2863_v2, %v2896_v50 }
 0x4b4   : > { %v2929_v55 = vadd.f32 %v2928_v30, %v2919_v46 }
 0x4b6   : > { %v2937_v1 = vmax.f32 %v2929_v55, 0.0  ;;  %v2875_v27 = vpop.f32.mrf.mxu2 }
 0x4b7   : > { %2903 = vrot.lane.b32.xlu0 %v2875_v27, %s3692_s30 }
 0x4b8   : > { %3552 = vmatmul.msk.f32.vlgmr.msra.gmra.mxu3 %vm2947_vm10, %v2937_v1 }
 0x4be   : > { %v2878_v20 = vpop.f32.mrf.mxu2 }
 0x4bf   : > { %2905 = vrot.lane.b32.xlu1 %v2878_v20, %s3692_s30 }
 0x4d8   : > { %v2898_v47 = vpop.permute.xlu0 %2897 }
 0x4d9   : > { %v2920_v58 = vmax.f32 %v2866_v52, %v2898_v47 }
 0x4db   : > { %v2930_v42 = vadd.f32 %v2928_v30, %v2920_v58 }
 0x4dd   : > { %v2938_v32 = vmax.f32 %v2930_v42, 0.0 }
 0x4df   : > { %3553 = vmatmul.msk.f32.gmra.mxu3 %vm2947_vm10, %v2938_v32 }
 0x4e0   : > { %v2900_v43 = vpop.permute.xlu1 %2899 }
 0x4e1   : > { %v2921_v17 = vmax.f32 %v2869_v22, %v2900_v43 }
 0x4e3   : > { %v2931_v4 = vadd.f32 %v2928_v30, %v2921_v17 }
 0x4e4   : > { %v2881_v33 = vpop.f32.mrf.mxu2 }
 0x4e5   : > { %v2939_v61 = vmax.f32 %v2931_v4, 0.0  ;;  %2907 = vrot.lane.b32.xlu2 %v2881_v33, %s3692_s30 }
 0x4e7   : > { %3554 = vmatmul.msk.f32.gmra.mxu3 %vm2947_vm10, %v2939_v61 }
 0x4ee   : > { %v2884_v8 = vpop.f32.mrf.mxu2 }
 0x4ef   : > { %2909 = vrot.lane.b32.xlu0 %v2884_v8, %s3692_s30 }
 0x4ff   : > { %v2902_v34 = vpop.permute.xlu2 %2901 }
 0x500   : > { %v2922_v14 = vmax.f32 %v2872_v10, %v2902_v34 }
 0x502   : > { %v2932_v38 = vadd.f32 %v2928_v30, %v2922_v14 }
 0x504   : > { %v2940_v6 = vmax.f32 %v2932_v38, 0.0 }
 0x506   : > { %3555 = vmatmul.msk.f32.gmra.mxu3 %vm2947_vm10, %v2940_v6 }
 0x529   : > { %v2904_v48 = vpop.permute.xlu0 %2903 }
 0x52a   : > { %v2923_v41 = vmax.f32 %v2875_v27, %v2904_v48 }
 0x52c   : > { %v2933_v3 = vadd.f32 %v2928_v30, %v2923_v41 }
 0x52e   : > { %v2941_v37 = vmax.f32 %v2933_v3, 0.0 }
 0x530   : > { %3556 = vmatmul.msk.f32.gmra.mxu3 %vm2947_vm10, %v2941_v37 }
 0x531   : > { %v2906_v35 = vpop.permute.xlu1 %2905 }
 0x532   : > { %v2924_v39 = vmax.f32 %v2878_v20, %v2906_v35 }
 0x534   : > { %v2934_v18 = vadd.f32 %v2928_v30, %v2924_v39 }
 0x536   : > { %v2942_v49 = vmax.f32 %v2934_v18, 0.0 }
 0x538   : > { %3557 = vmatmul.msk.f32.gmra.mxu3 %vm2947_vm10, %v2942_v49 }
 0x53b   : > { %v2993_v54 = vpop.f32.mrf.mxu3 }
 0x53c   : > { %3025 = vrot.lane.b32.xlu0 %v2993_v54, %s3693_s20 }
 0x53f   : > { %v2908_v31 = vpop.permute.xlu2 %2907 }
 0x540   : > { %v2925_v59 = vmax.f32 %v2881_v33, %v2908_v31 }
 0x542   : > { %v2935_v36 = vadd.f32 %v2928_v30, %v2925_v59 }
 0x544   : > { %v2943_v25 = vmax.f32 %v2935_v36, 0.0 }
 0x546   : > { %3558 = vmatmul.msk.f32.gmra.mxu3 %vm2947_vm10, %v2943_v25 }
 0x561   : > { %v2910_v5 = vpop.permute.xlu0 %2909 }
 0x562   : > { %v2996_v21 = vpop.f32.mrf.mxu3  ;;  %v2926_v45 = vmax.f32 %v2884_v8, %v2910_v5  ;;  %v3113_v5 = vld [vmem:[%s6668_s5 + $0x8] sm:$0xff] }
 0x563   : > { %3027 = vrot.lane.b32.xlu1 %v2996_v21, %s3693_s20 }
 0x564   : > { %v2936_v9 = vadd.f32 %v2928_v30, %v2926_v45  ;;  %v3115_v45 = vld [vmem:[%s6668_s5 + $0x18] sm:$0xff] }
 0x566   : > { %v2944_v57 = vmax.f32 %v2936_v9, 0.0 }
 0x568   : > { %3559 = vmatmul.msk.f32.gmra.mxu3 %vm2947_vm10, %v2944_v57 }
 0x56a   : > { %v2999_v62 = vpop.f32.mrf.mxu3 }
 0x56b   : > { %3029 = vrot.lane.b32.xlu2 %v2999_v62, %s3693_s20 }
 0x589   : > { %v3002_v0 = vpop.f32.mrf.mxu3 }
 0x58a   : > { %3031 = vrot.lane.b32.xlu1 %v3002_v0, %s3693_s20 }
 0x5ae   : > { %v3026_v11 = vpop.permute.xlu0 %3025 }
 0x5af   : > { %v3049_v22 = vmax.f32 %v2993_v54, %v3026_v11 }
 0x5b1   : > { %v3059_v7 = vadd.f32 %v3058_v12, %v3049_v22 }
 0x5b3   : > { %v3005_v44 = vpop.f32.mrf.mxu3  ;;  %v3067_v10 = vmax.f32 %v3059_v7, 0.0 }
 0x5b4   : > { %3033 = vrot.lane.b32.xlu2 %v3005_v44, %s3693_s20 }
 0x5b5   : > { %v3079_v1 = vmul.f32 %v3592_v53, %v3067_v10 }
 0x5b7   : > { %v3088_v58 = vsel %vm6726_vm11, %v3079_v1, 0.0 }
 0x5bb   : > { %v3008_v13 = vpop.f32.mrf.mxu3 }
 0x5bc   : > { %3035 = vrot.lane.b32.xlu0 %v3008_v13, %s3693_s20 }
 0x5c5   : > { %v3030_v2 = vpop.permute.xlu2 %3029 }
 0x5c6   : > { %v3051_v40 = vmax.f32 %v2999_v62, %v3030_v2  ;;  %v3114_v62 = vld [vmem:[%s6668_s5 + $0x10] sm:$0xff] }
 0x5c8   : > { %v3061_v26 = vadd.f32 %v3058_v12, %v3051_v40 }
 0x5c9   : > { %v3011_v56 = vpop.f32.mrf.mxu3 }
 0x5ca   : > { %3037 = vrot.lane.b32.xlu1 %v3011_v56, %s3693_s20  ;;  %v3069_v19 = vmax.f32 %v3061_v26, 0.0 }
 0x5cc   : > { %v3081_v52 = vmul.f32 %v3592_v53, %v3069_v19 }
 0x5ce   : > { %v3094_v29 = vsel %vm6726_vm11, %v3081_v52, 0.0 }
 0x5d5   : > { %v3028_v15 = vpop.permute.xlu1 %3027 }
 0x5d6   : > { %v3050_v16 = vmax.f32 %v2996_v21, %v3028_v15  ;;  %v3112_v21 = vld [vmem:[%s6668_s5] sm:$0xff] }
 0x5d8   : > { %v3060_v28 = vadd.f32 %v3058_v12, %v3050_v16 }
 0x5da   : > { %v3068_v23 = vmax.f32 %v3060_v28, 0.0 }
 0x5dc   : > { %v3080_v51 = vmul.f32 %v3592_v53, %v3068_v23 }
 0x5de   : > { %v3091_v24 = vsel %vm6726_vm11, %v3080_v51, 0.0 }
 0x5e6   : > { %3092 = vadd.xlane.f32.xlu0 %v3091_v24 }
 0x5eb   : > { %v3014_v63 = vpop.f32.mrf.mxu3 }
 0x5ec   : > { %3039 = vrot.lane.b32.xlu2 %v3014_v63, %s3693_s20 }
 0x5f4   : > { %3095 = vadd.xlane.f32.xlu1 %v3094_v29 }
 0x5fc   : > { %v3032_v60 = vpop.permute.xlu1 %3031 }
 0x5fd   : > { %v3052_v30 = vmax.f32 %v3002_v0, %v3032_v60 }
 0x5ff   : > { %v3062_v55 = vadd.f32 %v3058_v12, %v3052_v30 }
 0x601   : > { %v3070_v47 = vmax.f32 %v3062_v55, 0.0 }
 0x603   : > { %v3082_v43 = vmul.f32 %v3592_v53, %v3070_v47 }
 0x605   : > { %v3097_v17 = vsel %vm6726_vm11, %v3082_v43, 0.0 }
 0x60e   : > { %v3034_v50 = vpop.permute.xlu2 %3033 }
 0x60f   : > { %v3053_v46 = vmax.f32 %v3005_v44, %v3034_v50 }
 0x611   : > { %v3063_v27 = vadd.f32 %v3058_v12, %v3053_v46  ;;  %v3118_v46 = vld [vmem:[%s6668_s5 + $0x30] sm:$0xff] }
 0x613   : > { %v3071_v20 = vmax.f32 %v3063_v27, 0.0 }
 0x615   : > { %3089 = vadd.xlane.f32.xlu2 %v3088_v58  ;;  %v3083_v42 = vmul.f32 %v3592_v53, %v3071_v20 }
 0x617   : > { %v3100_v32 = vsel %vm6726_vm11, %v3083_v42, 0.0 }
 0x618   : > { %3101 = vadd.xlane.f32.xlu0 %v3100_v32 }
 0x61d   : > { %3098 = vadd.xlane.f32.xlu2 %v3097_v17 }
 0x62e   : > { %v3036_v4 = vpop.permute.xlu0 %3035 }
 0x62f   : > { %v3054_v33 = vmax.f32 %v3008_v13, %v3036_v4 }
 0x631   : > { %v3064_v61 = vadd.f32 %v3058_v12, %v3054_v33 }
 0x633   : > { %v3072_v8 = vmax.f32 %v3064_v61, 0.0 }
 0x635   : > { %v3084_v34 = vmul.f32 %v3592_v53, %v3072_v8 }
 0x637   : > { %v3103_v14 = vsel %vm6726_vm11, %v3084_v34, 0.0 }
 0x638   : > { %3104 = vadd.xlane.f32.xlu1 %v3103_v14 }
 0x63c   : > { %v3038_v38 = vpop.permute.xlu1 %3037 }
 0x63d   : > { %v3055_v6 = vmax.f32 %v3011_v56, %v3038_v38  ;;  %v3117_v56 = vld [vmem:[%s6668_s5 + $0x28] sm:$0xff] }
 0x63f   : > { %v3065_v48 = vadd.f32 %v3058_v12, %v3055_v6 }
 0x641   : > { %v3073_v41 = vmax.f32 %v3065_v48, 0.0 }
 0x643   : > { %v3085_v3 = vmul.f32 %v3592_v53, %v3073_v41 }
 0x645   : > { %v3106_v37 = vsel %vm6726_vm11, %v3085_v3, 0.0 }
 0x646   : > { %v3040_v35 = vpop.permute.xlu2 %3039  ;;  %3107 = vadd.xlane.f32.xlu2 %v3106_v37  ;;  %v3119_v37 = vld [vmem:[%s6668_s5 + $0x38] sm:$0xff] }
 0x647   : > { %v3056_v39 = vmax.f32 %v3014_v63, %v3040_v35 }
 0x649   : > { %v3066_v18 = vadd.f32 %v3058_v12, %v3056_v39  ;;  %v3116_v12 = vld [vmem:[%s6668_s5 + $0x20] sm:$0xff] }
 0x64b   : > { %v3074_v49 = vmax.f32 %v3066_v18, 0.0  ;;  %v3593_v18 = vld [vmem:[%s6669_s6] ss:$0 sm:$0xff] }
 0x64d   : > { %v3086_v54 = vmul.f32 %v3592_v53, %v3074_v49 }
 0x64f   : > { %v3109_v31 = vsel %vm6726_vm11, %v3086_v54, 0.0 }
 0x650   : > { %3110 = vadd.xlane.f32.xlu0 %v3109_v31 }
 0x659   : > { %v3093_v25 = vpop.xlane.xlu0 %3092 }
 0x65a   : > { %v3121_v57 = vmul.f32 %v3113_v5, %v3093_v25 }
 0x65c   : > { %v3135_v16 = vsel %vm6726_vm11, %v3121_v57, 0.0 }
 0x65d   : > { %v3136_v51 = vrot.slane %v3135_v16, 4 }
 0x65f   : > { %v3137_v29 = vadd.f32 %v3136_v51, %v3135_v16 }
 0x661   : > { %v3138_v50 = vrot.slane %v3137_v29, 2 }
 0x663   : > { %v3139_v32 = vadd.f32 %v3138_v50, %v3137_v29 }
 0x665   : > { %v3140_v14 = vrot.slane %v3139_v32, 1 }
 0x667   : > { %v3096_v36 = vpop.xlane.xlu1 %3095  ;;  %v3141_v49 = vadd.f32 %v3140_v14, %v3139_v32 }
 0x668   : > { %v3122_v13 = vmul.f32 %v3114_v62, %v3096_v36 }
 0x669   : > { %v3189_v62 = vadd.f32 %v3593_v18, %v3141_v49 }
 0x66a   : > { %v3142_v40 = vsel %vm6726_vm11, %v3122_v13, 0.0 }
 0x66b   : > { %v3143_v63 = vrot.slane %v3142_v40, 4 }
 0x66d   : > { %v3144_v10 = vadd.f32 %v3143_v63, %v3142_v40 }
 0x66f   : > { %v3145_v47 = vrot.slane %v3144_v10, 2 }
 0x671   : > { %v3146_v8 = vadd.f32 %v3145_v47, %v3144_v10 }
 0x673   : > { %v3147_v35 = vrot.slane %v3146_v8, 1 }
 0x688   : > { %v3090_v59 = vpop.xlane.xlu2 %3089 }
 0x689   : > { %v3120_v0 = vmul.f32 %v3112_v21, %v3090_v59  ;;  %v3148_v21 = vadd.f32 %v3147_v35, %v3146_v8 }
 0x68b   : > { %v3102_v28 = vpop.xlane.xlu0 %3101  ;;  %v3128_v23 = vsel %vm6726_vm11, %v3120_v0, 0.0  ;;  %v3190_v16 = vadd.f32 %v3593_v18, %v3148_v21 }
 0x68c   : > { %v3124_v24 = vmul.f32 %v3116_v12, %v3102_v28  ;;  %v3129_v26 = vrot.slane %v3128_v23, 4 }
 0x68e   : > { %v3156_v11 = vsel %vm6726_vm11, %v3124_v24, 0.0  ;;  %v3130_v22 = vadd.f32 %v3129_v26, %v3128_v23  ;;  %v3204_v23 = vrot.slane %v3189_v62, 7  ;;  %v3207_v26 = vrot.slane %v3190_v16, 6 }
 0x68f   : > { %v3157_v30 = vrot.slane %v3156_v11, 4 }
 0x690   : > { %v3099_v9 = vpop.xlane.xlu2 %3098  ;;  %v3131_v55 = vrot.slane %v3130_v22, 2 }
 0x691   : > { %v3123_v44 = vmul.f32 %v3115_v45, %v3099_v9  ;;  %v3158_v58 = vadd.f32 %v3157_v30, %v3156_v11 }
 0x692   : > { %v3132_v17 = vadd.f32 %v3131_v55, %v3130_v22 }
 0x693   : > { %v3149_v53 = vsel %vm6726_vm11, %v3123_v44, 0.0  ;;  %v3159_v34 = vrot.slane %v3158_v58, 2 }
 0x694   : > { %v3150_v19 = vrot.slane %v3149_v53, 4  ;;  %v3133_v6 = vrot.slane %v3132_v17, 1 }
 0x695   : > { %v3160_v39 = vadd.f32 %v3159_v34, %v3158_v58 }
 0x696   : > { %v3151_v7 = vadd.f32 %v3150_v19, %v3149_v53  ;;  %v3134_v36 = vadd.f32 %v3133_v6, %v3132_v17 }
 0x697   : > { %v3161_v45 = vrot.slane %v3160_v39, 1 }
 0x698   : > { %v3152_v1 = vrot.slane %v3151_v7, 2  ;;  %v3188_v44 = vadd.f32 %v3593_v18, %v3134_v36 }
 0x699   : > { %v3162_v12 = vadd.f32 %v3161_v45, %v3160_v39 }
 0x69a   : > { %v3153_v4 = vadd.f32 %v3152_v1, %v3151_v7 }
 0x69b   : > { %v3192_v19 = vadd.f32 %v3593_v18, %v3162_v12 }
 0x69c   : > { %v3154_v48 = vrot.slane %v3153_v4, 1 }
 0x69e   : > { %v3155_v25 = vadd.f32 %v3154_v48, %v3153_v4 }
 0x6a0   : > { %v3191_v13 = vadd.f32 %v3593_v18, %v3155_v25 }
 0x6a2   : > { %v3210_v51 = vrot.slane %v3191_v13, 5 }
 0x6ab   : > { %v3105_v15 = vpop.xlane.xlu1 %3104 }
 0x6ac   : > { %v3125_v2 = vmul.f32 %v3117_v56, %v3105_v15 }
 0x6ae   : > { %v3163_v52 = vsel %vm6726_vm11, %v3125_v2, 0.0  ;;  %v3206_v2 = vsel %vm3205_vm12, %v3204_v23, %v3188_v44 }
 0x6af   : > { %v3164_v60 = vrot.slane %v3163_v52, 4  ;;  %v3209_v29 = vsel %vm6732_vm13, %v3207_v26, %v3206_v2 }
 0x6b0   : > { %v3212_v7 = vsel %vm6731_vm14, %v3210_v51, %v3209_v29 }
 0x6b1   : > { %v3165_v27 = vadd.f32 %v3164_v60, %v3163_v52  ;;  %v3213_v60 = vrot.slane %v3192_v19, 4 }
 0x6b3   : > { %v3166_v33 = vrot.slane %v3165_v27, 2  ;;  %v3215_v50 = vsel %vm6730_vm15, %v3213_v60, %v3212_v7 }
 0x6b5   : > { %v3167_v41 = vadd.f32 %v3166_v33, %v3165_v27 }
 0x6b7   : > { %v3168_v5 = vrot.slane %v3167_v41, 1 }
 0x6b9   : > { %v3108_v20 = vpop.xlane.xlu2 %3107  ;;  %v3169_v56 = vadd.f32 %v3168_v5, %v3167_v41 }
 0x6ba   : > { %v3126_v42 = vmul.f32 %v3118_v46, %v3108_v20 }
 0x6bb   : > { %v3193_v40 = vadd.f32 %v3593_v18, %v3169_v56 }
 0x6bc   : > { %v3170_v43 = vsel %vm6726_vm11, %v3126_v42, 0.0 }
 0x6bd   : > { %v3171_v61 = vrot.slane %v3170_v43, 4  ;;  %v3216_v11 = vrot.slane %v3193_v40, 3 }
 0x6bf   : > { %v3172_v38 = vadd.f32 %v3171_v61, %v3170_v43  ;;  %v3218_v46 = vsel %vm6729_vm0, %v3216_v11, %v3215_v50 }
 0x6c1   : > { %v3173_v3 = vrot.slane %v3172_v38, 2 }
 0x6c3   : > { %v3174_v54 = vadd.f32 %v3173_v3, %v3172_v38  ;;  %v3111_v31 = vpop.xlane.xlu0 %3110 }
 0x6c4   : > { %v3127_v59 = vmul.f32 %v3119_v37, %v3111_v31 }
 0x6c5   : > { %v3175_v9 = vrot.slane %v3174_v54, 1 }
 0x6c6   : > { %v3177_v57 = vsel %vm6726_vm11, %v3127_v59, 0.0 }
 0x6c7   : > { %v3178_v0 = vrot.slane %v3177_v57, 4  ;;  %v3176_v28 = vadd.f32 %v3175_v9, %v3174_v54 }
 0x6c9   : > { %v3179_v15 = vadd.f32 %v3178_v0, %v3177_v57  ;;  %v3194_v63 = vadd.f32 %v3593_v18, %v3176_v28 }
 0x6cb   : > { %v3180_v53 = vrot.slane %v3179_v15, 2  ;;  %v3219_v10 = vrot.slane %v3194_v63, 2 }
 0x6cd   : > { %v3181_v24 = vadd.f32 %v3180_v53, %v3179_v15  ;;  %v3221_v1 = vsel %vm6728_vm1, %v3219_v10, %v3218_v46 }
 0x6cf   : > { %v3182_v52 = vrot.slane %v3181_v24, 1 }
 0x6d1   : > { %v3183_v22 = vadd.f32 %v3182_v52, %v3181_v24 }
 0x6d3   : > { %v3195_v30 = vadd.f32 %v3593_v18, %v3183_v22 }
 0x6d5   : > { %v3222_v55 = vrot.slane %v3195_v30, 1 }
 0x6d7   : > { %v3224_v27 = vsel %vm6727_vm2, %v3222_v55, %v3221_v1 }
 0x6d8   : > { %v3226_v20 = vsel %vm6726_vm11, %v3224_v27, -inf }
 0x6d9   : > { %3227 = vmax.xlane.f32.xlu1 %v3226_v20 }
 0x74c   : > { %v3228_v47 = vpop.xlane.xlu1 %3227 }
 0x74d   : > { %v3230_v58 = vrot.slane %v3228_v47, 1  ;;  %v3231_v42 = vrot.slane %v3228_v47, 2  ;;  %v3232_v32 = vrot.slane %v3228_v47, 3  ;;  %v3233_v43 = vrot.slane %v3228_v47, 4 }
 0x74e   : > { %v3234_v17 = vrot.slane %v3228_v47, 5  ;;  %v3235_v4 = vrot.slane %v3228_v47, 6  ;;  %v3236_v33 = vrot.slane %v3228_v47, 7  ;;  %v3245_v61 = vsub.f32 %v3188_v44, %v3228_v47 }
 0x74f   : > { %v3246_v8 = vsub.f32 %v3189_v62, %v3230_v58  ;;  %v3247_v34 = vsub.f32 %v3190_v16, %v3231_v42  ;;  %v3248_v14 = vsub.f32 %v3191_v13, %v3232_v32  ;;  %v3249_v38 = vsub.f32 %v3192_v19, %v3233_v43 }
 0x750   : > { %v3250_v6 = vsub.f32 %v3193_v40, %v3234_v17  ;;  %v3253_v48 = vmul.f32 1.442695, %v3245_v61  ;;  %v3251_v41 = vsub.f32 %v3194_v63, %v3235_v4  ;;  %v3252_v39 = vsub.f32 %v3195_v30, %v3236_v33 }
 0x751   : > { %v3255_v3 = vmul.f32 1.442695, %v3246_v8  ;;  %v3257_v37 = vmul.f32 1.442695, %v3247_v34  ;;  %v3259_v35 = vmul.f32 1.442695, %v3248_v14 }
 0x752   : > { %3594 = vpow2.f32 %v3253_v48  ;;  %v3261_v18 = vmul.f32 1.442695, %v3249_v38  ;;  %v3263_v49 = vmul.f32 1.442695, %v3250_v6  ;;  %v3265_v54 = vmul.f32 1.442695, %v3251_v41 }
 0x753   : > { %3596 = vpow2.f32 %v3255_v3  ;;  %v3267_v31 = vmul.f32 1.442695, %v3252_v39 }
 0x754   : > { %3598 = vpow2.f32 %v3257_v37 }
 0x755   : > { %3600 = vpow2.f32 %v3259_v35 }
 0x756   : > { %3602 = vpow2.f32 %v3261_v18 }
 0x757   : > { %3604 = vpow2.f32 %v3263_v49 }
 0x758   : > { %v6503_v59 = vpop.eup %3594  ;;  %3606 = vpow2.f32 %v3265_v54 }
 0x759   : > { %v6505_v36 = vpop.eup %3596  ;;  %3608 = vpow2.f32 %v3267_v31 }
 0x75a   : > { %v6507_v25 = vpop.eup %3598  ;;  %v3277_v5 = vrot.slane %v6505_v36, 7 }
 0x75b   : > { %v6510_v21 = vpop.eup %3600  ;;  %v3279_v45 = vrot.slane %v6507_v25, 6 }
 0x75c   : > { %v6513_v9 = vpop.eup %3602  ;;  %v3278_v57 = vsel %vm3205_vm12, %v3277_v5, %v6503_v59  ;;  %v3281_v62 = vrot.slane %v6510_v21, 5 }
 0x75d   : > { %v6518_v0 = vpop.eup %3604  ;;  %v3280_v44 = vsel %vm6732_vm13, %v3279_v45, %v3278_v57  ;;  %v3283_v13 = vrot.slane %v6513_v9, 4 }
 0x75e   : > { %v6522_v56 = vpop.eup %3606  ;;  %v3282_v15 = vsel %vm6731_vm14, %v3281_v62, %v3280_v44  ;;  %v3285_v16 = vrot.slane %v6518_v0, 3 }
 0x75f   : > { %v6526_v12 = vpop.eup %3608  ;;  %v3284_v28 = vsel %vm6730_vm15, %v3283_v13, %v3282_v15  ;;  %v3287_v23 = vrot.slane %v6522_v56, 2 }
 0x760   : > { %v3286_v53 = vsel %vm6729_vm0, %v3285_v16, %v3284_v28  ;;  %v3289_v2 = vrot.slane %v6526_v12, 1 }
 0x761   : > { %v3288_v51 = vsel %vm6728_vm1, %v3287_v23, %v3286_v53 }
 0x762   : > { %v3290_v40 = vsel %vm6727_vm2, %v3289_v2, %v3288_v51 }
 0x763   : > { %v3292_v24 = vsel %vm6726_vm11, %v3290_v40, 0.0 }
 0x764   : > { %3293 = vadd.xlane.f32.xlu2 %v3292_v24 }
 0x7d7   : > { %v3294_v26 = vpop.xlane.xlu2 %3293 }
 0x7d8   : > { %v3296_v19 = vrot.slane %v3294_v26, 1  ;;  %v6535_v63 = vrot.slane %v3294_v26, 2  ;;  %v6537_v52 = vrot.slane %v3294_v26, 3  ;;  %3610 = vrcp.f32 %v3294_v26 }
 0x7d9   : > { %v6539_v29 = vrot.slane %v3294_v26, 4  ;;  %v3322_v11 = vand.u32 2147483648, %v3294_v26  ;;  %v6543_v60 = vrot.slane %v3294_v26, 5  ;;  %v6545_v10 = vrot.slane %v3294_v26, 6 }
 0x7da   : > { %3612 = vrcp.f32 %v3296_v19  ;;  %v3335_v22 = vand.u32 2147483647, %v3296_v19  ;;  %v3337_v7 = vand.u32 2147483648, %v3296_v19  ;;  %v6547_v30 = vrot.slane %v3294_v26, 7 }
 0x7db   : > { %3614 = vrcp.f32 %v6535_v63  ;;  %v3350_v50 = vand.u32 2147483647, %v6535_v63  ;;  %vm3316_vm3 = vweird.f32 %v3294_v26  ;;  %v3320_v55 = vand.u32 2147483647, %v3294_v26 }
 0x7dc   : > { %3616 = vrcp.f32 %v6537_v52  ;;  %v3352_v1 = vand.u32 2147483648, %v6535_v63  ;;  %v3323_v47 = vor.u32 1.1754944e-38, %v3322_v11  ;;  %vm3331_vm4 = vweird.f32 %v3296_v19 }
 0x7dd   : > { %3618 = vrcp.f32 %v6539_v29  ;;  %vm3346_vm5 = vweird.f32 %v6535_v63  ;;  %vm6556_vm6 = vcmp.eq.f32.partialorder %v3335_v22, 8.507059e+37  ;;  %v3338_v43 = vor.u32 1.1754944e-38, %v3337_v7 }
 0x7de   : > { %v6550_v46 = vpop.eup %3610  ;;  %v3365_v17 = vand.u32 2147483647, %v6537_v52  ;;  %vm6562_vm7 = vcmp.eq.f32.partialorder %v3350_v50, 8.507059e+37  ;;  %vm3361_vm8 = vweird.f32 %v6537_v52  ;;  %v3367_v8 = vand.u32 2147483648, %v6537_v52 }
 0x7df   : > { %v3312_v20 = vmul.f32 %v6550_v46, %v3294_v26  ;;  %3620 = vrcp.f32 %v6543_v60  ;;  %vm3317_vm9 = vweird.f32 %v6550_v46  ;;  %vm6570_vm10 = vcmp.eq.f32.partialorder %v3320_v55, 8.507059e+37 }
 0x7e0   : > { %v3613_v27 = vpop.eup %3612  ;;  %v3353_v6 = vor.u32 1.1754944e-38, %v3352_v1  ;;  %v3380_v48 = vand.u32 2147483647, %v6539_v29  ;;  %v3382_v18 = vand.u32 2147483648, %v6539_v29  ;;  %3622 = vrcp.f32 %v6545_v10  ;;  %vm6584_vm1 = vmor %vm3316_vm3, %vm3317_vm9 }
 0x7e1   : > { %v3615_v58 = vpop.eup %3614  ;;  %v3327_v42 = vmul.f32 %v3613_v27, %v3296_v19  ;;  %v3313_v4 = vsub.f32 1.0, %v3312_v20  ;;  %vm3332_vm11 = vweird.f32 %v3613_v27  ;;  %vm6588_vm0 = vcmp.eq.f32.partialorder %v3365_v17, 8.507059e+37 }
 0x7e2   : > { %v3342_v33 = vmul.f32 %v3615_v58, %v6535_v63  ;;  %v3617_v34 = vpop.eup %3616  ;;  %vm3347_vm2 = vweird.f32 %v3615_v58  ;;  %v3368_v44 = vor.u32 1.1754944e-38, %v3367_v8  ;;  %vm3376_vm15 = vweird.f32 %v6539_v29  ;;  %vm3333_vm14 = vmor %vm3331_vm4, %vm3332_vm11 }
 0x7e3   : > { %v3328_v38 = vsub.f32 1.0, %v3327_v42  ;;  %v3314_v41 = vmul.f32 %v6550_v46, %v3313_v4  ;;  %v3357_v37 = vmul.f32 %v3617_v34, %v6537_v52  ;;  %v3619_v35 = vpop.eup %3618  ;;  %vm3362_vm13 = vweird.f32 %v3617_v34  ;;  %vm3348_vm9 = vmor %vm3346_vm5, %vm3347_vm2 }
 0x7e4   : > { %v3343_v3 = vsub.f32 1.0, %v3342_v33  ;;  %v3372_v5 = vmul.f32 %v3619_v35, %v6539_v29  ;;  %vm6595_vm3 = vcmp.eq.f32.partialorder %v3380_v48, 8.507059e+37  ;;  %v3383_v51 = vor.u32 1.1754944e-38, %v3382_v18  ;;  %vm3363_vm11 = vmor %vm3361_vm8, %vm3362_vm13 }
 0x7e5   : > { %v3329_v39 = vmul.f32 %v3613_v27, %v3328_v38  ;;  %v3315_v49 = vadd.f32 %v6550_v46, %v3314_v41  ;;  %v3358_v31 = vsub.f32 1.0, %v3357_v37  ;;  %v3621_v13 = vpop.eup %3620  ;;  %v3397_v11 = vand.u32 2147483648, %v6543_v60 }
 0x7e6   : > { %v3344_v54 = vmul.f32 %v3615_v58, %v3343_v3  ;;  %v3373_v28 = vsub.f32 1.0, %v3372_v5  ;;  %v3387_v40 = vmul.f32 %v3621_v13, %v6543_v60  ;;  %v3623_v22 = vpop.eup %3622  ;;  %vm3391_vm2 = vweird.f32 %v6543_v60 }
 0x7e7   : > { %v3330_v57 = vadd.f32 %v3613_v27, %v3329_v39  ;;  %v3359_v16 = vmul.f32 %v3617_v34, %v3358_v31  ;;  %v3319_v53 = vsel %vm6584_vm1, %v6550_v46, %v3315_v49  ;;  %vm3392_vm1 = vweird.f32 %v3621_v13 }
 0x7e8   : > { %v3345_v15 = vadd.f32 %v3615_v58, %v3344_v54  ;;  %v3374_v50 = vmul.f32 %v3619_v35, %v3373_v28  ;;  %v3388_v63 = vsub.f32 1.0, %v3387_v40  ;;  %v3324_v46 = vsel %vm6570_vm10, %v3323_v47, %v3319_v53 }
 0x7e9   : > { %v3334_v2 = vsel %vm3333_vm14, %v3613_v27, %v3330_v57  ;;  %v3360_v19 = vadd.f32 %v3617_v34, %v3359_v16  ;;  %vm3377_vm14 = vweird.f32 %v3619_v35  ;;  %v3402_v1 = vmul.f32 %v3623_v22, %v6545_v10 }
 0x7ea   : > { %v3339_v24 = vsel %vm6556_vm6, %v3338_v43, %v3334_v2  ;;  %v3349_v26 = vsel %vm3348_vm9, %v3615_v58, %v3345_v15  ;;  %v3375_v58 = vadd.f32 %v3619_v35, %v3374_v50  ;;  %v3389_v42 = vmul.f32 %v3621_v13, %v3388_v63  ;;  %vm3378_vm13 = vmor %vm3376_vm15, %vm3377_vm14 }
 0x7eb   : > { %v3354_v7 = vsel %vm6562_vm7, %v3353_v6, %v3349_v26  ;;  %v3364_v55 = vsel %vm3363_vm11, %v3617_v34, %v3360_v19  ;;  %v3340_v27 = vmul.f32 %v6505_v36, %v3339_v24  ;;  %v3403_v32 = vsub.f32 1.0, %v3402_v1 }
 0x7ec   : > { %v3369_v20 = vsel %vm6588_vm0, %v3368_v44, %v3364_v55  ;;  %v3355_v52 = vmul.f32 %v6507_v25, %v3354_v7  ;;  %3624 = vrcp.f32 %v6547_v30  ;;  %v3379_v47 = vsel %vm3378_vm13, %v3619_v35, %v3375_v58  ;;  %vm6628_vm0 = vmor %vm3391_vm2, %vm3392_vm1 }
 0x7ed   : > { %v3390_v43 = vadd.f32 %v3621_v13, %v3389_v42  ;;  %v3395_v17 = vand.u32 2147483647, %v6543_v60  ;;  %v3398_v36 = vor.u32 1.1754944e-38, %v3397_v11  ;;  %v3325_v4 = vmul.f32 %v6503_v59, %v3324_v46 }
 0x7ee   : > { %v3370_v33 = vmul.f32 %v6510_v21, %v3369_v20  ;;  %v3404_v29 = vmul.f32 %v3623_v22, %v3403_v32  ;;  %vm3407_vm15 = vweird.f32 %v3623_v22  ;;  %v3384_v61 = vsel %vm6595_vm3, %v3383_v51, %v3379_v47 }
 0x7ef   : > { %v3394_v8 = vsel %vm6628_vm0, %v3621_v13, %v3390_v43  ;;  %v3412_v60 = vand.u32 2147483648, %v6545_v10  ;;  %v3439_v34 = vrot.slane %v3340_v27, 7  ;;  %vm3406_vm4 = vweird.f32 %v6545_v10 }
 0x7f0   : > { %v3405_v59 = vadd.f32 %v3623_v22, %v3404_v29  ;;  %v3410_v21 = vand.u32 2147483647, %v6545_v10  ;;  %v3441_v14 = vrot.slane %v3355_v52, 6  ;;  %vm3396_vm5 = vcmp.eq.f32.partialorder %v3395_v17, 8.507059e+37  ;;  %vm3408_vm6 = vmor %vm3406_vm4, %vm3407_vm15 }
 0x7f1   : > { %v3440_v38 = vsel %vm3205_vm12, %v3439_v34, %v3325_v4  ;;  %v3385_v48 = vmul.f32 %v6513_v9, %v3384_v61  ;;  %v3399_v41 = vsel %vm3396_vm5, %v3398_v36, %v3394_v8  ;;  %vm6861_vm7 = vcmask 1042434  }
 0x7f2   : > { %v3625_v6 = vpop.eup %3624  ;;  %v3409_v3 = vsel %vm3408_vm6, %v3623_v22, %v3405_v59  ;;  %v3442_v37 = vsel %vm6861_vm7, %v3441_v14, %v3440_v38  ;;  %v3413_v35 = vor.u32 1.1754944e-38, %v3412_v60  ;;  %v3443_v18 = vrot.slane %v3370_v33, 5 }
 0x7f3   : > { %v3417_v39 = vmul.f32 %v3625_v6, %v6547_v30  ;;  %vm3411_vm8 = vcmp.eq.f32.partialorder %v3410_v21, 8.507059e+37  ;;  %v3400_v10 = vmul.f32 %v6518_v0, %v3399_v41  ;;  %vm6862_vm10 = vcmask 1043459  }
 0x7f4   : > { %v3414_v49 = vsel %vm3411_vm8, %v3413_v35, %v3409_v3  ;;  %v3444_v31 = vsel %vm6862_vm10, %v3443_v18, %v3442_v37  ;;  %v3427_v5 = vand.u32 2147483648, %v6547_v30  ;;  %v3445_v9 = vrot.slane %v3385_v48, 4 }
 0x7f5   : > { %v3418_v54 = vsub.f32 1.0, %v3417_v39  ;;  %vm3422_vm12 = vweird.f32 %v3625_v6  ;;  %v3425_v57 = vand.u32 2147483647, %v6547_v30  ;;  %v3415_v62 = vmul.f32 %v6522_v56, %v3414_v49 }
 0x7f6   : > { %vm6863_vm3 = vcmask 1044484   ;;  %vm3421_vm9 = vweird.f32 %v6547_v30  ;;  %v3447_v0 = vrot.slane %v3400_v10, 3  ;;  %v3428_v15 = vor.u32 1.1754944e-38, %v3427_v5 }
 0x7f7   : > { %v3419_v45 = vmul.f32 %v3625_v6, %v3418_v54  ;;  %v3446_v44 = vsel %vm6863_vm3, %v3445_v9, %v3444_v31  ;;  %vm3423_vm11 = vmor %vm3421_vm9, %vm3422_vm12  ;;  %vm3426_vm14 = vcmp.eq.f32.partialorder %v3425_v57, 8.507059e+37  ;;  %vm6864_vm1 = vcmask 1045509  }
 0x7f8   : > { %v3448_v28 = vsel %vm6864_vm1, %v3447_v0, %v3446_v44  ;;  %v3449_v53 = vrot.slane %v3415_v62, 2  ;;  %vm6865_vm13 = vcmask 1046534   ;;  %vm6866_vm2 = vcmask 1047559  }
 0x7f9   : > { %v3420_v13 = vadd.f32 %v3625_v6, %v3419_v45  ;;  %vm6867_vm0 = vcmask 23552  }
 0x7fa   : > { %v3450_v51 = vsel %vm6865_vm13, %v3449_v53, %v3448_v28 }
 0x7fb   : > { %v3424_v16 = vsel %vm3423_vm11, %v3625_v6, %v3420_v13 }
 0x7fc   : > { %v3429_v23 = vsel %vm3426_vm14, %v3428_v15, %v3424_v16 }
 0x7fd   : > { %v3430_v2 = vmul.f32 %v6526_v12, %v3429_v23 }
 0x7ff   : > { %v3451_v56 = vrot.slane %v3430_v2, 1 }
 0x801   : > { %v3452_v30 = vsel %vm6866_vm2, %v3451_v56, %v3450_v51 }
 0x802   : > { %3454 = vst.msk [vmem:[%s322_s16] sm:$0xff] %vm6867_vm0, %v3452_v30 }
 0x803 PF: > { %s19_s27 = sadd.s32 1, %s3682_s27  }
 0x804   : > { %p16_p8 = scmp.ge.s32.totalorder %s19_s27, 4  }
 0x806   :  { %18 = sbr.rel (!%p16_p8) target bundleno = 1 (0x1), region = 87 }
 0x80b   :  { %3474 = vsyncpa [#allocation3], 1 }
 0x80c   :  { %3476 = vsyncpa [#allocation3 + $0x1], 1 }

</bundles_post_ra>
